<compile_context>
chip_gen: v7x
topology: tpu7x:2x2x1
jax: 0.10.0
libtpu: 0.0.40
codegen_flags: <defaults>
</compile_context>

<pallas_src>
import functools

import jax
import jax.numpy as jnp
from jax.experimental import pallas as pl
from jax.experimental.pallas import tpu as pltpu


def _conv3x3_bias_prelu_kernel(x_ref, w_ref, b_ref, a_ref, o_ref, acc_ref, *,
                               M, Wp, Cin):
    """One batch element: 3x3 conv (9 shifted matmuls) + bias + PReLU.

    x_ref : (1, (H+3)*Wp, Cin)  flattened zero-padded NHWC image
    w_ref : (9*Cin, Cout)       tap-major weights; rows [t*Cin:(t+1)*Cin] = W[kh,kw]^T
    b_ref : (1, Cout)           conv bias
    a_ref : (1, Cout)           PReLU slope (scalar broadcast)
    o_ref : (1, M, Cout)        "wide" conv output; M = H*Wp, cols W..Wp-1 are spill
    acc_ref: VMEM (M, Cout) f32 accumulator scratch
    """
    def tap(t):
        kh, kw = divmod(t, 3)
        xt = x_ref[0, pl.ds(kh * Wp + kw, M), :]          # (M, Cin), static offset
        wt = w_ref[pl.ds(t * Cin, Cin), :]                # (Cin, Cout), aligned offset
        return jnp.dot(xt, wt, preferred_element_type=jnp.float32)

    acc_ref[...] = tap(0)          # overwrite -> no carried state across grid steps
    for t in range(1, 9):
        acc_ref[...] += tap(t)

    y = acc_ref[...] + b_ref[...]
    o_ref[0, :, :] = jnp.where(y >= 0.0, y, a_ref[...] * y).astype(o_ref.dtype)


def subpixel_conv_forward(x_nchw, w_oihw, bias, alpha, *, r=2):
    """SubPixelConv forward. x: NCHW; returns NCHW (B, Cin, H*r, W*r)."""
    B, Cin, H, W = x_nchw.shape
    Cout, Cin2, kh, kw = w_oihw.shape
    assert Cin2 == Cin and kh == 3 and kw == 3 and Cout == Cin * r * r

    # NCHW -> NHWC, pad spatially by k//2=1; one extra bottom row keeps every
    # tap's flattened slab in bounds.
    x = jnp.transpose(x_nchw, (0, 2, 3, 1)).astype(jnp.float32)
    xp = jnp.pad(x, ((0, 0), (1, 2), (1, 1), (0, 0)))
    Wp = W + 2
    Hp_ext = H + 3
    x_flat = xp.reshape(B, Hp_ext * Wp, Cin)

    # (Cout, Cin, 3, 3) -> (3, 3, Cin, Cout) -> (9*Cin, Cout): tap-major rows.
    w2 = jnp.transpose(w_oihw, (2, 3, 1, 0)).reshape(9 * Cin, Cout).astype(jnp.float32)
    b2 = bias.reshape(1, Cout).astype(jnp.float32)
    a2 = jnp.broadcast_to(jnp.asarray(alpha, jnp.float32).reshape(1, 1), (1, Cout))

    M = H * Wp   # rows of the "wide" conv output per batch element

    kernel = functools.partial(_conv3x3_bias_prelu_kernel, M=M, Wp=Wp, Cin=Cin)
    out_wide = pl.pallas_call(
        kernel,
        out_shape=jax.ShapeDtypeStruct((B, M, Cout), jnp.float32),
        grid_spec=pltpu.PrefetchScalarGridSpec(
            num_scalar_prefetch=0,
            grid=(B,),
            in_specs=[
                pl.BlockSpec((1, Hp_ext * Wp, Cin), lambda b: (b, 0, 0)),
                pl.BlockSpec((9 * Cin, Cout), lambda b: (0, 0)),
                pl.BlockSpec((1, Cout), lambda b: (0, 0)),
                pl.BlockSpec((1, Cout), lambda b: (0, 0)),
            ],
            out_specs=pl.BlockSpec((1, M, Cout), lambda b: (b, 0, 0)),
            scratch_shapes=[pltpu.VMEM((M, Cout), jnp.float32)],
        ),
        compiler_params=pltpu.CompilerParams(
            dimension_semantics=("parallel",),      # independent per image (v7x megacore)
            vmem_limit_bytes=32 * 1024 * 1024,
        ),
    )(x_flat, w2, b2, a2)

    # Drop the spill columns -> (B, H, W, Cout), then PixelShuffle (pure layout)
    # and return NCHW.  Conv channel c*r^2 + i*r + j -> output pixel (h*r+i, w*r+j, c).
    y = out_wide.reshape(B, H, Wp, Cout)[:, :, :W, :]
    y = y.reshape(B, H, W, Cin, r, r)
    y = jnp.transpose(y, (0, 1, 4, 2, 5, 3)).reshape(B, H * r, W * r, Cin)
    return jnp.transpose(y, (0, 3, 1, 2))


if __name__ == "__main__":
    key = jax.random.PRNGKey(0)
    kx, kw, kb = jax.random.split(key, 3)

    # Module defaults: in_channels=64, scaling_factor=2, kernel_size=3; small input.
    B, Cin, H, W, r = 2, 64, 16, 16, 2
    Cout = Cin * r * r

    x = jax.random.normal(kx, (B, Cin, H, W), jnp.float32)
    w = 0.05 * jax.random.normal(kw, (Cout, Cin, 3, 3), jnp.float32)
    b = 0.05 * jax.random.normal(kb, (Cout,), jnp.float32)
    alpha = jnp.float32(0.25)   # nn.PReLU() default single parameter

    fwd = jax.jit(functools.partial(subpixel_conv_forward, r=r))
    out = jax.block_until_ready(fwd(x, w, b, alpha))
    assert out.shape == (B, Cin, H * r, W * r), out.shape
    assert bool(jnp.all(jnp.isfinite(out)))

    # Pure-JAX reference: conv -> +bias -> PixelShuffle -> PReLU.
    ref = jax.lax.conv_general_dilated(
        x, w, window_strides=(1, 1), padding=((1, 1), (1, 1)),
        dimension_numbers=("NCHW", "OIHW", "NCHW"),
        precision=jax.lax.Precision.HIGHEST) + b[None, :, None, None]
    ref = ref.reshape(B, Cin, r, r, H, W)
    ref = jnp.transpose(ref, (0, 1, 4, 2, 5, 3)).reshape(B, Cin, H * r, W * r)
    ref = jnp.where(ref >= 0.0, ref, 0.25 * ref)
    assert bool(jnp.allclose(out, ref, atol=2e-2, rtol=2e-2)), \
        float(jnp.max(jnp.abs(out - ref)))

    print("KERNEL_OK")
</pallas_src>

<mosaic_0001>
module attributes {stable_mosaic.version = 11 : i64} {
  func.func @_conv3x3_bias_prelu_kernel(%arg0: i32, %arg1: memref<1x342x64xf32, #tpu.memory_space<vmem>>, %arg2: memref<576x256xf32, #tpu.memory_space<vmem>>, %arg3: memref<1x256xf32, #tpu.memory_space<vmem>>, %arg4: memref<1x256xf32, #tpu.memory_space<vmem>>, %arg5: memref<1x288x256xf32, #tpu.memory_space<vmem>>, %arg6: memref<288x256xf32, #tpu.memory_space<vmem>>) attributes {dimension_semantics = [#tpu.dimension_semantics<parallel>], iteration_bounds = array<i64: 2>, scalar_prefetch = 0 : i64, scratch_operands = 1 : i64, tpu.core_type = #tpu.core_type<tc>, window_params = [{transform_indices = @transform_0, window_bounds = array<i64: 1, 342, 64>}, {pipeline_mode = #tpu.pipeline_mode<synchronous>, transform_indices = @transform_1, window_bounds = array<i64: 576, 256>}, {pipeline_mode = #tpu.pipeline_mode<synchronous>, transform_indices = @transform_2, window_bounds = array<i64: 1, 256>}, {pipeline_mode = #tpu.pipeline_mode<synchronous>, transform_indices = @transform_3, window_bounds = array<i64: 1, 256>}, {transform_indices = @transform_4, window_bounds = array<i64: 1, 288, 256>}]} {
    %c0 = arith.constant 0 : index
    %c0_0 = arith.constant 0 : index
    %c0_1 = arith.constant 0 : index
    %0 = vector.load %arg1[%c0, %c0_0, %c0_1] : memref<1x342x64xf32, #tpu.memory_space<vmem>>, vector<1x288x64xf32>
    %1 = vector.shape_cast %0 : vector<1x288x64xf32> to vector<288x64xf32>
    %c0_2 = arith.constant 0 : index
    %c0_3 = arith.constant 0 : index
    %2 = vector.load %arg2[%c0_2, %c0_3] : memref<576x256xf32, #tpu.memory_space<vmem>>, vector<64x256xf32>
    %cst = arith.constant dense<0.000000e+00> : vector<288x256xf32>
    %3 = tpu.matmul %1, %2, %cst {dimension_numbers = #tpu.dot_dimension_numbers<[1], [0], [0], [1], [0, 0, 1, 1], [], []>} : vector<288x64xf32>, vector<64x256xf32>, vector<288x256xf32> -> vector<288x256xf32>
    %c0_4 = arith.constant 0 : index
    %c0_5 = arith.constant 0 : index
    %4 = vector.load %arg6[%c0_4, %c0_5] : memref<288x256xf32, #tpu.memory_space<vmem>>, vector<288x256xf32>
    tpu.vector_store %arg6[%c0_4, %c0_5], %3 {strides = array<i32>} : memref<288x256xf32, #tpu.memory_space<vmem>>, vector<288x256xf32>,
    %c0_6 = arith.constant 0 : index
    %c0_7 = arith.constant 0 : index
    %5 = vector.load %arg6[%c0_6, %c0_7] : memref<288x256xf32, #tpu.memory_space<vmem>>, vector<288x256xf32>
    %c0_8 = arith.constant 0 : index
    %c1 = arith.constant 1 : index
    %c0_9 = arith.constant 0 : index
    %6 = vector.load %arg1[%c0_8, %c1, %c0_9] : memref<1x342x64xf32, #tpu.memory_space<vmem>>, vector<1x288x64xf32>
    %7 = vector.shape_cast %6 : vector<1x288x64xf32> to vector<288x64xf32>
    %c64 = arith.constant 64 : index
    %c0_10 = arith.constant 0 : index
    %8 = vector.load %arg2[%c64, %c0_10] : memref<576x256xf32, #tpu.memory_space<vmem>>, vector<64x256xf32>
    %cst_11 = arith.constant dense<0.000000e+00> : vector<288x256xf32>
    %9 = tpu.matmul %7, %8, %cst_11 {dimension_numbers = #tpu.dot_dimension_numbers<[1], [0], [0], [1], [0, 0, 1, 1], [], []>} : vector<288x64xf32>, vector<64x256xf32>, vector<288x256xf32> -> vector<288x256xf32>
    %10 = arith.addf %5, %9 : vector<288x256xf32>
    %c0_12 = arith.constant 0 : index
    %c0_13 = arith.constant 0 : index
    %11 = vector.load %arg6[%c0_12, %c0_13] : memref<288x256xf32, #tpu.memory_space<vmem>>, vector<288x256xf32>
    tpu.vector_store %arg6[%c0_12, %c0_13], %10 {strides = array<i32>} : memref<288x256xf32, #tpu.memory_space<vmem>>, vector<288x256xf32>,
    %c0_14 = arith.constant 0 : index
    %c0_15 = arith.constant 0 : index
    %12 = vector.load %arg6[%c0_14, %c0_15] : memref<288x256xf32, #tpu.memory_space<vmem>>, vector<288x256xf32>
    %c0_16 = arith.constant 0 : index
    %c2 = arith.constant 2 : index
    %c0_17 = arith.constant 0 : index
    %13 = vector.load %arg1[%c0_16, %c2, %c0_17] : memref<1x342x64xf32, #tpu.memory_space<vmem>>, vector<1x288x64xf32>
    %14 = vector.shape_cast %13 : vector<1x288x64xf32> to vector<288x64xf32>
    %c128 = arith.constant 128 : index
    %c0_18 = arith.constant 0 : index
    %15 = vector.load %arg2[%c128, %c0_18] : memref<576x256xf32, #tpu.memory_space<vmem>>, vector<64x256xf32>
    %cst_19 = arith.constant dense<0.000000e+00> : vector<288x256xf32>
    %16 = tpu.matmul %14, %15, %cst_19 {dimension_numbers = #tpu.dot_dimension_numbers<[1], [0], [0], [1], [0, 0, 1, 1], [], []>} : vector<288x64xf32>, vector<64x256xf32>, vector<288x256xf32> -> vector<288x256xf32>
    %17 = arith.addf %12, %16 : vector<288x256xf32>
    %c0_20 = arith.constant 0 : index
    %c0_21 = arith.constant 0 : index
    %18 = vector.load %arg6[%c0_20, %c0_21] : memref<288x256xf32, #tpu.memory_space<vmem>>, vector<288x256xf32>
    tpu.vector_store %arg6[%c0_20, %c0_21], %17 {strides = array<i32>} : memref<288x256xf32, #tpu.memory_space<vmem>>, vector<288x256xf32>,
    %c0_22 = arith.constant 0 : index
    %c0_23 = arith.constant 0 : index
    %19 = vector.load %arg6[%c0_22, %c0_23] : memref<288x256xf32, #tpu.memory_space<vmem>>, vector<288x256xf32>
    %c0_24 = arith.constant 0 : index
    %c18 = arith.constant 18 : index
    %c0_25 = arith.constant 0 : index
    %20 = vector.load %arg1[%c0_24, %c18, %c0_25] : memref<1x342x64xf32, #tpu.memory_space<vmem>>, vector<1x288x64xf32>
    %21 = vector.shape_cast %20 : vector<1x288x64xf32> to vector<288x64xf32>
    %c192 = arith.constant 192 : index
    %c0_26 = arith.constant 0 : index
    %22 = vector.load %arg2[%c192, %c0_26] : memref<576x256xf32, #tpu.memory_space<vmem>>, vector<64x256xf32>
    %cst_27 = arith.constant dense<0.000000e+00> : vector<288x256xf32>
    %23 = tpu.matmul %21, %22, %cst_27 {dimension_numbers = #tpu.dot_dimension_numbers<[1], [0], [0], [1], [0, 0, 1, 1], [], []>} : vector<288x64xf32>, vector<64x256xf32>, vector<288x256xf32> -> vector<288x256xf32>
    %24 = arith.addf %19, %23 : vector<288x256xf32>
    %c0_28 = arith.constant 0 : index
    %c0_29 = arith.constant 0 : index
    %25 = vector.load %arg6[%c0_28, %c0_29] : memref<288x256xf32, #tpu.memory_space<vmem>>, vector<288x256xf32>
    tpu.vector_store %arg6[%c0_28, %c0_29], %24 {strides = array<i32>} : memref<288x256xf32, #tpu.memory_space<vmem>>, vector<288x256xf32>,
    %c0_30 = arith.constant 0 : index
    %c0_31 = arith.constant 0 : index
    %26 = vector.load %arg6[%c0_30, %c0_31] : memref<288x256xf32, #tpu.memory_space<vmem>>, vector<288x256xf32>
    %c0_32 = arith.constant 0 : index
    %c19 = arith.constant 19 : index
    %c0_33 = arith.constant 0 : index
    %27 = vector.load %arg1[%c0_32, %c19, %c0_33] : memref<1x342x64xf32, #tpu.memory_space<vmem>>, vector<1x288x64xf32>
    %28 = vector.shape_cast %27 : vector<1x288x64xf32> to vector<288x64xf32>
    %c256 = arith.constant 256 : index
    %c0_34 = arith.constant 0 : index
    %29 = vector.load %arg2[%c256, %c0_34] : memref<576x256xf32, #tpu.memory_space<vmem>>, vector<64x256xf32>
    %cst_35 = arith.constant dense<0.000000e+00> : vector<288x256xf32>
    %30 = tpu.matmul %28, %29, %cst_35 {dimension_numbers = #tpu.dot_dimension_numbers<[1], [0], [0], [1], [0, 0, 1, 1], [], []>} : vector<288x64xf32>, vector<64x256xf32>, vector<288x256xf32> -> vector<288x256xf32>
    %31 = arith.addf %26, %30 : vector<288x256xf32>
    %c0_36 = arith.constant 0 : index
    %c0_37 = arith.constant 0 : index
    %32 = vector.load %arg6[%c0_36, %c0_37] : memref<288x256xf32, #tpu.memory_space<vmem>>, vector<288x256xf32>
    tpu.vector_store %arg6[%c0_36, %c0_37], %31 {strides = array<i32>} : memref<288x256xf32, #tpu.memory_space<vmem>>, vector<288x256xf32>,
    %c0_38 = arith.constant 0 : index
    %c0_39 = arith.constant 0 : index
    %33 = vector.load %arg6[%c0_38, %c0_39] : memref<288x256xf32, #tpu.memory_space<vmem>>, vector<288x256xf32>
    %c0_40 = arith.constant 0 : index
    %c20 = arith.constant 20 : index
    %c0_41 = arith.constant 0 : index
    %34 = vector.load %arg1[%c0_40, %c20, %c0_41] : memref<1x342x64xf32, #tpu.memory_space<vmem>>, vector<1x288x64xf32>
    %35 = vector.shape_cast %34 : vector<1x288x64xf32> to vector<288x64xf32>
    %c320 = arith.constant 320 : index
    %c0_42 = arith.constant 0 : index
    %36 = vector.load %arg2[%c320, %c0_42] : memref<576x256xf32, #tpu.memory_space<vmem>>, vector<64x256xf32>
    %cst_43 = arith.constant dense<0.000000e+00> : vector<288x256xf32>
    %37 = tpu.matmul %35, %36, %cst_43 {dimension_numbers = #tpu.dot_dimension_numbers<[1], [0], [0], [1], [0, 0, 1, 1], [], []>} : vector<288x64xf32>, vector<64x256xf32>, vector<288x256xf32> -> vector<288x256xf32>
    %38 = arith.addf %33, %37 : vector<288x256xf32>
    %c0_44 = arith.constant 0 : index
    %c0_45 = arith.constant 0 : index
    %39 = vector.load %arg6[%c0_44, %c0_45] : memref<288x256xf32, #tpu.memory_space<vmem>>, vector<288x256xf32>
    tpu.vector_store %arg6[%c0_44, %c0_45], %38 {strides = array<i32>} : memref<288x256xf32, #tpu.memory_space<vmem>>, vector<288x256xf32>,
    %c0_46 = arith.constant 0 : index
    %c0_47 = arith.constant 0 : index
    %40 = vector.load %arg6[%c0_46, %c0_47] : memref<288x256xf32, #tpu.memory_space<vmem>>, vector<288x256xf32>
    %c0_48 = arith.constant 0 : index
    %c36 = arith.constant 36 : index
    %c0_49 = arith.constant 0 : index
    %41 = vector.load %arg1[%c0_48, %c36, %c0_49] : memref<1x342x64xf32, #tpu.memory_space<vmem>>, vector<1x288x64xf32>
    %42 = vector.shape_cast %41 : vector<1x288x64xf32> to vector<288x64xf32>
    %c384 = arith.constant 384 : index
    %c0_50 = arith.constant 0 : index
    %43 = vector.load %arg2[%c384, %c0_50] : memref<576x256xf32, #tpu.memory_space<vmem>>, vector<64x256xf32>
    %cst_51 = arith.constant dense<0.000000e+00> : vector<288x256xf32>
    %44 = tpu.matmul %42, %43, %cst_51 {dimension_numbers = #tpu.dot_dimension_numbers<[1], [0], [0], [1], [0, 0, 1, 1], [], []>} : vector<288x64xf32>, vector<64x256xf32>, vector<288x256xf32> -> vector<288x256xf32>
    %45 = arith.addf %40, %44 : vector<288x256xf32>
    %c0_52 = arith.constant 0 : index
    %c0_53 = arith.constant 0 : index
    %46 = vector.load %arg6[%c0_52, %c0_53] : memref<288x256xf32, #tpu.memory_space<vmem>>, vector<288x256xf32>
    tpu.vector_store %arg6[%c0_52, %c0_53], %45 {strides = array<i32>} : memref<288x256xf32, #tpu.memory_space<vmem>>, vector<288x256xf32>,
    %c0_54 = arith.constant 0 : index
    %c0_55 = arith.constant 0 : index
    %47 = vector.load %arg6[%c0_54, %c0_55] : memref<288x256xf32, #tpu.memory_space<vmem>>, vector<288x256xf32>
    %c0_56 = arith.constant 0 : index
    %c37 = arith.constant 37 : index
    %c0_57 = arith.constant 0 : index
    %48 = vector.load %arg1[%c0_56, %c37, %c0_57] : memref<1x342x64xf32, #tpu.memory_space<vmem>>, vector<1x288x64xf32>
    %49 = vector.shape_cast %48 : vector<1x288x64xf32> to vector<288x64xf32>
    %c448 = arith.constant 448 : index
    %c0_58 = arith.constant 0 : index
    %50 = vector.load %arg2[%c448, %c0_58] : memref<576x256xf32, #tpu.memory_space<vmem>>, vector<64x256xf32>
    %cst_59 = arith.constant dense<0.000000e+00> : vector<288x256xf32>
    %51 = tpu.matmul %49, %50, %cst_59 {dimension_numbers = #tpu.dot_dimension_numbers<[1], [0], [0], [1], [0, 0, 1, 1], [], []>} : vector<288x64xf32>, vector<64x256xf32>, vector<288x256xf32> -> vector<288x256xf32>
    %52 = arith.addf %47, %51 : vector<288x256xf32>
    %c0_60 = arith.constant 0 : index
    %c0_61 = arith.constant 0 : index
    %53 = vector.load %arg6[%c0_60, %c0_61] : memref<288x256xf32, #tpu.memory_space<vmem>>, vector<288x256xf32>
    tpu.vector_store %arg6[%c0_60, %c0_61], %52 {strides = array<i32>} : memref<288x256xf32, #tpu.memory_space<vmem>>, vector<288x256xf32>,
    %c0_62 = arith.constant 0 : index
    %c0_63 = arith.constant 0 : index
    %54 = vector.load %arg6[%c0_62, %c0_63] : memref<288x256xf32, #tpu.memory_space<vmem>>, vector<288x256xf32>
    %c0_64 = arith.constant 0 : index
    %c38 = arith.constant 38 : index
    %c0_65 = arith.constant 0 : index
    %55 = vector.load %arg1[%c0_64, %c38, %c0_65] : memref<1x342x64xf32, #tpu.memory_space<vmem>>, vector<1x288x64xf32>
    %56 = vector.shape_cast %55 : vector<1x288x64xf32> to vector<288x64xf32>
    %c512 = arith.constant 512 : index
    %c0_66 = arith.constant 0 : index
    %57 = vector.load %arg2[%c512, %c0_66] : memref<576x256xf32, #tpu.memory_space<vmem>>, vector<64x256xf32>
    %cst_67 = arith.constant dense<0.000000e+00> : vector<288x256xf32>
    %58 = tpu.matmul %56, %57, %cst_67 {dimension_numbers = #tpu.dot_dimension_numbers<[1], [0], [0], [1], [0, 0, 1, 1], [], []>} : vector<288x64xf32>, vector<64x256xf32>, vector<288x256xf32> -> vector<288x256xf32>
    %59 = arith.addf %54, %58 : vector<288x256xf32>
    %c0_68 = arith.constant 0 : index
    %c0_69 = arith.constant 0 : index
    %60 = vector.load %arg6[%c0_68, %c0_69] : memref<288x256xf32, #tpu.memory_space<vmem>>, vector<288x256xf32>
    tpu.vector_store %arg6[%c0_68, %c0_69], %59 {strides = array<i32>} : memref<288x256xf32, #tpu.memory_space<vmem>>, vector<288x256xf32>,
    %c0_70 = arith.constant 0 : index
    %c0_71 = arith.constant 0 : index
    %61 = vector.load %arg6[%c0_70, %c0_71] : memref<288x256xf32, #tpu.memory_space<vmem>>, vector<288x256xf32>
    %c0_72 = arith.constant 0 : index
    %c0_73 = arith.constant 0 : index
    %62 = vector.load %arg3[%c0_72, %c0_73] : memref<1x256xf32, #tpu.memory_space<vmem>>, vector<1x256xf32>
    %63 = vector.broadcast %62 : vector<1x256xf32> to vector<288x256xf32>
    %64 = arith.addf %61, %63 : vector<288x256xf32>
    %cst_74 = arith.constant 0.000000e+00 : f32
    %65 = vector.broadcast %cst_74 : f32 to vector<288x256xf32>
    %66 = arith.cmpf oge, %64, %65 : vector<288x256xf32>
    %c0_75 = arith.constant 0 : index
    %c0_76 = arith.constant 0 : index
    %67 = vector.load %arg4[%c0_75, %c0_76] : memref<1x256xf32, #tpu.memory_space<vmem>>, vector<1x256xf32>
    %68 = vector.broadcast %67 : vector<1x256xf32> to vector<288x256xf32>
    %69 = arith.mulf %68, %64 : vector<288x256xf32>
    %70 = arith.select %66, %64, %69 : vector<288x256xi1>, vector<288x256xf32>
    %c0_77 = arith.constant 0 : index
    %c0_78 = arith.constant 0 : index
    %c0_79 = arith.constant 0 : index
    %71 = vector.load %arg5[%c0_77, %c0_78, %c0_79] : memref<1x288x256xf32, #tpu.memory_space<vmem>>, vector<1x288x256xf32>
    %72 = vector.shape_cast %71 : vector<1x288x256xf32> to vector<288x256xf32>
    %73 = vector.shape_cast %70 : vector<288x256xf32> to vector<1x288x256xf32>
    tpu.vector_store %arg5[%c0_77, %c0_78, %c0_79], %73 {strides = array<i32>} : memref<1x288x256xf32, #tpu.memory_space<vmem>>, vector<1x288x256xf32>,
    return
  }
  func.func @transform_0(%arg0: i32) -> (i32, i32, i32) {
    %c0_i32 = arith.constant 0 : i32
    %c0_i32_0 = arith.constant 0 : i32
    %c0_i32_1 = arith.constant 0 : i32
    return %arg0, %c0_i32, %c0_i32_0 : i32, i32, i32
  }
  func.func @transform_1(%arg0: i32) -> (i32, i32) {
    %c0_i32 = arith.constant 0 : i32
    %c0_i32_0 = arith.constant 0 : i32
    %c0_i32_1 = arith.constant 0 : i32
    return %c0_i32, %c0_i32_0 : i32, i32
  }
  func.func @transform_2(%arg0: i32) -> (i32, i32) {
    %c0_i32 = arith.constant 0 : i32
    %c0_i32_0 = arith.constant 0 : i32
    %c0_i32_1 = arith.constant 0 : i32
    return %c0_i32, %c0_i32_0 : i32, i32
  }
  func.func @transform_3(%arg0: i32) -> (i32, i32) {
    %c0_i32 = arith.constant 0 : i32
    %c0_i32_0 = arith.constant 0 : i32
    %c0_i32_1 = arith.constant 0 : i32
    return %c0_i32, %c0_i32_0 : i32, i32
  }
  func.func @transform_4(%arg0: i32) -> (i32, i32, i32) {
    %c0_i32 = arith.constant 0 : i32
    %c0_i32_0 = arith.constant 0 : i32
    %c0_i32_1 = arith.constant 0 : i32
    return %arg0, %c0_i32, %c0_i32_0 : i32, i32, i32
  }
}

</mosaic_0001>

<bundles_post_ra>
// kernel: subpixel_conv_forward.1
= control target key start
LH: loop header
LB: loop body
LE: loop exit
PB: predicated region body
PF: predicated region fallthrough
CT: control target
= control target key end

     0   :  { %9 = vsyncpa [#allocation4], 0  ;;  %s9364_s0 = inlined_call_operand.vmem [shape: f32[2,342,64], index: 0, kind: input, shape index: {}]   ;;  %s9365_s1 = inlined_call_operand.hbm [shape: f32[576,256], index: 1, kind: input, shape index: {}]   ;;  %s9366_s2 = inlined_call_operand.hbm [shape: f32[1,256], index: 2, kind: input, shape index: {}]   ;;  %s9367_s3 = inlined_call_operand.vmem [shape: f32[1,256], index: 3, kind: input, shape index: {}]   ;;  %s9368_s4 = inlined_call_operand.vmem [shape: f32[2,288,256], index: 4, kind: output, shape index: {}]  }
   0x1   :  { %10 = vsyncpa [#allocation6], 0  ;;  %s7730_s15 = smov 0  }
   0x2 LB: > { %s7736_s16 = sadd.s32 4294967295, %s7698_s15   ;;  %p6531_p0 = scmp.ge.s32.totalorder %s7698_s15, 1  ;;  %s7698_s15 = sphi %s7730_s15, %s16_s15  }
   0x3   : > { %p136_p1 = scmp.lt.s32.totalorder %s7698_s15, 3  ;;  %s7700_s17 = smov [#allocation3]  }
   0x4   : > { %s148_s18 = sshll.u32 %s7700_s17, 4  ;;  %p9369_p3 = scmp.eq.s32.totalorder %s7736_s16, 0  ;;  %s149_s18 = int_to_ptr.vmem [resolvable:$true] %s148_s18 }
   0x5   : > { %p7740_p2 = pnand %p6531_p0, %p136_p1  ;;  %s7701_s20 = smov [#allocation5]  }
   0x6   : > { %s162_s21 = sshll.u32 %s7701_s20, 4  ;;  %s7628_s25 = scalar_lea.hbm %s9365_s1, 18432  ;;  %s7753_s21 = int_to_ptr.vmem [resolvable:$true] %s162_s21 }
   0x7   : > { %s9371_s19 = scalar_select %p7740_p2, 1, 0 }
   0x8   : > { %p7604_p4 = pneg %p7740_p2  ;;  %p7629_p6 = scmp.ne.s32.totalorder %s9365_s1, %s7628_s25 }
   0x9   : > { %p7635_p10 = scmp.lt.u32.totalorder %s7628_s25, %s9365_s1 }
   0xa   : > { %p7749_p5 = pnand %p9369_p3, %p7604_p4 }
   0xc   : > { %p7630_p7 = pneg %p7749_p5 }
   0xe   : > { %p7631_p8 = pnand %p7630_p7, %p7629_p6 }
  0x10   : > { %p7632_p9 = pneg %p7631_p8 }
  0x12   : > { %p7637_p11 = pnand %p7635_p10, %p7632_p9 }
  0x14   : > { %7640 = shalt.err (!%p7637_p11)
}
  0x15   : > { %s7641_s30 = scalar_lea.vmem %s149_s18, 18432  ;;  %p7649_p1 = scmp.lt.s32.totalorder %s149_s18, %s149_s18 }
  0x16   : > { %p7642_p12 = scmp.ne.s32.totalorder %s149_s18, %s7641_s30  ;;  %p7650_p4 = scmp.lt.s32.totalorder %s7641_s30, %s7641_s30 }
  0x18   : > { %p7644_p13 = pnand %p7642_p12, %p7630_p7  ;;  %p7651_p3 = por %p7650_p4, %p7649_p1 }
  0x1a   : > { %p7645_p0 = pneg %p7644_p13 }
  0x1c   : > { %p7652_p2 = pnand %p7651_p3, %p7645_p0 }
  0x1e   : > { %7655 = shalt.err (!%p7652_p2)
}
  0x1f   : > { %s7702_s5 = smov 256   ;;  %s7703_s6 = smov 16  }
  0x20   : > { %7607 = dma.hbm_to_vmem [thread:$0]  (!%p7749_p5), %s9365_s1, 18432, %s149_s18, [#allocation4], %s7702_s5, %s7702_s5, %s7703_s6  }
  0x21   : > { %s7656_s11 = scalar_lea.hbm %s9366_s2, 32 }
  0x22   : > { %p7657_p6 = scmp.ne.s32.totalorder %s9366_s2, %s7656_s11  ;;  %p7663_p8 = scmp.lt.u32.totalorder %s7656_s11, %s9366_s2 }
  0x24   : > { %p7659_p2 = pnand %p7657_p6, %p7630_p7 }
  0x26   : > { %p7660_p3 = pneg %p7659_p2 }
  0x28   : > { %p7665_p9 = pnand %p7663_p8, %p7660_p3 }
  0x2a   : > { %7668 = shalt.err (!%p7665_p9)
}
  0x2b   : > { %s7669_s18 = scalar_lea.vmem %s7753_s21, 32  ;;  %p7677_p13 = scmp.lt.s32.totalorder %s7753_s21, %s7753_s21 }
  0x2c   : > { %p7670_p10 = scmp.ne.s32.totalorder %s7753_s21, %s7669_s18  ;;  %p7678_p0 = scmp.lt.s32.totalorder %s7669_s18, %s7669_s18 }
  0x2e   : > { %p7672_p11 = pnand %p7670_p10, %p7630_p7  ;;  %p7679_p1 = por %p7678_p0, %p7677_p13 }
  0x30   : > { %p7673_p12 = pneg %p7672_p11 }
  0x32   : > { %p7680_p4 = pnand %p7679_p1, %p7673_p12 }
  0x34   : > { %7683 = shalt.err (!%p7680_p4)
}
  0x35   : > { %7610 = dma.hbm_to_vmem [thread:$0]  (!%p7749_p5), %s9366_s2, 32, %s7753_s21, [#allocation6]  }
  0x36   : > { %p9373_p6 = scmp.ne.s32.totalorder %s9371_s19, 0 }
  0x37   : > { %p9374_p2 = scmp.eq.s32.totalorder (!%p9373_p6), %s7736_s16, 0 }
  0x38   : > { %186 = sbr.rel (%p9373_p6) target bundleno = 953 (0x3b9), region = 36 }
  0x3f   : > { %7689 = dma.done.wait (%p9374_p2), [#allocation4], 18432   ;;  %p9375_p7 = pmov %p9374_p2 }
  0x40   : > { %p9376_p3 = pmov %p9374_p2 }
  0x41   : > { %7691 = vsyncadd (%p9375_p7), [#allocation4], 4294948864 }
  0x42   : > { %7693 = dma.done.wait (%p9376_p3), [#allocation6], 32   ;;  %p9377_p8 = pmov %p9374_p2 }
  0x43   : > { %v7704_v0 = vmov 0.0   ;;  %v263_v1 = vld [vmem:[#allocation3 + $0x8] sm:$0xff]  ;;  %v265_v2 = vld [vmem:[#allocation3 + $0x18] sm:$0xff]  ;;  %v262_v6 = vld [vmem:[#allocation3] sm:$0xff]  ;;  %p216_p5 = scmp.lt.s32.totalorder %s7736_s16, 1  ;;  %vm278_vm0 = vcmask 523264  }
  0x44   : > { %7695 = vsyncadd (%p9377_p8), [#allocation6], 4294967264  ;;  %451 = vmatprep.mubr.f32.mxu1 %v7704_v0  ;;  %3007 = vmatprep.mubr.f32.mxu0 %v7704_v0  ;;  %v2820_v3 = vld [vmem:[#allocation3 + $0x208] sm:$0xff]  ;;  %v6866_v4 = vpack.c.bf16 %v265_v2, %v263_v1  ;;  %v2822_v5 = vld [vmem:[#allocation3 + $0x218] sm:$0xff] }
  0x45   : > { %v264_v7 = vld [vmem:[#allocation3 + $0x10] sm:$0xff]  ;;  %v7815_v8 = vpack.c.bf16 %v2822_v5, %v2820_v3  ;;  %v2819_v10 = vld [vmem:[#allocation3 + $0x200] sm:$0xff]  ;;  %v267_v12 = vld [vmem:[#allocation3 + $0x28] sm:$0xff]  ;;  %s9379_s16 = smov (!%p216_p5, %s7736_s16), 1 }
  0x46   : > { %v6868_v9 = vpack.c.bf16 %v264_v7, %v262_v6  ;;  %v2821_v11 = vld [vmem:[#allocation3 + $0x210] sm:$0xff]  ;;  %6867 = vmatprep.subr.bf16.mxu1 %v6866_v4  ;;  %v269_v14 = vld [vmem:[#allocation3 + $0x38] sm:$0xff]  ;;  %v2824_v15 = vld [vmem:[#allocation3 + $0x228] sm:$0xff]  ;;  %s7594_s19 = smul.u32 344, %s9379_s16 }
  0x47   : > { %v7817_v13 = vpack.c.bf16 %v2821_v11, %v2819_v10  ;;  %v2826_v16 = vld [vmem:[#allocation3 + $0x238] sm:$0xff]  ;;  %6931 = vmatprep.subr.bf16.mxu0 %v7815_v8  ;;  %v6870_v17 = vpack.c.bf16 %v269_v14, %v267_v12  ;;  %v266_v19 = vld [vmem:[#allocation3 + $0x20] sm:$0xff]  ;;  %v268_v20 = vld [vmem:[#allocation3 + $0x30] sm:$0xff]  ;;  %s7595_s27 = smul.u32 576, %s9379_s16 }
  0x48   : > { %6869 = vmatpush1.bf16.msra.mxu1 %v6868_v9  ;;  %v7820_v18 = vpack.c.bf16 %v2826_v16, %v2824_v15  ;;  %v2823_v21 = vld [vmem:[#allocation3 + $0x220] sm:$0xff]  ;;  %v6872_v22 = vpack.c.bf16 %v268_v20, %v266_v19  ;;  %v2825_v23 = vld [vmem:[#allocation3 + $0x230] sm:$0xff]  ;;  %v271_v24 = vld [vmem:[#allocation3 + $0x48] sm:$0xff]  ;;  %s7846_s24 = scalar_lea.vmem %s9364_s0, %s7594_s19 }
  0x49   : > { %6933 = vmatpush1.bf16.msra.mxu0 %v7817_v13  ;;  %v273_v25 = vld [vmem:[#allocation3 + $0x58] sm:$0xff]  ;;  %6871 = vmatprep.subr.bf16.mxu1 %v6870_v17  ;;  %v7829_v26 = vpack.c.bf16 %v2825_v23, %v2823_v21  ;;  %v2828_v28 = vld [vmem:[#allocation3 + $0x248] sm:$0xff]  ;;  %v270_v30 = vld [vmem:[#allocation3 + $0x40] sm:$0xff]  ;;  %s9113_s30 = scalar_lea.vmem %s9368_s4, %s7595_s27 }
  0x4a   : > { %6935 = vmatprep.subr.bf16.mxu0 %v7820_v18  ;;  %v6874_v27 = vpack.c.bf16 %v273_v25, %v271_v24  ;;  %v2830_v29 = vld [vmem:[#allocation3 + $0x258] sm:$0xff]  ;;  %v272_v32 = vld [vmem:[#allocation3 + $0x50] sm:$0xff]  ;;  %v2827_v33 = vld [vmem:[#allocation3 + $0x240] sm:$0xff] }
  0x4b   : > { %v7831_v31 = vpack.c.bf16 %v2830_v29, %v2828_v28  ;;  %v2829_v34 = vld [vmem:[#allocation3 + $0x250] sm:$0xff]  ;;  %v6876_v35 = vpack.c.bf16 %v272_v32, %v270_v30  ;;  %v275_v36 = vld [vmem:[#allocation3 + $0x68] sm:$0xff]  ;;  %v277_v37 = vld [vmem:[#allocation3 + $0x78] sm:$0xff] }
  0x4c   : > { %6873 = vmatpush1.bf16.msra.mxu1 %v6872_v22  ;;  %v2832_v38 = vld [vmem:[#allocation3 + $0x268] sm:$0xff]  ;;  %v7834_v39 = vpack.c.bf16 %v2829_v34, %v2827_v33  ;;  %v6878_v40 = vpack.c.bf16 %v277_v37, %v275_v36  ;;  %v2834_v41 = vld [vmem:[#allocation3 + $0x278] sm:$0xff]  ;;  %v274_v42 = vld [vmem:[#allocation3 + $0x60] sm:$0xff] }
  0x4d   : > { %6937 = vmatpush1.bf16.msra.mxu0 %v7829_v26  ;;  %6875 = vmatprep.subr.bf16.mxu1 %v6874_v27  ;;  %v276_v43 = vld [vmem:[#allocation3 + $0x70] sm:$0xff]  ;;  %v7838_v44 = vpack.c.bf16 %v2834_v41, %v2832_v38  ;;  %v2831_v45 = vld [vmem:[#allocation3 + $0x260] sm:$0xff]  ;;  %v849_v47 = vld [vmem:[#allocation3 + $0x88] sm:$0xff] }
  0x4e   : > { %6939 = vmatprep.subr.bf16.mxu0 %v7831_v31  ;;  %v2833_v46 = vld [vmem:[#allocation3 + $0x270] sm:$0xff]  ;;  %v851_v48 = vld [vmem:[#allocation3 + $0x98] sm:$0xff]  ;;  %v6880_v49 = vpack.c.bf16 %v276_v43, %v274_v42  ;;  %v3477_v50 = vld [vmem:[#allocation3 + $0x288] sm:$0xff] }
  0x4f   : > { %v3479_v51 = vld [vmem:[#allocation3 + $0x298] sm:$0xff]  ;;  %v7841_v52 = vpack.c.bf16 %v2833_v46, %v2831_v45  ;;  %v6882_v53 = vpack.c.bf16 %v851_v48, %v849_v47  ;;  %v848_v54 = vld [vmem:[#allocation3 + $0x80] sm:$0xff]  ;;  %v850_v55 = vld [vmem:[#allocation3 + $0x90] sm:$0xff] }
  0x50   : > { %6877 = vmatpush1.bf16.msra.mxu1 %v6876_v35  ;;  %v6946_v56 = vpack.c.bf16 %v3479_v51, %v3477_v50  ;;  %v3476_v57 = vld [vmem:[#allocation3 + $0x280] sm:$0xff]  ;;  %v3478_v58 = vld [vmem:[#allocation3 + $0x290] sm:$0xff]  ;;  %v6884_v60 = vpack.c.bf16 %v850_v55, %v848_v54  ;;  %v3481_v61 = vld [vmem:[#allocation3 + $0x2a8] sm:$0xff] }
  0x51   : > { %6941 = vmatpush1.bf16.msra.mxu0 %v7834_v39  ;;  %6879 = vmatprep.subr.bf16.mxu1 %v6878_v40  ;;  %v226_v59 = vld [vmem:[%s7846_s24] sm:$0xff]  ;;  %v2783_v62 = vld [vmem:[%s7846_s24 + $0x13] sm:$0xff]  ;;  %v6948_v63 = vpack.c.bf16 %v3478_v58, %v3476_v57  ;;  %v227_v5 = vld [vmem:[%s7846_s24 + $0x8] sm:$0xff] }
  0x52   : > { %6943 = vmatprep.subr.bf16.mxu0 %v7838_v44  ;;  %v3483_v1 = vld [vmem:[#allocation3 + $0x2b8] sm:$0xff]  ;;  %v3480_v3 = vld [vmem:[#allocation3 + $0x2a0] sm:$0xff]  ;;  %v3482_v4 = vld [vmem:[#allocation3 + $0x2b0] sm:$0xff] }
  0x53   : > { %v6950_v2 = vpack.c.bf16 %v3483_v1, %v3481_v61  ;;  %v2784_v6 = vld [vmem:[%s7846_s24 + $0x1b] sm:$0xff]  ;;  %v6952_v7 = vpack.c.bf16 %v3482_v4, %v3480_v3  ;;  %v853_v9 = vld [vmem:[#allocation3 + $0xa8] sm:$0xff]  ;;  %v854_v17 = vld [vmem:[#allocation3 + $0xb0] sm:$0xff] }
  0x54   : > { %6881 = vmatpush1.bf16.msra.mxu1 %v6880_v49  ;;  %v855_v10 = vld [vmem:[#allocation3 + $0xb8] sm:$0xff]  ;;  %v3485_v12 = vld [vmem:[#allocation3 + $0x2c8] sm:$0xff]  ;;  %v852_v15 = vld [vmem:[#allocation3 + $0xa0] sm:$0xff] }
  0x55   : > { %6945 = vmatpush1.bf16.msra.mxu0 %v7841_v52  ;;  %6883 = vmatprep.subr.bf16.mxu1 %v6882_v53  ;;  %v6886_v11 = vpack.c.bf16 %v855_v10, %v853_v9  ;;  %v3487_v14 = vld [vmem:[#allocation3 + $0x2d8] sm:$0xff]  ;;  %v3484_v19 = vld [vmem:[#allocation3 + $0x2c0] sm:$0xff]  ;;  %v3486_v20 = vld [vmem:[#allocation3 + $0x2d0] sm:$0xff]  ;;  %v6888_v23 = vpack.c.bf16 %v854_v17, %v852_v15 }
  0x56   : > { %6947 = vmatprep.subr.bf16.mxu0 %v6946_v56  ;;  %v6954_v16 = vpack.c.bf16 %v3487_v14, %v3485_v12  ;;  %v228_v21 = vld [vmem:[%s7846_s24 + $0x10] sm:$0xff]  ;;  %v2785_v22 = vld [vmem:[%s7846_s24 + $0x23] sm:$0xff]  ;;  %v6956_v24 = vpack.c.bf16 %v3486_v20, %v3484_v19  ;;  %v3491_v27 = vld [vmem:[#allocation3 + $0x2f8] sm:$0xff] }
  0x57   : > { %6540 = vmatmul.mubr.msk.f32.vlgmr.msra.gmra.mrb[0].mxu1 %vm278_vm0, %v226_v59  ;;  %v3489_v25 = vld [vmem:[#allocation3 + $0x2e8] sm:$0xff]  ;;  %v3488_v28 = vld [vmem:[#allocation3 + $0x2e0] sm:$0xff]  ;;  %v3490_v29 = vld [vmem:[#allocation3 + $0x2f0] sm:$0xff] }
  0x58   : > { %6684 = vmatmul.mubr.msk.f32.vlgmr.msra.gmra.mrb[0].mxu0 %vm278_vm0, %v2783_v62  ;;  %6885 = vmatpush1.bf16.msra.mxu1 %v6884_v60  ;;  %v229_v30 = vld [vmem:[%s7846_s24 + $0x18] sm:$0xff]  ;;  %v6958_v32 = vpack.c.bf16 %v3491_v27, %v3489_v25  ;;  %v2786_v33 = vld [vmem:[%s7846_s24 + $0x2b] sm:$0xff]  ;;  %v6960_v34 = vpack.c.bf16 %v3490_v29, %v3488_v28  ;;  %v230_v35 = vld [vmem:[%s7846_s24 + $0x20] sm:$0xff] }
  0x59   : > { %6949 = vmatpush1.bf16.msra.mxu0 %v6948_v63  ;;  %457 = vmatprep.mubr.f32.mxu1 %v7704_v0  ;;  %v857_v36 = vld [vmem:[#allocation3 + $0xc8] sm:$0xff]  ;;  %v859_v37 = vld [vmem:[#allocation3 + $0xd8] sm:$0xff]  ;;  %v856_v42 = vld [vmem:[#allocation3 + $0xc0] sm:$0xff] }
  0x5a   : > { %3013 = vmatprep.mubr.f32.mxu0 %v7704_v0  ;;  %6951 = vmatprep.subr.bf16.mxu0 %v6950_v2  ;;  %v6890_v38 = vpack.c.bf16 %v859_v37, %v857_v36  ;;  %v4134_v40 = vld [vmem:[#allocation3 + $0x308] sm:$0xff]  ;;  %v4136_v41 = vld [vmem:[#allocation3 + $0x318] sm:$0xff]  ;;  %v858_v46 = vld [vmem:[#allocation3 + $0xd0] sm:$0xff] }
  0x5b   : > { %6541 = vmatmul.mubr.msk.f32.gmra.mrb[2].mxu1 %vm278_vm0, %v227_v5  ;;  %6887 = vmatprep.subr.bf16.mxu1 %v6886_v11  ;;  %v2787_v43 = vld [vmem:[%s7846_s24 + $0x33] sm:$0xff]  ;;  %v6962_v45 = vpack.c.bf16 %v4136_v41, %v4134_v40  ;;  %v6892_v47 = vpack.c.bf16 %v858_v46, %v856_v42  ;;  %v231_v48 = vld [vmem:[%s7846_s24 + $0x28] sm:$0xff]  ;;  %v2788_v49 = vld [vmem:[%s7846_s24 + $0x3b] sm:$0xff] }
  0x5c   : > { %6685 = vmatmul.mubr.msk.f32.gmra.mrb[2].mxu0 %vm278_vm0, %v2784_v6  ;;  %463 = vmatprep.mubr.f32.mxu1 %v7704_v0  ;;  %v861_v50 = vld [vmem:[#allocation3 + $0xe8] sm:$0xff]  ;;  %v232_v51 = vld [vmem:[%s7846_s24 + $0x30] sm:$0xff]  ;;  %v863_v53 = vld [vmem:[#allocation3 + $0xf8] sm:$0xff] }
  0x5d   : > { %3019 = vmatprep.mubr.f32.mxu0 %v7704_v0  ;;  %6953 = vmatpush1.bf16.msra.mxu0 %v6952_v7  ;;  %v2789_v54 = vld [vmem:[%s7846_s24 + $0x43] sm:$0xff]  ;;  %v6894_v55 = vpack.c.bf16 %v863_v53, %v861_v50  ;;  %v862_v57 = vld [vmem:[#allocation3 + $0xf0] sm:$0xff]  ;;  %v233_v59 = vld [vmem:[%s7846_s24 + $0x38] sm:$0xff] }
  0x5e   : > { %6955 = vmatprep.subr.bf16.mxu0 %v6954_v16  ;;  %6889 = vmatpush1.bf16.msra.mxu1 %v6888_v23  ;;  %v860_v56 = vld [vmem:[#allocation3 + $0xe0] sm:$0xff]  ;;  %v2790_v60 = vld [vmem:[%s7846_s24 + $0x4b] sm:$0xff]  ;;  %v1508_v63 = vld [vmem:[#allocation3 + $0x118] sm:$0xff] }
  0x5f   : > { %6542 = vmatmul.mubr.msk.f32.gmra.mrb[4].mxu1 %vm278_vm0, %v228_v21  ;;  %6891 = vmatprep.subr.bf16.mxu1 %v6890_v38  ;;  %v6896_v58 = vpack.c.bf16 %v862_v57, %v860_v56  ;;  %v234_v61 = vld [vmem:[%s7846_s24 + $0x40] sm:$0xff]  ;;  %v1506_v62 = vld [vmem:[#allocation3 + $0x108] sm:$0xff]  ;;  %v2791_v1 = vld [vmem:[%s7846_s24 + $0x53] sm:$0xff] }
  0x60   : > { %6686 = vmatmul.mubr.msk.f32.gmra.mrb[4].mxu0 %vm278_vm0, %v2785_v22  ;;  %469 = vmatprep.mubr.f32.mxu1 %v7704_v0  ;;  %v6898_v2 = vpack.c.bf16 %v1508_v63, %v1506_v62  ;;  %v235_v3 = vld [vmem:[%s7846_s24 + $0x48] sm:$0xff]  ;;  %v2792_v4 = vld [vmem:[%s7846_s24 + $0x5b] sm:$0xff]  ;;  %v236_v5 = vld [vmem:[%s7846_s24 + $0x50] sm:$0xff] }
  0x61   : > { %3025 = vmatprep.mubr.f32.mxu0 %v7704_v0  ;;  %6957 = vmatpush1.bf16.msra.mxu0 %v6956_v24  ;;  %v2793_v6 = vld [vmem:[%s7846_s24 + $0x63] sm:$0xff]  ;;  %v237_v7 = vld [vmem:[%s7846_s24 + $0x58] sm:$0xff]  ;;  %v2794_v9 = vld [vmem:[%s7846_s24 + $0x6b] sm:$0xff] }
  0x62   : > { %6959 = vmatprep.subr.bf16.mxu0 %v6958_v32  ;;  %6893 = vmatpush1.bf16.msra.mxu1 %v6892_v47  ;;  %v238_v10 = vld [vmem:[%s7846_s24 + $0x60] sm:$0xff]  ;;  %v2795_v11 = vld [vmem:[%s7846_s24 + $0x73] sm:$0xff]  ;;  %v239_v12 = vld [vmem:[%s7846_s24 + $0x68] sm:$0xff] }
  0x63   : > { %6543 = vmatmul.mubr.msk.f32.gmra.mrb[6].mxu1 %vm278_vm0, %v229_v30  ;;  %6895 = vmatprep.subr.bf16.mxu1 %v6894_v55  ;;  %v2796_v14 = vld [vmem:[%s7846_s24 + $0x7b] sm:$0xff]  ;;  %v240_v15 = vld [vmem:[%s7846_s24 + $0x70] sm:$0xff]  ;;  %v2797_v16 = vld [vmem:[%s7846_s24 + $0x83] sm:$0xff] }
  0x64   : > { %6687 = vmatmul.mubr.msk.f32.gmra.mrb[6].mxu0 %vm278_vm0, %v2786_v33  ;;  %475 = vmatprep.mubr.f32.mxu1 %v7704_v0  ;;  %v241_v17 = vld [vmem:[%s7846_s24 + $0x78] sm:$0xff]  ;;  %v2798_v19 = vld [vmem:[%s7846_s24 + $0x8b] sm:$0xff]  ;;  %v242_v20 = vld [vmem:[%s7846_s24 + $0x80] sm:$0xff] }
  0x65   : > { %3031 = vmatprep.mubr.f32.mxu0 %v7704_v0  ;;  %6961 = vmatpush1.bf16.msra.mxu0 %v6960_v34  ;;  %v2799_v21 = vld [vmem:[%s7846_s24 + $0x93] sm:$0xff]  ;;  %v243_v22 = vld [vmem:[%s7846_s24 + $0x88] sm:$0xff]  ;;  %v2800_v23 = vld [vmem:[%s7846_s24 + $0x9b] sm:$0xff] }
  0x66   : > { %6963 = vmatprep.subr.bf16.mxu0 %v6962_v45  ;;  %6897 = vmatpush1.bf16.msra.mxu1 %v6896_v58  ;;  %v4133_v24 = vld [vmem:[#allocation3 + $0x300] sm:$0xff]  ;;  %v4135_v25 = vld [vmem:[#allocation3 + $0x310] sm:$0xff]  ;;  %v4138_v27 = vld [vmem:[#allocation3 + $0x328] sm:$0xff] }
  0x67   : > { %6544 = vmatmul.mubr.msk.f32.gmra.mrb[8].mxu1 %vm278_vm0, %v230_v35  ;;  %6899 = vmatprep.subr.bf16.mxu1 %v6898_v2  ;;  %v4140_v28 = vld [vmem:[#allocation3 + $0x338] sm:$0xff]  ;;  %v244_v29 = vld [vmem:[%s7846_s24 + $0x90] sm:$0xff]  ;;  %v6964_v32 = vpack.c.bf16 %v4135_v25, %v4133_v24  ;;  %v4137_v34 = vld [vmem:[#allocation3 + $0x320] sm:$0xff] }
  0x68   : > { %6688 = vmatmul.mubr.msk.f32.gmra.mrb[8].mxu0 %vm278_vm0, %v2787_v43  ;;  %481 = vmatprep.mubr.f32.mxu1 %v7704_v0  ;;  %v3440_v30 = vld [vmem:[%s7846_s24 + $0x14] sm:$0xff]  ;;  %v6966_v33 = vpack.c.bf16 %v4140_v28, %v4138_v27  ;;  %v4142_v36 = vld [vmem:[#allocation3 + $0x348] sm:$0xff]  ;;  %v3441_v40 = vld [vmem:[%s7846_s24 + $0x1c] sm:$0xff] }
  0x69   : > { %3037 = vmatprep.mubr.f32.mxu0 %v7704_v0  ;;  %v4139_v35 = vld [vmem:[#allocation3 + $0x330] sm:$0xff]  ;;  %v4144_v37 = vld [vmem:[#allocation3 + $0x358] sm:$0xff]  ;;  %v4141_v43 = vld [vmem:[#allocation3 + $0x340] sm:$0xff] }
  0x6a   : > { %v245_v38 = vld [vmem:[%s7846_s24 + $0x98] sm:$0xff]  ;;  %v6968_v41 = vpack.c.bf16 %v4139_v35, %v4137_v34  ;;  %v6970_v42 = vpack.c.bf16 %v4144_v37, %v4142_v36  ;;  %v4143_v45 = vld [vmem:[#allocation3 + $0x350] sm:$0xff]  ;;  %v4146_v46 = vld [vmem:[#allocation3 + $0x368] sm:$0xff] }
  0x6b   : > { %6545 = vmatmul.mubr.msk.f32.gmra.mrb[10].mxu1 %vm278_vm0, %v231_v48  ;;  %v4148_v47 = vld [vmem:[#allocation3 + $0x378] sm:$0xff]  ;;  %v246_v48 = vld [vmem:[%s7846_s24 + $0xa0] sm:$0xff]  ;;  %v6972_v50 = vpack.c.bf16 %v4143_v45, %v4141_v43  ;;  %v247_v55 = vld [vmem:[%s7846_s24 + $0xa8] sm:$0xff] }
  0x6c   : > { %6689 = vmatmul.mubr.msk.f32.gmra.mrb[10].mxu0 %vm278_vm0, %v2788_v49  ;;  %487 = vmatprep.mubr.f32.mxu1 %v7704_v0  ;;  %v7972_v49 = vld [vmem:[%s7846_s24 + $0x24] sm:$0xff]  ;;  %v7981_v56 = vld [vmem:[%s7846_s24 + $0x2c] sm:$0xff]  ;;  %v4793_v62 = vld [vmem:[#allocation3 + $0x398] sm:$0xff] }
  0x6d   : > { %3043 = vmatprep.mubr.f32.mxu0 %v7704_v0  ;;  %v4145_v53 = vld [vmem:[#allocation3 + $0x360] sm:$0xff]  ;;  %v248_v58 = vld [vmem:[%s7846_s24 + $0xb0] sm:$0xff]  ;;  %v261_v28 = vld [vmem:[%s7846_s24 + $0x118] sm:$0xff] }
  0x6e   : > { %v7999_v63 = vld [vmem:[%s7846_s24 + $0x3c] sm:$0xff]  ;;  %v8089_v24 = vld [vmem:[%s7846_s24 + $0x8c] sm:$0xff]  ;;  %v8098_v27 = vld [vmem:[%s7846_s24 + $0x94] sm:$0xff] }
  0x6f   : > { %6546 = vmatmul.mubr.msk.f32.gmra.mrb[12].mxu1 %vm278_vm0, %v232_v51  ;;  %v6974_v51 = vpack.c.bf16 %v4148_v47, %v4146_v46  ;;  %v250_v2 = vld [vmem:[%s7846_s24 + $0xc0] sm:$0xff]  ;;  %v260_v25 = vld [vmem:[%s7846_s24 + $0x110] sm:$0xff]  ;;  %v1512_v34 = vld [vmem:[#allocation3 + $0x138] sm:$0xff] }
  0x70   : > { %6690 = vmatmul.mubr.msk.f32.gmra.mrb[12].mxu0 %vm278_vm0, %v2789_v54  ;;  %493 = vmatprep.mubr.f32.mxu1 %v7704_v0  ;;  %v4147_v54 = vld [vmem:[#allocation3 + $0x370] sm:$0xff]  ;;  %v812_v35 = vld [vmem:[%s7846_s24 + $0x1] sm:$0xff]  ;;  %v1516_v43 = vld [vmem:[#allocation3 + $0x158] sm:$0xff] }
  0x71   : > { %3049 = vmatprep.mubr.f32.mxu0 %v7704_v0  ;;  %v6976_v57 = vpack.c.bf16 %v4147_v54, %v4145_v53  ;;  %v8116_v37 = vld [vmem:[%s7846_s24 + $0xa4] sm:$0xff]  ;;  %v8125_v46 = vld [vmem:[%s7846_s24 + $0xac] sm:$0xff]  ;;  %v1520_v54 = vld [vmem:[#allocation3 + $0x178] sm:$0xff] }
  0x72   : > { %v813_v45 = vld [vmem:[%s7846_s24 + $0x9] sm:$0xff] }
  0x73   : > { %6547 = vmatmul.mubr.msk.f32.gmra.mrb[14].mxu1 %vm278_vm0, %v233_v59  ;;  %v7990_v59 = vld [vmem:[%s7846_s24 + $0x34] sm:$0xff]  ;;  %v1518_v53 = vld [vmem:[#allocation3 + $0x168] sm:$0xff] }
  0x74   : > { %6691 = vmatmul.mubr.msk.f32.gmra.mrb[14].mxu0 %vm278_vm0, %v2790_v60  ;;  %499 = vmatprep.mubr.f32.mxu1 %v7704_v0  ;;  %v249_v60 = vld [vmem:[%s7846_s24 + $0xb8] sm:$0xff] }
  0x75   : > { %3055 = vmatprep.mubr.f32.mxu0 %v7704_v0 }
  0x77   : > { %6548 = vmatmul.mubr.msk.f32.gmra.mrb[16].mxu1 %vm278_vm0, %v234_v61  ;;  %v4791_v61 = vld [vmem:[#allocation3 + $0x388] sm:$0xff] }
  0x78   : > { %6692 = vmatmul.mubr.msk.f32.gmra.mrb[16].mxu0 %vm278_vm0, %v2791_v1  ;;  %505 = vmatprep.mubr.f32.mxu1 %v7704_v0  ;;  %v6978_v1 = vpack.c.bf16 %v4793_v62, %v4791_v61  ;;  %v1517_v61 = vld [vmem:[#allocation3 + $0x160] sm:$0xff]  ;;  %v1519_v62 = vld [vmem:[#allocation3 + $0x170] sm:$0xff] }
  0x79   : > { %3061 = vmatprep.mubr.f32.mxu0 %v7704_v0 }
  0x7b   : > { %6549 = vmatmul.mubr.msk.f32.gmra.mrb[18].mxu1 %vm278_vm0, %v235_v3  ;;  %v8008_v3 = vld [vmem:[%s7846_s24 + $0x44] sm:$0xff] }
  0x7c   : > { %6693 = vmatmul.mubr.msk.f32.gmra.mrb[18].mxu0 %vm278_vm0, %v2792_v4  ;;  %511 = vmatprep.mubr.f32.mxu1 %v7704_v0  ;;  %v251_v4 = vld [vmem:[%s7846_s24 + $0xc8] sm:$0xff] }
  0x7d   : > { %3067 = vmatprep.mubr.f32.mxu0 %v7704_v0 }
  0x7f   : > { %6550 = vmatmul.mubr.msk.f32.gmra.mrb[20].mxu1 %vm278_vm0, %v236_v5  ;;  %v8017_v5 = vld [vmem:[%s7846_s24 + $0x4c] sm:$0xff] }
  0x80   : > { %6694 = vmatmul.mubr.msk.f32.gmra.mrb[20].mxu0 %vm278_vm0, %v2793_v6  ;;  %517 = vmatprep.mubr.f32.mxu1 %v7704_v0  ;;  %v252_v6 = vld [vmem:[%s7846_s24 + $0xd0] sm:$0xff] }
  0x81   : > { %3073 = vmatprep.mubr.f32.mxu0 %v7704_v0 }
  0x83   : > { %6551 = vmatmul.mubr.msk.f32.gmra.mrb[22].mxu1 %vm278_vm0, %v237_v7  ;;  %v8026_v7 = vld [vmem:[%s7846_s24 + $0x54] sm:$0xff] }
  0x84   : > { %6695 = vmatmul.mubr.msk.f32.gmra.mrb[22].mxu0 %vm278_vm0, %v2794_v9  ;;  %523 = vmatprep.mubr.f32.mxu1 %v7704_v0  ;;  %v253_v9 = vld [vmem:[%s7846_s24 + $0xd8] sm:$0xff] }
  0x85   : > { %3079 = vmatprep.mubr.f32.mxu0 %v7704_v0 }
  0x87   : > { %6552 = vmatmul.mubr.msk.f32.gmra.mrb[24].mxu1 %vm278_vm0, %v238_v10  ;;  %v8035_v10 = vld [vmem:[%s7846_s24 + $0x5c] sm:$0xff] }
  0x88   : > { %6696 = vmatmul.mubr.msk.f32.gmra.mrb[24].mxu0 %vm278_vm0, %v2795_v11  ;;  %529 = vmatprep.mubr.f32.mxu1 %v7704_v0  ;;  %v254_v11 = vld [vmem:[%s7846_s24 + $0xe0] sm:$0xff] }
  0x89   : > { %3085 = vmatprep.mubr.f32.mxu0 %v7704_v0 }
  0x8b   : > { %6553 = vmatmul.mubr.msk.f32.gmra.mrb[26].mxu1 %vm278_vm0, %v239_v12  ;;  %v8044_v12 = vld [vmem:[%s7846_s24 + $0x64] sm:$0xff] }
  0x8c   : > { %6697 = vmatmul.mubr.msk.f32.gmra.mrb[26].mxu0 %vm278_vm0, %v2796_v14  ;;  %535 = vmatprep.mubr.f32.mxu1 %v7704_v0  ;;  %v255_v14 = vld [vmem:[%s7846_s24 + $0xe8] sm:$0xff] }
  0x8d   : > { %3091 = vmatprep.mubr.f32.mxu0 %v7704_v0 }
  0x8f   : > { %6554 = vmatmul.mubr.msk.f32.gmra.mrb[28].mxu1 %vm278_vm0, %v240_v15  ;;  %v8053_v15 = vld [vmem:[%s7846_s24 + $0x6c] sm:$0xff] }
  0x90   : > { %6698 = vmatmul.mubr.msk.f32.gmra.mrb[28].mxu0 %vm278_vm0, %v2797_v16  ;;  %541 = vmatprep.mubr.f32.mxu1 %v7704_v0  ;;  %v256_v16 = vld [vmem:[%s7846_s24 + $0xf0] sm:$0xff] }
  0x91   : > { %3097 = vmatprep.mubr.f32.mxu0 %v7704_v0 }
  0x93   : > { %6555 = vmatmul.mubr.msk.f32.gmra.mrb[30].mxu1 %vm278_vm0, %v241_v17  ;;  %v8062_v17 = vld [vmem:[%s7846_s24 + $0x74] sm:$0xff] }
  0x94   : > { %6699 = vmatmul.mubr.msk.f32.gmra.mrb[30].mxu0 %vm278_vm0, %v2798_v19  ;;  %547 = vmatprep.mubr.f32.mxu1 %v7704_v0  ;;  %v257_v19 = vld [vmem:[%s7846_s24 + $0xf8] sm:$0xff] }
  0x95   : > { %3103 = vmatprep.mubr.f32.mxu0 %v7704_v0 }
  0x97   : > { %6556 = vmatmul.mubr.msk.f32.gmra.mrb[32].mxu1 %vm278_vm0, %v242_v20  ;;  %v8071_v20 = vld [vmem:[%s7846_s24 + $0x7c] sm:$0xff] }
  0x98   : > { %6700 = vmatmul.mubr.msk.f32.gmra.mrb[32].mxu0 %vm278_vm0, %v2799_v21  ;;  %553 = vmatprep.mubr.f32.mxu1 %v7704_v0  ;;  %v258_v21 = vld [vmem:[%s7846_s24 + $0x100] sm:$0xff] }
  0x99   : > { %3109 = vmatprep.mubr.f32.mxu0 %v7704_v0 }
  0x9b   : > { %6557 = vmatmul.mubr.msk.f32.gmra.mrb[34].mxu1 %vm278_vm0, %v243_v22  ;;  %v8080_v22 = vld [vmem:[%s7846_s24 + $0x84] sm:$0xff] }
  0x9c   : > { %6701 = vmatmul.mubr.msk.f32.gmra.mrb[34].mxu0 %vm278_vm0, %v2800_v23  ;;  %559 = vmatprep.mubr.f32.mxu1 %v7704_v0  ;;  %v259_v23 = vld [vmem:[%s7846_s24 + $0x108] sm:$0xff] }
  0x9d   : > { %3664 = vmatprep.mubr.f32.mxu0 %v7704_v0 }
  0x9f   : > { %6558 = vmatmul.mubr.msk.f32.gmra.mrb[36].mxu1 %vm278_vm0, %v244_v29  ;;  %v8107_v29 = vld [vmem:[%s7846_s24 + $0x9c] sm:$0xff] }
  0xa0   : > { %6720 = vmatmul.mubr.msk.f32.vlgmr.msra.gmra.mrb[0].mxu0 %vm278_vm0, %v3440_v30  ;;  %565 = vmatprep.mubr.f32.mxu1 %v7704_v0  ;;  %v1505_v30 = vld [vmem:[#allocation3 + $0x100] sm:$0xff] }
  0xa1   : > { %6965 = vmatpush1.bf16.msra.mxu0 %v6964_v32  ;;  %3670 = vmatprep.mubr.f32.mxu0 %v7704_v0  ;;  %v1507_v32 = vld [vmem:[#allocation3 + $0x110] sm:$0xff] }
  0xa2   : > { %6967 = vmatprep.subr.bf16.mxu0 %v6966_v33  ;;  %v1510_v33 = vld [vmem:[#allocation3 + $0x128] sm:$0xff]  ;;  %v6900_v36 = vpack.c.bf16 %v1507_v32, %v1505_v30  ;;  %v8179_v30 = vld [vmem:[%s7846_s24 + $0xdc] sm:$0xff] }
  0xa3   : > { %6559 = vmatmul.mubr.msk.f32.gmra.mrb[38].mxu1 %vm278_vm0, %v245_v38  ;;  %v6902_v38 = vpack.c.bf16 %v1512_v34, %v1510_v33  ;;  %v820_v32 = vld [vmem:[%s7846_s24 + $0x41] sm:$0xff]  ;;  %v821_v34 = vld [vmem:[%s7846_s24 + $0x49] sm:$0xff] }
  0xa4   : > { %6721 = vmatmul.mubr.msk.f32.gmra.mrb[2].mxu0 %vm278_vm0, %v3441_v40  ;;  %571 = vmatprep.mubr.f32.mxu1 %v7704_v0  ;;  %v1509_v40 = vld [vmem:[#allocation3 + $0x120] sm:$0xff] }
  0xa5   : > { %3676 = vmatprep.mubr.f32.mxu0 %v7704_v0  ;;  %6969 = vmatpush1.bf16.msra.mxu0 %v6968_v41  ;;  %v1511_v41 = vld [vmem:[#allocation3 + $0x130] sm:$0xff]  ;;  %v8188_v33 = vld [vmem:[%s7846_s24 + $0xe4] sm:$0xff] }
  0xa6   : > { %6971 = vmatprep.subr.bf16.mxu0 %v6970_v42  ;;  %v1514_v42 = vld [vmem:[#allocation3 + $0x148] sm:$0xff]  ;;  %v6904_v47 = vpack.c.bf16 %v1511_v41, %v1509_v40  ;;  %v823_v40 = vld [vmem:[%s7846_s24 + $0x59] sm:$0xff] }
  0xa7   : > { %6560 = vmatmul.mubr.msk.f32.gmra.mrb[40].mxu1 %vm278_vm0, %v246_v48  ;;  %v6906_v48 = vpack.c.bf16 %v1516_v43, %v1514_v42  ;;  %v8215_v41 = vld [vmem:[%s7846_s24 + $0xfc] sm:$0xff]  ;;  %v8224_v43 = vld [vmem:[%s7846_s24 + $0x104] sm:$0xff] }
  0xa8   : > { %6722 = vmatmul.mubr.msk.f32.gmra.mrb[4].mxu0 %vm278_vm0, %v7972_v49  ;;  %577 = vmatprep.mubr.f32.mxu1 %v7704_v0  ;;  %v824_v42 = vld [vmem:[%s7846_s24 + $0x61] sm:$0xff] }
  0xa9   : > { %3682 = vmatprep.mubr.f32.mxu0 %v7704_v0  ;;  %6973 = vmatpush1.bf16.msra.mxu0 %v6972_v50  ;;  %v1513_v50 = vld [vmem:[#allocation3 + $0x140] sm:$0xff] }
  0xaa   : > { %6975 = vmatprep.subr.bf16.mxu0 %v6974_v51  ;;  %v1515_v51 = vld [vmem:[#allocation3 + $0x150] sm:$0xff] }
  0xab   : > { %6561 = vmatmul.mubr.msk.f32.gmra.mrb[42].mxu1 %vm278_vm0, %v247_v55  ;;  %v814_v55 = vld [vmem:[%s7846_s24 + $0x11] sm:$0xff] }
  0xac   : > { %6723 = vmatmul.mubr.msk.f32.gmra.mrb[6].mxu0 %vm278_vm0, %v7981_v56  ;;  %583 = vmatprep.mubr.f32.mxu1 %v7704_v0 }
  0xad   : > { %3688 = vmatprep.mubr.f32.mxu0 %v7704_v0  ;;  %6977 = vmatpush1.bf16.msra.mxu0 %v6976_v57  ;;  %v8134_v57 = vld [vmem:[%s7846_s24 + $0xb4] sm:$0xff] }
  0xae   : > { %6979 = vmatprep.subr.bf16.mxu0 %v6978_v1  ;;  %v815_v1 = vld [vmem:[%s7846_s24 + $0x19] sm:$0xff] }
  0xaf   : > { %6562 = vmatmul.mubr.msk.f32.gmra.mrb[44].mxu1 %vm278_vm0, %v248_v58  ;;  %v6908_v58 = vpack.c.bf16 %v1515_v51, %v1513_v50  ;;  %v8242_v50 = vld [vmem:[%s7846_s24 + $0x114] sm:$0xff] }
  0xb0   : > { %6724 = vmatmul.mubr.msk.f32.gmra.mrb[8].mxu0 %vm278_vm0, %v7990_v59  ;;  %589 = vmatprep.mubr.f32.mxu1 %v7704_v0  ;;  %v827_v51 = vld [vmem:[%s7846_s24 + $0x79] sm:$0xff] }
  0xb1   : > { %3694 = vmatprep.mubr.f32.mxu0 %v7704_v0 }
  0xb3   : > { %6563 = vmatmul.mubr.msk.f32.gmra.mrb[46].mxu1 %vm278_vm0, %v249_v60  ;;  %v6910_v60 = vpack.c.bf16 %v1520_v54, %v1518_v53  ;;  %v8251_v53 = vld [vmem:[%s7846_s24 + $0x11c] sm:$0xff] }
  0xb4   : > { %6725 = vmatmul.mubr.msk.f32.gmra.mrb[10].mxu0 %vm278_vm0, %v7999_v63  ;;  %595 = vmatprep.mubr.f32.mxu1 %v7704_v0  ;;  %v828_v54 = vld [vmem:[%s7846_s24 + $0x81] sm:$0xff] }
  0xb5   : > { %3700 = vmatprep.mubr.f32.mxu0 %v7704_v0 }
  0xb7   : > { %6564 = vmatmul.mubr.msk.f32.gmra.mrb[48].mxu1 %vm278_vm0, %v250_v2  ;;  %v8143_v2 = vld [vmem:[%s7846_s24 + $0xbc] sm:$0xff] }
  0xb8   : > { %6726 = vmatmul.mubr.msk.f32.gmra.mrb[12].mxu0 %vm278_vm0, %v8008_v3  ;;  %601 = vmatprep.mubr.f32.mxu1 %v7704_v0 }
  0xb9   : > { %3706 = vmatprep.mubr.f32.mxu0 %v7704_v0 }
  0xbb   : > { %6565 = vmatmul.mubr.msk.f32.gmra.mrb[50].mxu1 %vm278_vm0, %v251_v4  ;;  %v6912_v4 = vpack.c.bf16 %v1519_v62, %v1517_v61  ;;  %v4790_v61 = vld [vmem:[#allocation3 + $0x380] sm:$0xff]  ;;  %v4792_v62 = vld [vmem:[#allocation3 + $0x390] sm:$0xff] }
  0xbc   : > { %6727 = vmatmul.mubr.msk.f32.gmra.mrb[14].mxu0 %vm278_vm0, %v8017_v5  ;;  %607 = vmatprep.mubr.f32.mxu1 %v7704_v0 }
  0xbd   : > { %3712 = vmatprep.mubr.f32.mxu0 %v7704_v0 }
  0xbf   : > { %6566 = vmatmul.mubr.msk.f32.gmra.mrb[52].mxu1 %vm278_vm0, %v252_v6  ;;  %v816_v6 = vld [vmem:[%s7846_s24 + $0x21] sm:$0xff] }
  0xc0   : > { %6728 = vmatmul.mubr.msk.f32.gmra.mrb[16].mxu0 %vm278_vm0, %v8026_v7  ;;  %613 = vmatprep.mubr.f32.mxu1 %v7704_v0 }
  0xc1   : > { %3718 = vmatprep.mubr.f32.mxu0 %v7704_v0 }
  0xc3   : > { %6567 = vmatmul.mubr.msk.f32.gmra.mrb[54].mxu1 %vm278_vm0, %v253_v9  ;;  %v8152_v9 = vld [vmem:[%s7846_s24 + $0xc4] sm:$0xff] }
  0xc4   : > { %6729 = vmatmul.mubr.msk.f32.gmra.mrb[18].mxu0 %vm278_vm0, %v8035_v10  ;;  %619 = vmatprep.mubr.f32.mxu1 %v7704_v0 }
  0xc5   : > { %3724 = vmatprep.mubr.f32.mxu0 %v7704_v0 }
  0xc7   : > { %6568 = vmatmul.mubr.msk.f32.gmra.mrb[56].mxu1 %vm278_vm0, %v254_v11  ;;  %v2163_v11 = vld [vmem:[#allocation3 + $0x188] sm:$0xff] }
  0xc8   : > { %6730 = vmatmul.mubr.msk.f32.gmra.mrb[20].mxu0 %vm278_vm0, %v8044_v12  ;;  %625 = vmatprep.mubr.f32.mxu1 %v7704_v0 }
  0xc9   : > { %3730 = vmatprep.mubr.f32.mxu0 %v7704_v0 }
  0xcb   : > { %6569 = vmatmul.mubr.msk.f32.gmra.mrb[58].mxu1 %vm278_vm0, %v255_v14  ;;  %v2165_v14 = vld [vmem:[#allocation3 + $0x198] sm:$0xff] }
  0xcc   : > { %6731 = vmatmul.mubr.msk.f32.gmra.mrb[22].mxu0 %vm278_vm0, %v8053_v15  ;;  %631 = vmatprep.mubr.f32.mxu1 %v7704_v0 }
  0xcd   : > { %3736 = vmatprep.mubr.f32.mxu0 %v7704_v0 }
  0xcf   : > { %6570 = vmatmul.mubr.msk.f32.gmra.mrb[60].mxu1 %vm278_vm0, %v256_v16  ;;  %v817_v16 = vld [vmem:[%s7846_s24 + $0x29] sm:$0xff] }
  0xd0   : > { %6732 = vmatmul.mubr.msk.f32.gmra.mrb[24].mxu0 %vm278_vm0, %v8062_v17  ;;  %637 = vmatprep.mubr.f32.mxu1 %v7704_v0 }
  0xd1   : > { %3742 = vmatprep.mubr.f32.mxu0 %v7704_v0 }
  0xd3   : > { %6571 = vmatmul.mubr.msk.f32.gmra.mrb[62].mxu1 %vm278_vm0, %v257_v19  ;;  %v6914_v19 = vpack.c.bf16 %v2165_v14, %v2163_v11  ;;  %v6980_v11 = vpack.c.bf16 %v4792_v62, %v4790_v61  ;;  %v4804_v61 = vld [vmem:[#allocation3 + $0x3f0] sm:$0xff] }
  0xd4   : > { %6733 = vmatmul.mubr.msk.f32.gmra.mrb[26].mxu0 %vm278_vm0, %v8071_v20  ;;  %643 = vmatprep.mubr.f32.mxu1 %v7704_v0 }
  0xd5   : > { %3748 = vmatprep.mubr.f32.mxu0 %v7704_v0 }
  0xd7   : > { %6572 = vmatmul.mubr.msk.f32.gmra.mrb[64].mxu1 %vm278_vm0, %v258_v21  ;;  %v8161_v21 = vld [vmem:[%s7846_s24 + $0xcc] sm:$0xff] }
  0xd8   : > { %6734 = vmatmul.mubr.msk.f32.gmra.mrb[28].mxu0 %vm278_vm0, %v8080_v22  ;;  %649 = vmatprep.mubr.f32.mxu1 %v7704_v0 }
  0xd9   : > { %3754 = vmatprep.mubr.f32.mxu0 %v7704_v0 }
  0xdb   : > { %6573 = vmatmul.mubr.msk.f32.gmra.mrb[66].mxu1 %vm278_vm0, %v259_v23  ;;  %v818_v23 = vld [vmem:[%s7846_s24 + $0x31] sm:$0xff] }
  0xdc   : > { %6735 = vmatmul.mubr.msk.f32.gmra.mrb[30].mxu0 %vm278_vm0, %v8089_v24  ;;  %655 = vmatprep.mubr.f32.mxu1 %v7704_v0 }
  0xdd   : > { %3760 = vmatprep.mubr.f32.mxu0 %v7704_v0 }
  0xdf   : > { %6574 = vmatmul.mubr.msk.f32.gmra.mrb[68].mxu1 %vm278_vm0, %v260_v25  ;;  %v8170_v25 = vld [vmem:[%s7846_s24 + $0xd4] sm:$0xff] }
  0xe0   : > { %6736 = vmatmul.mubr.msk.f32.gmra.mrb[32].mxu0 %vm278_vm0, %v8098_v27  ;;  %661 = vmatprep.mubr.f32.mxu1 %v7704_v0 }
  0xe1   : > { %3766 = vmatprep.mubr.f32.mxu0 %v7704_v0 }
  0xe3   : > { %6575 = vmatmul.mubr.msk.f32.gmra.mrb[70].mxu1 %vm278_vm0, %v261_v28  ;;  %v819_v28 = vld [vmem:[%s7846_s24 + $0x39] sm:$0xff] }
  0xe4   : > { %6737 = vmatmul.mubr.msk.f32.gmra.mrb[34].mxu0 %vm278_vm0, %v8107_v29  ;;  %1036 = vmatprep.mubr.f32.mxu1 %v7704_v0 }
  0xe5   : > { %3772 = vmatprep.mubr.f32.mxu0 %v7704_v0 }
  0xe7   : > { %6576 = vmatmul.mubr.msk.f32.vlgmr.msra.gmra.mrb[0].mxu1 %vm278_vm0, %v812_v35  ;;  %v8197_v35 = vld [vmem:[%s7846_s24 + $0xec] sm:$0xff] }
  0xe8   : > { %6738 = vmatmul.mubr.msk.f32.gmra.mrb[36].mxu0 %vm278_vm0, %v8116_v37  ;;  %6901 = vmatpush1.bf16.msra.mxu1 %v6900_v36  ;;  %v822_v36 = vld [vmem:[%s7846_s24 + $0x51] sm:$0xff] }
  0xe9   : > { %1042 = vmatprep.mubr.f32.mxu1 %v7704_v0  ;;  %3778 = vmatprep.mubr.f32.mxu0 %v7704_v0 }
  0xea   : > { %6903 = vmatprep.subr.bf16.mxu1 %v6902_v38  ;;  %v8206_v38 = vld [vmem:[%s7846_s24 + $0xf4] sm:$0xff] }
  0xeb   : > { %6577 = vmatmul.mubr.msk.f32.gmra.mrb[2].mxu1 %vm278_vm0, %v813_v45  ;;  %v825_v45 = vld [vmem:[%s7846_s24 + $0x69] sm:$0xff] }
  0xec   : > { %6739 = vmatmul.mubr.msk.f32.gmra.mrb[38].mxu0 %vm278_vm0, %v8125_v46  ;;  %1048 = vmatprep.mubr.f32.mxu1 %v7704_v0 }
  0xed   : > { %3784 = vmatprep.mubr.f32.mxu0 %v7704_v0  ;;  %6905 = vmatpush1.bf16.msra.mxu1 %v6904_v47  ;;  %v8233_v47 = vld [vmem:[%s7846_s24 + $0x10c] sm:$0xff] }
  0xee   : > { %6907 = vmatprep.subr.bf16.mxu1 %v6906_v48  ;;  %v826_v48 = vld [vmem:[%s7846_s24 + $0x71] sm:$0xff] }
  0xef   : > { %6578 = vmatmul.mubr.msk.f32.gmra.mrb[4].mxu1 %vm278_vm0, %v814_v55  ;;  %v8260_v55 = vld [vmem:[%s7846_s24 + $0x124] sm:$0xff] }
  0xf0   : > { %6740 = vmatmul.mubr.msk.f32.gmra.mrb[40].mxu0 %vm278_vm0, %v8134_v57  ;;  %1054 = vmatprep.mubr.f32.mxu1 %v7704_v0 }
  0xf1   : > { %3790 = vmatprep.mubr.f32.mxu0 %v7704_v0  ;;  %6909 = vmatpush1.bf16.msra.mxu1 %v6908_v58  ;;  %v829_v58 = vld [vmem:[%s7846_s24 + $0x89] sm:$0xff] }
  0xf2   : > { %6911 = vmatprep.subr.bf16.mxu1 %v6910_v60  ;;  %v8269_v60 = vld [vmem:[%s7846_s24 + $0x12c] sm:$0xff] }
  0xf3   : > { %6579 = vmatmul.mubr.msk.f32.gmra.mrb[6].mxu1 %vm278_vm0, %v815_v1  ;;  %v4795_v1 = vld [vmem:[#allocation3 + $0x3a8] sm:$0xff] }
  0xf4   : > { %6741 = vmatmul.mubr.msk.f32.gmra.mrb[42].mxu0 %vm278_vm0, %v8143_v2  ;;  %1060 = vmatprep.mubr.f32.mxu1 %v7704_v0 }
  0xf5   : > { %3796 = vmatprep.mubr.f32.mxu0 %v7704_v0  ;;  %6913 = vmatpush1.bf16.msra.mxu1 %v6912_v4  ;;  %v4797_v4 = vld [vmem:[#allocation3 + $0x3b8] sm:$0xff] }
  0xf6   : > { %6915 = vmatprep.subr.bf16.mxu1 %v6914_v19  ;;  %v6982_v14 = vpack.c.bf16 %v4797_v4, %v4795_v1  ;;  %v4796_v19 = vld [vmem:[#allocation3 + $0x3b0] sm:$0xff]  ;;  %v5448_v4 = vld [vmem:[#allocation3 + $0x408] sm:$0xff] }
  0xf7   : > { %6580 = vmatmul.mubr.msk.f32.gmra.mrb[8].mxu1 %vm278_vm0, %v816_v6  ;;  %v830_v6 = vld [vmem:[%s7846_s24 + $0x91] sm:$0xff] }
  0xf8   : > { %6742 = vmatmul.mubr.msk.f32.gmra.mrb[44].mxu0 %vm278_vm0, %v8152_v9  ;;  %1066 = vmatprep.mubr.f32.mxu1 %v7704_v0  ;;  %v834_v1 = vld [vmem:[%s7846_s24 + $0xb1] sm:$0xff] }
  0xf9   : > { %3802 = vmatprep.mubr.f32.mxu0 %v7704_v0 }
  0xfb   : > { %6581 = vmatmul.mubr.msk.f32.gmra.mrb[10].mxu1 %vm278_vm0, %v817_v16  ;;  %v4794_v16 = vld [vmem:[#allocation3 + $0x3a0] sm:$0xff] }
  0xfc   : > { %6743 = vmatmul.mubr.msk.f32.gmra.mrb[46].mxu0 %vm278_vm0, %v8161_v21  ;;  %1072 = vmatprep.mubr.f32.mxu1 %v7704_v0 }
  0xfd   : > { %3808 = vmatprep.mubr.f32.mxu0 %v7704_v0 }
  0xff   : > { %6582 = vmatmul.mubr.msk.f32.gmra.mrb[12].mxu1 %vm278_vm0, %v818_v23  ;;  %v4799_v23 = vld [vmem:[#allocation3 + $0x3c8] sm:$0xff] }
 0x100   : > { %6744 = vmatmul.mubr.msk.f32.gmra.mrb[48].mxu0 %vm278_vm0, %v8170_v25  ;;  %1078 = vmatprep.mubr.f32.mxu1 %v7704_v0 }
 0x101   : > { %3814 = vmatprep.mubr.f32.mxu0 %v7704_v0 }
 0x103   : > { %6583 = vmatmul.mubr.msk.f32.gmra.mrb[14].mxu1 %vm278_vm0, %v819_v28  ;;  %v4801_v28 = vld [vmem:[#allocation3 + $0x3d8] sm:$0xff] }
 0x104   : > { %6745 = vmatmul.mubr.msk.f32.gmra.mrb[50].mxu0 %vm278_vm0, %v8179_v30  ;;  %1084 = vmatprep.mubr.f32.mxu1 %v7704_v0 }
 0x105   : > { %3820 = vmatprep.mubr.f32.mxu0 %v7704_v0 }
 0x107   : > { %6584 = vmatmul.mubr.msk.f32.gmra.mrb[16].mxu1 %vm278_vm0, %v820_v32  ;;  %v831_v32 = vld [vmem:[%s7846_s24 + $0x99] sm:$0xff] }
 0x108   : > { %6746 = vmatmul.mubr.msk.f32.gmra.mrb[52].mxu0 %vm278_vm0, %v8188_v33  ;;  %1090 = vmatprep.mubr.f32.mxu1 %v7704_v0 }
 0x109   : > { %3826 = vmatprep.mubr.f32.mxu0 %v7704_v0 }
 0x10b   : > { %6585 = vmatmul.mubr.msk.f32.gmra.mrb[18].mxu1 %vm278_vm0, %v821_v34  ;;  %v6984_v34 = vpack.c.bf16 %v4796_v19, %v4794_v16  ;;  %v2164_v16 = vld [vmem:[#allocation3 + $0x190] sm:$0xff]  ;;  %v2169_v19 = vld [vmem:[#allocation3 + $0x1b8] sm:$0xff] }
 0x10c   : > { %6747 = vmatmul.mubr.msk.f32.gmra.mrb[54].mxu0 %vm278_vm0, %v8197_v35  ;;  %1096 = vmatprep.mubr.f32.mxu1 %v7704_v0 }
 0x10d   : > { %3832 = vmatprep.mubr.f32.mxu0 %v7704_v0 }
 0x10f   : > { %6586 = vmatmul.mubr.msk.f32.gmra.mrb[20].mxu1 %vm278_vm0, %v822_v36  ;;  %v6986_v36 = vpack.c.bf16 %v4801_v28, %v4799_v23  ;;  %v1469_v23 = vld [vmem:[%s7846_s24 + $0x2] sm:$0xff] }
 0x110   : > { %6748 = vmatmul.mubr.msk.f32.gmra.mrb[56].mxu0 %vm278_vm0, %v8206_v38  ;;  %1102 = vmatprep.mubr.f32.mxu1 %v7704_v0 }
 0x111   : > { %3838 = vmatprep.mubr.f32.mxu0 %v7704_v0 }
 0x113   : > { %6587 = vmatmul.mubr.msk.f32.gmra.mrb[22].mxu1 %vm278_vm0, %v823_v40  ;;  %v4798_v40 = vld [vmem:[#allocation3 + $0x3c0] sm:$0xff] }
 0x114   : > { %6749 = vmatmul.mubr.msk.f32.gmra.mrb[58].mxu0 %vm278_vm0, %v8215_v41  ;;  %1108 = vmatprep.mubr.f32.mxu1 %v7704_v0 }
 0x115   : > { %3844 = vmatprep.mubr.f32.mxu0 %v7704_v0 }
 0x117   : > { %6588 = vmatmul.mubr.msk.f32.gmra.mrb[24].mxu1 %vm278_vm0, %v824_v42  ;;  %v4800_v42 = vld [vmem:[#allocation3 + $0x3d0] sm:$0xff] }
 0x118   : > { %6750 = vmatmul.mubr.msk.f32.gmra.mrb[60].mxu0 %vm278_vm0, %v8224_v43  ;;  %1114 = vmatprep.mubr.f32.mxu1 %v7704_v0 }
 0x119   : > { %3850 = vmatprep.mubr.f32.mxu0 %v7704_v0 }
 0x11b   : > { %6589 = vmatmul.mubr.msk.f32.gmra.mrb[26].mxu1 %vm278_vm0, %v825_v45  ;;  %v4803_v45 = vld [vmem:[#allocation3 + $0x3e8] sm:$0xff] }
 0x11c   : > { %6751 = vmatmul.mubr.msk.f32.gmra.mrb[62].mxu0 %vm278_vm0, %v8233_v47  ;;  %1120 = vmatprep.mubr.f32.mxu1 %v7704_v0 }
 0x11d   : > { %3856 = vmatprep.mubr.f32.mxu0 %v7704_v0 }
 0x11f   : > { %6590 = vmatmul.mubr.msk.f32.gmra.mrb[28].mxu1 %vm278_vm0, %v826_v48  ;;  %v4805_v48 = vld [vmem:[#allocation3 + $0x3f8] sm:$0xff] }
 0x120   : > { %6752 = vmatmul.mubr.msk.f32.gmra.mrb[64].mxu0 %vm278_vm0, %v8242_v50  ;;  %1126 = vmatprep.mubr.f32.mxu1 %v7704_v0 }
 0x121   : > { %3862 = vmatprep.mubr.f32.mxu0 %v7704_v0 }
 0x123   : > { %6591 = vmatmul.mubr.msk.f32.gmra.mrb[30].mxu1 %vm278_vm0, %v827_v51  ;;  %v6988_v51 = vpack.c.bf16 %v4800_v42, %v4798_v40  ;;  %v2173_v40 = vld [vmem:[#allocation3 + $0x1d8] sm:$0xff]  ;;  %v1470_v42 = vld [vmem:[%s7846_s24 + $0xa] sm:$0xff] }
 0x124   : > { %6753 = vmatmul.mubr.msk.f32.gmra.mrb[66].mxu0 %vm278_vm0, %v8251_v53  ;;  %1132 = vmatprep.mubr.f32.mxu1 %v7704_v0 }
 0x125   : > { %3868 = vmatprep.mubr.f32.mxu0 %v7704_v0 }
 0x127   : > { %6592 = vmatmul.mubr.msk.f32.gmra.mrb[32].mxu1 %vm278_vm0, %v828_v54  ;;  %v6990_v54 = vpack.c.bf16 %v4805_v48, %v4803_v45  ;;  %v2170_v48 = vld [vmem:[#allocation3 + $0x1c0] sm:$0xff] }
 0x128   : > { %6754 = vmatmul.mubr.msk.f32.gmra.mrb[68].mxu0 %vm278_vm0, %v8260_v55  ;;  %1138 = vmatprep.mubr.f32.mxu1 %v7704_v0 }
 0x129   : > { %3874 = vmatprep.mubr.f32.mxu0 %v7704_v0 }
 0x12b   : > { %6593 = vmatmul.mubr.msk.f32.gmra.mrb[34].mxu1 %vm278_vm0, %v829_v58  ;;  %v4802_v58 = vld [vmem:[#allocation3 + $0x3e0] sm:$0xff] }
 0x12c   : > { %6755 = vmatmul.mubr.msk.f32.gmra.mrb[70].mxu0 %vm278_vm0, %v8269_v60  ;;  %1144 = vmatprep.mubr.f32.mxu1 %v7704_v0  ;;  %v6992_v62 = vpack.c.bf16 %v4804_v61, %v4802_v58 }
 0x12d   : > { %4321 = vmatprep.mubr.f32.mxu0 %v7704_v0 }
 0x12f   : > { %6594 = vmatmul.mubr.msk.f32.gmra.mrb[36].mxu1 %vm278_vm0, %v830_v6  ;;  %v5450_v6 = vld [vmem:[#allocation3 + $0x418] sm:$0xff] }
 0x130   : > { %6756 = vmatmul.mubr.msk.f32.vlgmr.msra.gmra.mrb[0].mxu0 %vm278_vm0, %v7972_v49  ;;  %1150 = vmatprep.mubr.f32.mxu1 %v7704_v0  ;;  %v832_v49 = vld [vmem:[%s7846_s24 + $0xa1] sm:$0xff] }
 0x131   : > { %6981 = vmatpush1.bf16.msra.mxu0 %v6980_v11  ;;  %4327 = vmatprep.mubr.f32.mxu0 %v7704_v0  ;;  %v837_v11 = vld [vmem:[%s7846_s24 + $0xc9] sm:$0xff] }
 0x132   : > { %6983 = vmatprep.subr.bf16.mxu0 %v6982_v14  ;;  %v2162_v14 = vld [vmem:[#allocation3 + $0x180] sm:$0xff] }
 0x133   : > { %6595 = vmatmul.mubr.msk.f32.gmra.mrb[38].mxu1 %vm278_vm0, %v831_v32  ;;  %v6916_v28 = vpack.c.bf16 %v2164_v16, %v2162_v14  ;;  %v2166_v32 = vld [vmem:[#allocation3 + $0x1a0] sm:$0xff] }
 0x134   : > { %6757 = vmatmul.mubr.msk.f32.gmra.mrb[2].mxu0 %vm278_vm0, %v7981_v56  ;;  %1156 = vmatprep.mubr.f32.mxu1 %v7704_v0  ;;  %v833_v56 = vld [vmem:[%s7846_s24 + $0xa9] sm:$0xff]  ;;  %v5455_v16 = vld [vmem:[#allocation3 + $0x440] sm:$0xff] }
 0x135   : > { %4333 = vmatprep.mubr.f32.mxu0 %v7704_v0  ;;  %6985 = vmatpush1.bf16.msra.mxu0 %v6984_v34  ;;  %v2168_v34 = vld [vmem:[#allocation3 + $0x1b0] sm:$0xff] }
 0x136   : > { %6987 = vmatprep.subr.bf16.mxu0 %v6986_v36  ;;  %v2171_v36 = vld [vmem:[#allocation3 + $0x1c8] sm:$0xff] }
 0x137   : > { %6596 = vmatmul.mubr.msk.f32.gmra.mrb[40].mxu1 %vm278_vm0, %v832_v49  ;;  %v6922_v45 = vpack.c.bf16 %v2173_v40, %v2171_v36  ;;  %v2172_v49 = vld [vmem:[#allocation3 + $0x1d0] sm:$0xff]  ;;  %v5459_v36 = vld [vmem:[#allocation3 + $0x460] sm:$0xff] }
 0x138   : > { %6758 = vmatmul.mubr.msk.f32.gmra.mrb[4].mxu0 %vm278_vm0, %v7990_v59  ;;  %1162 = vmatprep.mubr.f32.mxu1 %v7704_v0  ;;  %v835_v59 = vld [vmem:[%s7846_s24 + $0xb9] sm:$0xff]  ;;  %v6924_v58 = vpack.c.bf16 %v2172_v49, %v2170_v48  ;;  %v5461_v40 = vld [vmem:[#allocation3 + $0x470] sm:$0xff]  ;;  %v4758_v49 = vld [vmem:[%s7846_s24 + $0x45] sm:$0xff] }
 0x139   : > { %4339 = vmatprep.mubr.f32.mxu0 %v7704_v0  ;;  %6989 = vmatpush1.bf16.msra.mxu0 %v6988_v51  ;;  %v2175_v51 = vld [vmem:[#allocation3 + $0x1e8] sm:$0xff]  ;;  %v8577_v48 = vld [vmem:[%s7846_s24 + $0xb2] sm:$0xff] }
 0x13a   : > { %6991 = vmatprep.subr.bf16.mxu0 %v6990_v54  ;;  %v2177_v54 = vld [vmem:[#allocation3 + $0x1f8] sm:$0xff] }
 0x13b   : > { %6597 = vmatmul.mubr.msk.f32.gmra.mrb[42].mxu1 %vm278_vm0, %v833_v56  ;;  %v6926_v61 = vpack.c.bf16 %v2177_v54, %v2175_v51  ;;  %v2174_v56 = vld [vmem:[#allocation3 + $0x1e0] sm:$0xff]  ;;  %v4759_v54 = vld [vmem:[%s7846_s24 + $0x4d] sm:$0xff] }
 0x13c   : > { %6759 = vmatmul.mubr.msk.f32.gmra.mrb[6].mxu0 %vm278_vm0, %v7999_v63  ;;  %1168 = vmatprep.mubr.f32.mxu1 %v7704_v0  ;;  %v6994_v63 = vpack.c.bf16 %v5450_v6, %v5448_v4  ;;  %v5447_v4 = vld [vmem:[#allocation3 + $0x400] sm:$0xff]  ;;  %v5449_v6 = vld [vmem:[#allocation3 + $0x410] sm:$0xff] }
 0x13d   : > { %4345 = vmatprep.mubr.f32.mxu0 %v7704_v0  ;;  %6993 = vmatpush1.bf16.msra.mxu0 %v6992_v62  ;;  %v2176_v62 = vld [vmem:[#allocation3 + $0x1f0] sm:$0xff]  ;;  %v8586_v51 = vld [vmem:[%s7846_s24 + $0xba] sm:$0xff] }
 0x13e   : > { %6995 = vmatprep.subr.bf16.mxu0 %v6994_v63  ;;  %v5452_v63 = vld [vmem:[#allocation3 + $0x428] sm:$0xff] }
 0x13f   : > { %6598 = vmatmul.mubr.msk.f32.gmra.mrb[44].mxu1 %vm278_vm0, %v834_v1  ;;  %v6928_v1 = vpack.c.bf16 %v2176_v62, %v2174_v56  ;;  %v8604_v56 = vld [vmem:[%s7846_s24 + $0xca] sm:$0xff]  ;;  %v4761_v62 = vld [vmem:[%s7846_s24 + $0x5d] sm:$0xff] }
 0x140   : > { %6760 = vmatmul.mubr.msk.f32.gmra.mrb[8].mxu0 %vm278_vm0, %v8008_v3  ;;  %1174 = vmatprep.mubr.f32.mxu1 %v7704_v0  ;;  %v836_v3 = vld [vmem:[%s7846_s24 + $0xc1] sm:$0xff] }
 0x141   : > { %4351 = vmatprep.mubr.f32.mxu0 %v7704_v0 }
 0x143   : > { %6599 = vmatmul.mubr.msk.f32.gmra.mrb[46].mxu1 %vm278_vm0, %v835_v59  ;;  %v8532_v59 = vld [vmem:[%s7846_s24 + $0x8a] sm:$0xff] }
 0x144   : > { %6761 = vmatmul.mubr.msk.f32.gmra.mrb[10].mxu0 %vm278_vm0, %v8017_v5  ;;  %1180 = vmatprep.mubr.f32.mxu1 %v7704_v0  ;;  %v838_v5 = vld [vmem:[%s7846_s24 + $0xd1] sm:$0xff] }
 0x145   : > { %4357 = vmatprep.mubr.f32.mxu0 %v7704_v0 }
 0x147   : > { %6600 = vmatmul.mubr.msk.f32.gmra.mrb[48].mxu1 %vm278_vm0, %v836_v3  ;;  %v5454_v3 = vld [vmem:[#allocation3 + $0x438] sm:$0xff] }
 0x148   : > { %6762 = vmatmul.mubr.msk.f32.gmra.mrb[12].mxu0 %vm278_vm0, %v8026_v7  ;;  %1186 = vmatprep.mubr.f32.mxu1 %v7704_v0  ;;  %v839_v7 = vld [vmem:[%s7846_s24 + $0xd9] sm:$0xff] }
 0x149   : > { %4363 = vmatprep.mubr.f32.mxu0 %v7704_v0 }
 0x14b   : > { %6601 = vmatmul.mubr.msk.f32.gmra.mrb[50].mxu1 %vm278_vm0, %v837_v11  ;;  %v8541_v11 = vld [vmem:[%s7846_s24 + $0x92] sm:$0xff] }
 0x14c   : > { %6763 = vmatmul.mubr.msk.f32.gmra.mrb[14].mxu0 %vm278_vm0, %v8035_v10  ;;  %1192 = vmatprep.mubr.f32.mxu1 %v7704_v0  ;;  %v840_v10 = vld [vmem:[%s7846_s24 + $0xe1] sm:$0xff] }
 0x14d   : > { %4369 = vmatprep.mubr.f32.mxu0 %v7704_v0 }
 0x14f   : > { %6602 = vmatmul.mubr.msk.f32.gmra.mrb[52].mxu1 %vm278_vm0, %v838_v5  ;;  %v4754_v5 = vld [vmem:[%s7846_s24 + $0x25] sm:$0xff] }
 0x150   : > { %6764 = vmatmul.mubr.msk.f32.gmra.mrb[16].mxu0 %vm278_vm0, %v8044_v12  ;;  %1198 = vmatprep.mubr.f32.mxu1 %v7704_v0  ;;  %v841_v12 = vld [vmem:[%s7846_s24 + $0xe9] sm:$0xff] }
 0x151   : > { %4375 = vmatprep.mubr.f32.mxu0 %v7704_v0 }
 0x153   : > { %6603 = vmatmul.mubr.msk.f32.gmra.mrb[54].mxu1 %vm278_vm0, %v839_v7  ;;  %v6996_v7 = vpack.c.bf16 %v5449_v6, %v5447_v4  ;;  %v4763_v4 = vld [vmem:[%s7846_s24 + $0x6d] sm:$0xff]  ;;  %v8631_v6 = vld [vmem:[%s7846_s24 + $0xe2] sm:$0xff] }
 0x154   : > { %6765 = vmatmul.mubr.msk.f32.gmra.mrb[18].mxu0 %vm278_vm0, %v8053_v15  ;;  %1204 = vmatprep.mubr.f32.mxu1 %v7704_v0  ;;  %v842_v15 = vld [vmem:[%s7846_s24 + $0xf1] sm:$0xff] }
 0x155   : > { %4381 = vmatprep.mubr.f32.mxu0 %v7704_v0 }
 0x157   : > { %6604 = vmatmul.mubr.msk.f32.gmra.mrb[56].mxu1 %vm278_vm0, %v840_v10  ;;  %v6998_v10 = vpack.c.bf16 %v5454_v3, %v5452_v63  ;;  %v4764_v63 = vld [vmem:[%s7846_s24 + $0x75] sm:$0xff]  ;;  %v8640_v3 = vld [vmem:[%s7846_s24 + $0xea] sm:$0xff] }
 0x158   : > { %6766 = vmatmul.mubr.msk.f32.gmra.mrb[20].mxu0 %vm278_vm0, %v8062_v17  ;;  %1210 = vmatprep.mubr.f32.mxu1 %v7704_v0  ;;  %v843_v17 = vld [vmem:[%s7846_s24 + $0xf9] sm:$0xff] }
 0x159   : > { %4387 = vmatprep.mubr.f32.mxu0 %v7704_v0 }
 0x15b   : > { %6605 = vmatmul.mubr.msk.f32.gmra.mrb[58].mxu1 %vm278_vm0, %v841_v12  ;;  %v5451_v12 = vld [vmem:[#allocation3 + $0x420] sm:$0xff] }
 0x15c   : > { %6767 = vmatmul.mubr.msk.f32.gmra.mrb[22].mxu0 %vm278_vm0, %v8071_v20  ;;  %1216 = vmatprep.mubr.f32.mxu1 %v7704_v0  ;;  %v844_v20 = vld [vmem:[%s7846_s24 + $0x101] sm:$0xff] }
 0x15d   : > { %4393 = vmatprep.mubr.f32.mxu0 %v7704_v0 }
 0x15f   : > { %6606 = vmatmul.mubr.msk.f32.gmra.mrb[60].mxu1 %vm278_vm0, %v842_v15  ;;  %v5453_v15 = vld [vmem:[#allocation3 + $0x430] sm:$0xff] }
 0x160   : > { %6768 = vmatmul.mubr.msk.f32.gmra.mrb[24].mxu0 %vm278_vm0, %v8080_v22  ;;  %1222 = vmatprep.mubr.f32.mxu1 %v7704_v0  ;;  %v845_v22 = vld [vmem:[%s7846_s24 + $0x109] sm:$0xff] }
 0x161   : > { %4399 = vmatprep.mubr.f32.mxu0 %v7704_v0 }
 0x163   : > { %6607 = vmatmul.mubr.msk.f32.gmra.mrb[62].mxu1 %vm278_vm0, %v843_v17  ;;  %v5456_v17 = vld [vmem:[#allocation3 + $0x448] sm:$0xff] }
 0x164   : > { %6769 = vmatmul.mubr.msk.f32.gmra.mrb[26].mxu0 %vm278_vm0, %v8089_v24  ;;  %1228 = vmatprep.mubr.f32.mxu1 %v7704_v0  ;;  %v846_v24 = vld [vmem:[%s7846_s24 + $0x111] sm:$0xff] }
 0x165   : > { %4405 = vmatprep.mubr.f32.mxu0 %v7704_v0 }
 0x167   : > { %6608 = vmatmul.mubr.msk.f32.gmra.mrb[64].mxu1 %vm278_vm0, %v844_v20  ;;  %v5458_v20 = vld [vmem:[#allocation3 + $0x458] sm:$0xff] }
 0x168   : > { %6770 = vmatmul.mubr.msk.f32.gmra.mrb[28].mxu0 %vm278_vm0, %v8098_v27  ;;  %1234 = vmatprep.mubr.f32.mxu1 %v7704_v0  ;;  %v847_v27 = vld [vmem:[%s7846_s24 + $0x119] sm:$0xff]  ;;  %v7002_v14 = vpack.c.bf16 %v5458_v20, %v5456_v17  ;;  %v8667_v17 = vld [vmem:[%s7846_s24 + $0x102] sm:$0xff] }
 0x169   : > { %4411 = vmatprep.mubr.f32.mxu0 %v7704_v0  ;;  %v4768_v20 = vld [vmem:[%s7846_s24 + $0x95] sm:$0xff] }
 0x16b   : > { %6609 = vmatmul.mubr.msk.f32.gmra.mrb[66].mxu1 %vm278_vm0, %v845_v22  ;;  %v8550_v22 = vld [vmem:[%s7846_s24 + $0x9a] sm:$0xff] }
 0x16c   : > { %6771 = vmatmul.mubr.msk.f32.gmra.mrb[30].mxu0 %vm278_vm0, %v8107_v29  ;;  %1240 = vmatprep.mubr.f32.mxu1 %v7704_v0  ;;  %v2167_v29 = vld [vmem:[#allocation3 + $0x1a8] sm:$0xff] }
 0x16d   : > { %4417 = vmatprep.mubr.f32.mxu0 %v7704_v0 }
 0x16f   : > { %6610 = vmatmul.mubr.msk.f32.gmra.mrb[68].mxu1 %vm278_vm0, %v846_v24  ;;  %v4755_v24 = vld [vmem:[%s7846_s24 + $0x2d] sm:$0xff] }
 0x170   : > { %6772 = vmatmul.mubr.msk.f32.gmra.mrb[32].mxu0 %vm278_vm0, %v8116_v37  ;;  %1246 = vmatprep.mubr.f32.mxu1 %v7704_v0  ;;  %v6918_v37 = vpack.c.bf16 %v2169_v19, %v2167_v29  ;;  %v5457_v29 = vld [vmem:[#allocation3 + $0x450] sm:$0xff]  ;;  %v5460_v19 = vld [vmem:[#allocation3 + $0x468] sm:$0xff] }
 0x171   : > { %4423 = vmatprep.mubr.f32.mxu0 %v7704_v0 }
 0x173   : > { %6611 = vmatmul.mubr.msk.f32.gmra.mrb[70].mxu1 %vm278_vm0, %v847_v27  ;;  %v7000_v27 = vpack.c.bf16 %v5453_v15, %v5451_v12  ;;  %v8658_v12 = vld [vmem:[%s7846_s24 + $0xfa] sm:$0xff]  ;;  %v4767_v15 = vld [vmem:[%s7846_s24 + $0x8d] sm:$0xff] }
 0x174   : > { %6773 = vmatmul.mubr.msk.f32.gmra.mrb[34].mxu0 %vm278_vm0, %v8125_v46  ;;  %1693 = vmatprep.mubr.f32.mxu1 %v7704_v0  ;;  %v6920_v46 = vpack.c.bf16 %v2168_v34, %v2166_v32  ;;  %v7004_v32 = vpack.c.bf16 %v5457_v29, %v5455_v16  ;;  %v4770_v16 = vld [vmem:[%s7846_s24 + $0xa5] sm:$0xff]  ;;  %v8694_v29 = vld [vmem:[%s7846_s24 + $0x11a] sm:$0xff] }
 0x175   : > { %4429 = vmatprep.mubr.f32.mxu0 %v7704_v0 }
 0x177   : > { %6612 = vmatmul.mubr.msk.f32.vlgmr.msra.gmra.mrb[0].mxu1 %vm278_vm0, %v1469_v23  ;;  %v5462_v23 = vld [vmem:[#allocation3 + $0x478] sm:$0xff] }
 0x178   : > { %6774 = vmatmul.mubr.msk.f32.gmra.mrb[36].mxu0 %vm278_vm0, %v8134_v57  ;;  %6917 = vmatpush1.bf16.msra.mxu1 %v6916_v28  ;;  %v8396_v57 = vld [vmem:[%s7846_s24 + $0x12] sm:$0xff]  ;;  %v8559_v28 = vld [vmem:[%s7846_s24 + $0xa2] sm:$0xff]  ;;  %v7006_v34 = vpack.c.bf16 %v5462_v23, %v5460_v19 }
 0x179   : > { %1699 = vmatprep.mubr.f32.mxu1 %v7704_v0  ;;  %4435 = vmatprep.mubr.f32.mxu0 %v7704_v0  ;;  %v4771_v19 = vld [vmem:[%s7846_s24 + $0xad] sm:$0xff]  ;;  %v4772_v23 = vld [vmem:[%s7846_s24 + $0xb5] sm:$0xff] }
 0x17a   : > { %6919 = vmatprep.subr.bf16.mxu1 %v6918_v37  ;;  %v4756_v37 = vld [vmem:[%s7846_s24 + $0x35] sm:$0xff] }
 0x17b   : > { %6613 = vmatmul.mubr.msk.f32.gmra.mrb[2].mxu1 %vm278_vm0, %v1470_v42  ;;  %v8568_v42 = vld [vmem:[%s7846_s24 + $0xaa] sm:$0xff] }
 0x17c   : > { %6775 = vmatmul.mubr.msk.f32.gmra.mrb[38].mxu0 %vm278_vm0, %v8143_v2  ;;  %1705 = vmatprep.mubr.f32.mxu1 %v7704_v0  ;;  %v8405_v2 = vld [vmem:[%s7846_s24 + $0x1a] sm:$0xff] }
 0x17d   : > { %4441 = vmatprep.mubr.f32.mxu0 %v7704_v0  ;;  %6921 = vmatpush1.bf16.msra.mxu1 %v6920_v46  ;;  %v4757_v46 = vld [vmem:[%s7846_s24 + $0x3d] sm:$0xff] }
 0x17e   : > { %6923 = vmatprep.subr.bf16.mxu1 %v6922_v45  ;;  %v7008_v45 = vpack.c.bf16 %v5461_v40, %v5459_v36  ;;  %v5423_v36 = vld [vmem:[%s7846_s24 + $0x86] sm:$0xff]  ;;  %v5424_v40 = vld [vmem:[%s7846_s24 + $0x8e] sm:$0xff] }
 0x17f   : > { %6614 = vmatmul.mubr.msk.f32.gmra.mrb[4].mxu1 %vm278_vm0, %v8396_v57 }
 0x180   : > { %6776 = vmatmul.mubr.msk.f32.gmra.mrb[40].mxu0 %vm278_vm0, %v8152_v9  ;;  %1711 = vmatprep.mubr.f32.mxu1 %v7704_v0  ;;  %v8414_v9 = vld [vmem:[%s7846_s24 + $0x22] sm:$0xff] }
 0x181   : > { %4447 = vmatprep.mubr.f32.mxu0 %v7704_v0  ;;  %6925 = vmatpush1.bf16.msra.mxu1 %v6924_v58  ;;  %v8595_v58 = vld [vmem:[%s7846_s24 + $0xc2] sm:$0xff] }
 0x182   : > { %6927 = vmatprep.subr.bf16.mxu1 %v6926_v61  ;;  %v4760_v61 = vld [vmem:[%s7846_s24 + $0x55] sm:$0xff] }
 0x183   : > { %6615 = vmatmul.mubr.msk.f32.gmra.mrb[6].mxu1 %vm278_vm0, %v8405_v2 }
 0x184   : > { %6777 = vmatmul.mubr.msk.f32.gmra.mrb[42].mxu0 %vm278_vm0, %v8161_v21  ;;  %1717 = vmatprep.mubr.f32.mxu1 %v7704_v0  ;;  %v8424_v21 = vld [vmem:[%s7846_s24 + $0x2a] sm:$0xff] }
 0x185   : > { %4453 = vmatprep.mubr.f32.mxu0 %v7704_v0  ;;  %6929 = vmatpush1.bf16.msra.mxu1 %v6928_v1  ;;  %v8613_v1 = vld [vmem:[%s7846_s24 + $0xd2] sm:$0xff] }
 0x186   : > { %7010 = vmatprep.subr.bf16.mxu1 %v7815_v8  ;;  %v8433_v8 = vld [vmem:[%s7846_s24 + $0x32] sm:$0xff] }
 0x187   : > { %6616 = vmatmul.mubr.msk.f32.gmra.mrb[8].mxu1 %vm278_vm0, %v8414_v9 }
 0x188   : > { %6778 = vmatmul.mubr.msk.f32.gmra.mrb[44].mxu0 %vm278_vm0, %v8170_v25  ;;  %1723 = vmatprep.mubr.f32.mxu1 %v7704_v0  ;;  %v8442_v25 = vld [vmem:[%s7846_s24 + $0x3a] sm:$0xff] }
 0x189   : > { %4459 = vmatprep.mubr.f32.mxu0 %v7704_v0 }
 0x18b   : > { %6617 = vmatmul.mubr.msk.f32.gmra.mrb[10].mxu1 %vm278_vm0, %v8424_v21 }
 0x18c   : > { %6779 = vmatmul.mubr.msk.f32.gmra.mrb[46].mxu0 %vm278_vm0, %v8179_v30  ;;  %1729 = vmatprep.mubr.f32.mxu1 %v7704_v0  ;;  %v8451_v30 = vld [vmem:[%s7846_s24 + $0x42] sm:$0xff] }
 0x18d   : > { %4465 = vmatprep.mubr.f32.mxu0 %v7704_v0 }
 0x18f   : > { %6618 = vmatmul.mubr.msk.f32.gmra.mrb[12].mxu1 %vm278_vm0, %v8433_v8 }
 0x190   : > { %6780 = vmatmul.mubr.msk.f32.gmra.mrb[48].mxu0 %vm278_vm0, %v8188_v33  ;;  %1735 = vmatprep.mubr.f32.mxu1 %v7704_v0  ;;  %v8460_v33 = vld [vmem:[%s7846_s24 + $0x4a] sm:$0xff] }
 0x191   : > { %4471 = vmatprep.mubr.f32.mxu0 %v7704_v0 }
 0x193   : > { %6619 = vmatmul.mubr.msk.f32.gmra.mrb[14].mxu1 %vm278_vm0, %v8442_v25 }
 0x194   : > { %6781 = vmatmul.mubr.msk.f32.gmra.mrb[50].mxu0 %vm278_vm0, %v8197_v35  ;;  %1741 = vmatprep.mubr.f32.mxu1 %v7704_v0  ;;  %v8469_v35 = vld [vmem:[%s7846_s24 + $0x52] sm:$0xff] }
 0x195   : > { %4477 = vmatprep.mubr.f32.mxu0 %v7704_v0 }
 0x197   : > { %6620 = vmatmul.mubr.msk.f32.gmra.mrb[16].mxu1 %vm278_vm0, %v8451_v30 }
 0x198   : > { %6782 = vmatmul.mubr.msk.f32.gmra.mrb[52].mxu0 %vm278_vm0, %v8206_v38  ;;  %1747 = vmatprep.mubr.f32.mxu1 %v7704_v0  ;;  %v8478_v38 = vld [vmem:[%s7846_s24 + $0x5a] sm:$0xff] }
 0x199   : > { %4483 = vmatprep.mubr.f32.mxu0 %v7704_v0 }
 0x19b   : > { %6621 = vmatmul.mubr.msk.f32.gmra.mrb[18].mxu1 %vm278_vm0, %v8460_v33 }
 0x19c   : > { %6783 = vmatmul.mubr.msk.f32.gmra.mrb[54].mxu0 %vm278_vm0, %v8215_v41  ;;  %1753 = vmatprep.mubr.f32.mxu1 %v7704_v0  ;;  %v8487_v41 = vld [vmem:[%s7846_s24 + $0x62] sm:$0xff] }
 0x19d   : > { %4489 = vmatprep.mubr.f32.mxu0 %v7704_v0 }
 0x19f   : > { %6622 = vmatmul.mubr.msk.f32.gmra.mrb[20].mxu1 %vm278_vm0, %v8469_v35 }
 0x1a0   : > { %6784 = vmatmul.mubr.msk.f32.gmra.mrb[56].mxu0 %vm278_vm0, %v8224_v43  ;;  %1759 = vmatprep.mubr.f32.mxu1 %v7704_v0  ;;  %v8496_v43 = vld [vmem:[%s7846_s24 + $0x6a] sm:$0xff] }
 0x1a1   : > { %4495 = vmatprep.mubr.f32.mxu0 %v7704_v0 }
 0x1a3   : > { %6623 = vmatmul.mubr.msk.f32.gmra.mrb[22].mxu1 %vm278_vm0, %v8478_v38 }
 0x1a4   : > { %6785 = vmatmul.mubr.msk.f32.gmra.mrb[58].mxu0 %vm278_vm0, %v8233_v47  ;;  %1765 = vmatprep.mubr.f32.mxu1 %v7704_v0  ;;  %v8505_v47 = vld [vmem:[%s7846_s24 + $0x72] sm:$0xff] }
 0x1a5   : > { %4501 = vmatprep.mubr.f32.mxu0 %v7704_v0 }
 0x1a7   : > { %6624 = vmatmul.mubr.msk.f32.gmra.mrb[24].mxu1 %vm278_vm0, %v8487_v41 }
 0x1a8   : > { %6786 = vmatmul.mubr.msk.f32.gmra.mrb[60].mxu0 %vm278_vm0, %v8242_v50  ;;  %1771 = vmatprep.mubr.f32.mxu1 %v7704_v0  ;;  %v8514_v50 = vld [vmem:[%s7846_s24 + $0x7a] sm:$0xff] }
 0x1a9   : > { %4507 = vmatprep.mubr.f32.mxu0 %v7704_v0 }
 0x1ab   : > { %6625 = vmatmul.mubr.msk.f32.gmra.mrb[26].mxu1 %vm278_vm0, %v8496_v43 }
 0x1ac   : > { %6787 = vmatmul.mubr.msk.f32.gmra.mrb[62].mxu0 %vm278_vm0, %v8251_v53  ;;  %1777 = vmatprep.mubr.f32.mxu1 %v7704_v0  ;;  %v8523_v53 = vld [vmem:[%s7846_s24 + $0x82] sm:$0xff] }
 0x1ad   : > { %4513 = vmatprep.mubr.f32.mxu0 %v7704_v0 }
 0x1af   : > { %6626 = vmatmul.mubr.msk.f32.gmra.mrb[28].mxu1 %vm278_vm0, %v8505_v47 }
 0x1b0   : > { %6788 = vmatmul.mubr.msk.f32.gmra.mrb[64].mxu0 %vm278_vm0, %v8260_v55  ;;  %1783 = vmatprep.mubr.f32.mxu1 %v7704_v0  ;;  %v4131_v55 = vld [vmem:[%s7846_s24 + $0x134] sm:$0xff] }
 0x1b1   : > { %4519 = vmatprep.mubr.f32.mxu0 %v7704_v0 }
 0x1b3   : > { %6627 = vmatmul.mubr.msk.f32.gmra.mrb[30].mxu1 %vm278_vm0, %v8514_v50 }
 0x1b4   : > { %6789 = vmatmul.mubr.msk.f32.gmra.mrb[66].mxu0 %vm278_vm0, %v8269_v60  ;;  %1789 = vmatprep.mubr.f32.mxu1 %v7704_v0  ;;  %v4132_v60 = vld [vmem:[%s7846_s24 + $0x13c] sm:$0xff] }
 0x1b5   : > { %4525 = vmatprep.mubr.f32.mxu0 %v7704_v0 }
 0x1b7   : > { %6628 = vmatmul.mubr.msk.f32.gmra.mrb[32].mxu1 %vm278_vm0, %v8523_v53 }
 0x1b8   : > { %6790 = vmatmul.mubr.msk.f32.gmra.mrb[68].mxu0 %vm278_vm0, %v4131_v55  ;;  %1795 = vmatprep.mubr.f32.mxu1 %v7704_v0  ;;  %v4762_v55 = vld [vmem:[%s7846_s24 + $0x65] sm:$0xff] }
 0x1b9   : > { %4531 = vmatprep.mubr.f32.mxu0 %v7704_v0 }
 0x1bb   : > { %6629 = vmatmul.mubr.msk.f32.gmra.mrb[34].mxu1 %vm278_vm0, %v8532_v59 }
 0x1bc   : > { %6791 = vmatmul.mubr.msk.f32.gmra.mrb[70].mxu0 %vm278_vm0, %v4132_v60  ;;  %1801 = vmatprep.mubr.f32.mxu1 %v7704_v0  ;;  %v8622_v60 = vld [vmem:[%s7846_s24 + $0xda] sm:$0xff] }
 0x1bd   : > { %4978 = vmatprep.mubr.f32.mxu0 %v7704_v0 }
 0x1bf   : > { %6630 = vmatmul.mubr.msk.f32.gmra.mrb[36].mxu1 %vm278_vm0, %v8541_v11 }
 0x1c0   : > { %6792 = vmatmul.mubr.msk.f32.vlgmr.msra.gmra.mrb[0].mxu0 %vm278_vm0, %v4754_v5  ;;  %1807 = vmatprep.mubr.f32.mxu1 %v7704_v0  ;;  %v4765_v5 = vld [vmem:[%s7846_s24 + $0x7d] sm:$0xff] }
 0x1c1   : > { %6997 = vmatpush1.bf16.msra.mxu0 %v6996_v7  ;;  %4984 = vmatprep.mubr.f32.mxu0 %v7704_v0  ;;  %v8649_v7 = vld [vmem:[%s7846_s24 + $0xf2] sm:$0xff] }
 0x1c2   : > { %6999 = vmatprep.subr.bf16.mxu0 %v6998_v10  ;;  %v4766_v10 = vld [vmem:[%s7846_s24 + $0x85] sm:$0xff] }
 0x1c3   : > { %6631 = vmatmul.mubr.msk.f32.gmra.mrb[38].mxu1 %vm278_vm0, %v8550_v22 }
 0x1c4   : > { %6793 = vmatmul.mubr.msk.f32.gmra.mrb[2].mxu0 %vm278_vm0, %v4755_v24  ;;  %1813 = vmatprep.mubr.f32.mxu1 %v7704_v0  ;;  %v8676_v24 = vld [vmem:[%s7846_s24 + $0x10a] sm:$0xff] }
 0x1c5   : > { %4990 = vmatprep.mubr.f32.mxu0 %v7704_v0  ;;  %7001 = vmatpush1.bf16.msra.mxu0 %v7000_v27  ;;  %v4769_v27 = vld [vmem:[%s7846_s24 + $0x9d] sm:$0xff] }
 0x1c6   : > { %7003 = vmatprep.subr.bf16.mxu0 %v7002_v14  ;;  %v8685_v14 = vld [vmem:[%s7846_s24 + $0x112] sm:$0xff] }
 0x1c7   : > { %6632 = vmatmul.mubr.msk.f32.gmra.mrb[40].mxu1 %vm278_vm0, %v8559_v28 }
 0x1c8   : > { %6794 = vmatmul.mubr.msk.f32.gmra.mrb[4].mxu0 %vm278_vm0, %v4756_v37  ;;  %1819 = vmatprep.mubr.f32.mxu1 %v7704_v0  ;;  %v4773_v37 = vld [vmem:[%s7846_s24 + $0xbd] sm:$0xff] }
 0x1c9   : > { %4996 = vmatprep.mubr.f32.mxu0 %v7704_v0  ;;  %7005 = vmatpush1.bf16.msra.mxu0 %v7004_v32  ;;  %v5421_v32 = vld [vmem:[%s7846_s24 + $0x76] sm:$0xff] }
 0x1ca   : > { %7007 = vmatprep.subr.bf16.mxu0 %v7006_v34  ;;  %v5422_v34 = vld [vmem:[%s7846_s24 + $0x7e] sm:$0xff] }
 0x1cb   : > { %6633 = vmatmul.mubr.msk.f32.gmra.mrb[42].mxu1 %vm278_vm0, %v8568_v42 }
 0x1cc   : > { %6795 = vmatmul.mubr.msk.f32.gmra.mrb[6].mxu0 %vm278_vm0, %v4757_v46  ;;  %1825 = vmatprep.mubr.f32.mxu1 %v7704_v0  ;;  %v5426_v46 = vld [vmem:[%s7846_s24 + $0x9e] sm:$0xff] }
 0x1cd   : > { %5002 = vmatprep.mubr.f32.mxu0 %v7704_v0  ;;  %7009 = vmatpush1.bf16.msra.mxu0 %v7008_v45  ;;  %v2160_v45 = vld [vmem:[%s7846_s24 + $0x122] sm:$0xff] }
 0x1cf   : > { %6634 = vmatmul.mubr.msk.f32.gmra.mrb[44].mxu1 %vm278_vm0, %v8577_v48 }
 0x1d0   : > { %6796 = vmatmul.mubr.msk.f32.gmra.mrb[8].mxu0 %vm278_vm0, %v4758_v49  ;;  %1831 = vmatprep.mubr.f32.mxu1 %v7704_v0  ;;  %v2161_v49 = vld [vmem:[%s7846_s24 + $0x12a] sm:$0xff] }
 0x1d1   : > { %5008 = vmatprep.mubr.f32.mxu0 %v7704_v0 }
 0x1d3   : > { %6635 = vmatmul.mubr.msk.f32.gmra.mrb[46].mxu1 %vm278_vm0, %v8586_v51 }
 0x1d4   : > { %6797 = vmatmul.mubr.msk.f32.gmra.mrb[10].mxu0 %vm278_vm0, %v4759_v54  ;;  %1837 = vmatprep.mubr.f32.mxu1 %v7704_v0  ;;  %v2801_v54 = vld [vmem:[%s7846_s24 + $0xa3] sm:$0xff] }
 0x1d5   : > { %5014 = vmatprep.mubr.f32.mxu0 %v7704_v0 }
 0x1d7   : > { %6636 = vmatmul.mubr.msk.f32.gmra.mrb[48].mxu1 %vm278_vm0, %v8595_v58 }
 0x1d8   : > { %6798 = vmatmul.mubr.msk.f32.gmra.mrb[12].mxu0 %vm278_vm0, %v4760_v61  ;;  %1843 = vmatprep.mubr.f32.mxu1 %v7704_v0  ;;  %v2802_v61 = vld [vmem:[%s7846_s24 + $0xab] sm:$0xff] }
 0x1d9   : > { %5020 = vmatprep.mubr.f32.mxu0 %v7704_v0 }
 0x1db   : > { %6637 = vmatmul.mubr.msk.f32.gmra.mrb[50].mxu1 %vm278_vm0, %v8604_v56 }
 0x1dc   : > { %6799 = vmatmul.mubr.msk.f32.gmra.mrb[14].mxu0 %vm278_vm0, %v4761_v62  ;;  %1849 = vmatprep.mubr.f32.mxu1 %v7704_v0  ;;  %v2803_v62 = vld [vmem:[%s7846_s24 + $0xb3] sm:$0xff] }
 0x1dd   : > { %5026 = vmatprep.mubr.f32.mxu0 %v7704_v0 }
 0x1df   : > { %6638 = vmatmul.mubr.msk.f32.gmra.mrb[52].mxu1 %vm278_vm0, %v8613_v1 }
 0x1e0   : > { %6800 = vmatmul.mubr.msk.f32.gmra.mrb[16].mxu0 %vm278_vm0, %v4762_v55  ;;  %1855 = vmatprep.mubr.f32.mxu1 %v7704_v0  ;;  %v2804_v55 = vld [vmem:[%s7846_s24 + $0xbb] sm:$0xff] }
 0x1e1   : > { %5032 = vmatprep.mubr.f32.mxu0 %v7704_v0 }
 0x1e3   : > { %6639 = vmatmul.mubr.msk.f32.gmra.mrb[54].mxu1 %vm278_vm0, %v8622_v60 }
 0x1e4   : > { %6801 = vmatmul.mubr.msk.f32.gmra.mrb[18].mxu0 %vm278_vm0, %v4763_v4  ;;  %1861 = vmatprep.mubr.f32.mxu1 %v7704_v0  ;;  %v2805_v4 = vld [vmem:[%s7846_s24 + $0xc3] sm:$0xff] }
 0x1e5   : > { %5038 = vmatprep.mubr.f32.mxu0 %v7704_v0 }
 0x1e7   : > { %6640 = vmatmul.mubr.msk.f32.gmra.mrb[56].mxu1 %vm278_vm0, %v8631_v6 }
 0x1e8   : > { %6802 = vmatmul.mubr.msk.f32.gmra.mrb[20].mxu0 %vm278_vm0, %v4764_v63  ;;  %1867 = vmatprep.mubr.f32.mxu1 %v7704_v0  ;;  %v2806_v63 = vld [vmem:[%s7846_s24 + $0xcb] sm:$0xff] }
 0x1e9   : > { %5044 = vmatprep.mubr.f32.mxu0 %v7704_v0 }
 0x1eb   : > { %6641 = vmatmul.mubr.msk.f32.gmra.mrb[58].mxu1 %vm278_vm0, %v8640_v3 }
 0x1ec   : > { %6803 = vmatmul.mubr.msk.f32.gmra.mrb[22].mxu0 %vm278_vm0, %v4765_v5  ;;  %1873 = vmatprep.mubr.f32.mxu1 %v7704_v0  ;;  %v2807_v5 = vld [vmem:[%s7846_s24 + $0xd3] sm:$0xff] }
 0x1ed   : > { %5050 = vmatprep.mubr.f32.mxu0 %v7704_v0 }
 0x1ef   : > { %6642 = vmatmul.mubr.msk.f32.gmra.mrb[60].mxu1 %vm278_vm0, %v8649_v7 }
 0x1f0   : > { %6804 = vmatmul.mubr.msk.f32.gmra.mrb[24].mxu0 %vm278_vm0, %v4766_v10  ;;  %1879 = vmatprep.mubr.f32.mxu1 %v7704_v0  ;;  %v2808_v10 = vld [vmem:[%s7846_s24 + $0xdb] sm:$0xff] }
 0x1f1   : > { %5056 = vmatprep.mubr.f32.mxu0 %v7704_v0 }
 0x1f3   : > { %6643 = vmatmul.mubr.msk.f32.gmra.mrb[62].mxu1 %vm278_vm0, %v8658_v12 }
 0x1f4   : > { %6805 = vmatmul.mubr.msk.f32.gmra.mrb[26].mxu0 %vm278_vm0, %v4767_v15  ;;  %1885 = vmatprep.mubr.f32.mxu1 %v7704_v0  ;;  %v2809_v15 = vld [vmem:[%s7846_s24 + $0xe3] sm:$0xff] }
 0x1f5   : > { %5062 = vmatprep.mubr.f32.mxu0 %v7704_v0 }
 0x1f7   : > { %6644 = vmatmul.mubr.msk.f32.gmra.mrb[64].mxu1 %vm278_vm0, %v8667_v17 }
 0x1f8   : > { %6806 = vmatmul.mubr.msk.f32.gmra.mrb[28].mxu0 %vm278_vm0, %v4768_v20  ;;  %1891 = vmatprep.mubr.f32.mxu1 %v7704_v0  ;;  %v2810_v20 = vld [vmem:[%s7846_s24 + $0xeb] sm:$0xff] }
 0x1f9   : > { %5068 = vmatprep.mubr.f32.mxu0 %v7704_v0 }
 0x1fb   : > { %6645 = vmatmul.mubr.msk.f32.gmra.mrb[66].mxu1 %vm278_vm0, %v8676_v24 }
 0x1fc   : > { %6807 = vmatmul.mubr.msk.f32.gmra.mrb[30].mxu0 %vm278_vm0, %v4769_v27  ;;  %1897 = vmatprep.mubr.f32.mxu1 %v7704_v0  ;;  %v2811_v27 = vld [vmem:[%s7846_s24 + $0xf3] sm:$0xff] }
 0x1fd   : > { %5074 = vmatprep.mubr.f32.mxu0 %v7704_v0 }
 0x1ff   : > { %6646 = vmatmul.mubr.msk.f32.gmra.mrb[68].mxu1 %vm278_vm0, %v8685_v14 }
 0x200   : > { %6808 = vmatmul.mubr.msk.f32.gmra.mrb[32].mxu0 %vm278_vm0, %v4770_v16  ;;  %1903 = vmatprep.mubr.f32.mxu1 %v7704_v0  ;;  %v2812_v16 = vld [vmem:[%s7846_s24 + $0xfb] sm:$0xff] }
 0x201   : > { %5080 = vmatprep.mubr.f32.mxu0 %v7704_v0 }
 0x203   : > { %6647 = vmatmul.mubr.msk.f32.gmra.mrb[70].mxu1 %vm278_vm0, %v8694_v29 }
 0x204   : > { %6809 = vmatmul.mubr.msk.f32.gmra.mrb[34].mxu0 %vm278_vm0, %v4771_v19  ;;  %2350 = vmatprep.mubr.f32.mxu1 %v7704_v0  ;;  %v2813_v19 = vld [vmem:[%s7846_s24 + $0x103] sm:$0xff] }
 0x205   : > { %5086 = vmatprep.mubr.f32.mxu0 %v7704_v0 }
 0x207   : > { %6648 = vmatmul.mubr.msk.f32.vlgmr.msra.gmra.mrb[0].mxu1 %vm278_vm0, %v8396_v57  ;;  %v4774_v57 = vld [vmem:[%s7846_s24 + $0xc5] sm:$0xff] }
 0x208   : > { %6810 = vmatmul.mubr.msk.f32.gmra.mrb[36].mxu0 %vm278_vm0, %v4772_v23  ;;  %7014 = vmatpush1.bf16.msra.mxu1 %v7817_v13  ;;  %v4775_v13 = vld [vmem:[%s7846_s24 + $0xcd] sm:$0xff]  ;;  %v5441_v23 = vld [vmem:[%s7846_s24 + $0x116] sm:$0xff] }
 0x209   : > { %2356 = vmatprep.mubr.f32.mxu1 %v7704_v0  ;;  %5092 = vmatprep.mubr.f32.mxu0 %v7704_v0 }
 0x20a   : > { %7011 = vmatprep.subr.bf16.mxu1 %v7820_v18  ;;  %v4776_v18 = vld [vmem:[%s7846_s24 + $0xd5] sm:$0xff] }
 0x20b   : > { %6649 = vmatmul.mubr.msk.f32.gmra.mrb[2].mxu1 %vm278_vm0, %v8405_v2  ;;  %v4782_v2 = vld [vmem:[%s7846_s24 + $0x105] sm:$0xff] }
 0x20c   : > { %6811 = vmatmul.mubr.msk.f32.gmra.mrb[38].mxu0 %vm278_vm0, %v4773_v37  ;;  %2362 = vmatprep.mubr.f32.mxu1 %v7704_v0  ;;  %v2814_v37 = vld [vmem:[%s7846_s24 + $0x10b] sm:$0xff] }
 0x20d   : > { %5098 = vmatprep.mubr.f32.mxu0 %v7704_v0  ;;  %7015 = vmatpush1.bf16.msra.mxu1 %v7829_v26  ;;  %v4777_v26 = vld [vmem:[%s7846_s24 + $0xdd] sm:$0xff] }
 0x20e   : > { %7012 = vmatprep.subr.bf16.mxu1 %v7831_v31  ;;  %v4778_v31 = vld [vmem:[%s7846_s24 + $0xe5] sm:$0xff] }
 0x20f   : > { %6650 = vmatmul.mubr.msk.f32.gmra.mrb[4].mxu1 %vm278_vm0, %v8414_v9  ;;  %v4783_v9 = vld [vmem:[%s7846_s24 + $0x10d] sm:$0xff] }
 0x210   : > { %6812 = vmatmul.mubr.msk.f32.gmra.mrb[40].mxu0 %vm278_vm0, %v4774_v57  ;;  %2368 = vmatprep.mubr.f32.mxu1 %v7704_v0  ;;  %v5442_v57 = vld [vmem:[%s7846_s24 + $0x11e] sm:$0xff] }
 0x211   : > { %5104 = vmatprep.mubr.f32.mxu0 %v7704_v0  ;;  %7016 = vmatpush1.bf16.msra.mxu1 %v7834_v39  ;;  %v4779_v39 = vld [vmem:[%s7846_s24 + $0xed] sm:$0xff] }
 0x212   : > { %7013 = vmatprep.subr.bf16.mxu1 %v7838_v44  ;;  %v4780_v44 = vld [vmem:[%s7846_s24 + $0xf5] sm:$0xff] }
 0x213   : > { %6651 = vmatmul.mubr.msk.f32.gmra.mrb[6].mxu1 %vm278_vm0, %v8424_v21  ;;  %v4784_v21 = vld [vmem:[%s7846_s24 + $0x115] sm:$0xff] }
 0x214   : > { %6813 = vmatmul.mubr.msk.f32.gmra.mrb[42].mxu0 %vm278_vm0, %v4775_v13  ;;  %2374 = vmatprep.mubr.f32.mxu1 %v7704_v0  ;;  %v2815_v13 = vld [vmem:[%s7846_s24 + $0x113] sm:$0xff] }
 0x215   : > { %5110 = vmatprep.mubr.f32.mxu0 %v7704_v0  ;;  %7017 = vmatpush1.bf16.msra.mxu1 %v7841_v52  ;;  %v4781_v52 = vld [vmem:[%s7846_s24 + $0xfd] sm:$0xff] }
 0x217   : > { %6652 = vmatmul.mubr.msk.f32.gmra.mrb[8].mxu1 %vm278_vm0, %v8433_v8  ;;  %v4785_v8 = vld [vmem:[%s7846_s24 + $0x11d] sm:$0xff] }
 0x218   : > { %6814 = vmatmul.mubr.msk.f32.gmra.mrb[44].mxu0 %vm278_vm0, %v4776_v18  ;;  %2380 = vmatprep.mubr.f32.mxu1 %v7704_v0  ;;  %v5443_v18 = vld [vmem:[%s7846_s24 + $0x126] sm:$0xff] }
 0x219   : > { %5116 = vmatprep.mubr.f32.mxu0 %v7704_v0 }
 0x21b   : > { %6653 = vmatmul.mubr.msk.f32.gmra.mrb[10].mxu1 %vm278_vm0, %v8442_v25  ;;  %v4786_v25 = vld [vmem:[%s7846_s24 + $0x125] sm:$0xff] }
 0x21c   : > { %6815 = vmatmul.mubr.msk.f32.gmra.mrb[46].mxu0 %vm278_vm0, %v4777_v26  ;;  %2386 = vmatprep.mubr.f32.mxu1 %v7704_v0  ;;  %v2816_v26 = vld [vmem:[%s7846_s24 + $0x11b] sm:$0xff] }
 0x21d   : > { %5122 = vmatprep.mubr.f32.mxu0 %v7704_v0 }
 0x21f   : > { %6654 = vmatmul.mubr.msk.f32.gmra.mrb[12].mxu1 %vm278_vm0, %v8451_v30  ;;  %v4787_v30 = vld [vmem:[%s7846_s24 + $0x12d] sm:$0xff] }
 0x220   : > { %6816 = vmatmul.mubr.msk.f32.gmra.mrb[48].mxu0 %vm278_vm0, %v4778_v31  ;;  %2392 = vmatprep.mubr.f32.mxu1 %v7704_v0  ;;  %v5444_v31 = vld [vmem:[%s7846_s24 + $0x12e] sm:$0xff] }
 0x221   : > { %5128 = vmatprep.mubr.f32.mxu0 %v7704_v0 }
 0x223   : > { %6655 = vmatmul.mubr.msk.f32.gmra.mrb[14].mxu1 %vm278_vm0, %v8460_v33  ;;  %v4788_v33 = vld [vmem:[%s7846_s24 + $0x135] sm:$0xff] }
 0x224   : > { %6817 = vmatmul.mubr.msk.f32.gmra.mrb[50].mxu0 %vm278_vm0, %v4779_v39  ;;  %2398 = vmatprep.mubr.f32.mxu1 %v7704_v0  ;;  %v2817_v39 = vld [vmem:[%s7846_s24 + $0x123] sm:$0xff] }
 0x225   : > { %5134 = vmatprep.mubr.f32.mxu0 %v7704_v0 }
 0x227   : > { %6656 = vmatmul.mubr.msk.f32.gmra.mrb[16].mxu1 %vm278_vm0, %v8469_v35  ;;  %v4789_v35 = vld [vmem:[%s7846_s24 + $0x13d] sm:$0xff] }
 0x228   : > { %6818 = vmatmul.mubr.msk.f32.gmra.mrb[52].mxu0 %vm278_vm0, %v4780_v44  ;;  %2404 = vmatprep.mubr.f32.mxu1 %v7704_v0  ;;  %v5445_v44 = vld [vmem:[%s7846_s24 + $0x136] sm:$0xff] }
 0x229   : > { %5140 = vmatprep.mubr.f32.mxu0 %v7704_v0 }
 0x22b   : > { %6657 = vmatmul.mubr.msk.f32.gmra.mrb[18].mxu1 %vm278_vm0, %v8478_v38  ;;  %v5411_v38 = vld [vmem:[%s7846_s24 + $0x26] sm:$0xff] }
 0x22c   : > { %6819 = vmatmul.mubr.msk.f32.gmra.mrb[54].mxu0 %vm278_vm0, %v4781_v52  ;;  %2410 = vmatprep.mubr.f32.mxu1 %v7704_v0  ;;  %v2818_v52 = vld [vmem:[%s7846_s24 + $0x12b] sm:$0xff] }
 0x22d   : > { %5146 = vmatprep.mubr.f32.mxu0 %v7704_v0 }
 0x22f   : > { %6658 = vmatmul.mubr.msk.f32.gmra.mrb[20].mxu1 %vm278_vm0, %v8487_v41  ;;  %v5412_v41 = vld [vmem:[%s7846_s24 + $0x2e] sm:$0xff] }
 0x230   : > { %6820 = vmatmul.mubr.msk.f32.gmra.mrb[56].mxu0 %vm278_vm0, %v4782_v2  ;;  %2416 = vmatprep.mubr.f32.mxu1 %v7704_v0  ;;  %v5446_v2 = vld [vmem:[%s7846_s24 + $0x13e] sm:$0xff] }
 0x231   : > { %5152 = vmatprep.mubr.f32.mxu0 %v7704_v0 }
 0x233   : > { %6659 = vmatmul.mubr.msk.f32.gmra.mrb[22].mxu1 %vm278_vm0, %v8496_v43  ;;  %v5413_v43 = vld [vmem:[%s7846_s24 + $0x36] sm:$0xff] }
 0x234   : > { %6821 = vmatmul.mubr.msk.f32.gmra.mrb[58].mxu0 %vm278_vm0, %v4783_v9  ;;  %2422 = vmatprep.mubr.f32.mxu1 %v7704_v0 }
 0x235   : > { %5158 = vmatprep.mubr.f32.mxu0 %v7704_v0 }
 0x237   : > { %6660 = vmatmul.mubr.msk.f32.gmra.mrb[24].mxu1 %vm278_vm0, %v8505_v47  ;;  %v5414_v47 = vld [vmem:[%s7846_s24 + $0x3e] sm:$0xff] }
 0x238   : > { %6822 = vmatmul.mubr.msk.f32.gmra.mrb[60].mxu0 %vm278_vm0, %v4784_v21  ;;  %2428 = vmatprep.mubr.f32.mxu1 %v7704_v0 }
 0x239   : > { %5164 = vmatprep.mubr.f32.mxu0 %v7704_v0 }
 0x23b   : > { %6661 = vmatmul.mubr.msk.f32.gmra.mrb[26].mxu1 %vm278_vm0, %v8514_v50  ;;  %v5415_v50 = vld [vmem:[%s7846_s24 + $0x46] sm:$0xff] }
 0x23c   : > { %6823 = vmatmul.mubr.msk.f32.gmra.mrb[62].mxu0 %vm278_vm0, %v4785_v8  ;;  %2434 = vmatprep.mubr.f32.mxu1 %v7704_v0 }
 0x23d   : > { %5170 = vmatprep.mubr.f32.mxu0 %v7704_v0 }
 0x23f   : > { %6662 = vmatmul.mubr.msk.f32.gmra.mrb[28].mxu1 %vm278_vm0, %v8523_v53  ;;  %v5416_v53 = vld [vmem:[%s7846_s24 + $0x4e] sm:$0xff] }
 0x240   : > { %6824 = vmatmul.mubr.msk.f32.gmra.mrb[64].mxu0 %vm278_vm0, %v4786_v25  ;;  %2440 = vmatprep.mubr.f32.mxu1 %v7704_v0 }
 0x241   : > { %5176 = vmatprep.mubr.f32.mxu0 %v7704_v0 }
 0x243   : > { %6663 = vmatmul.mubr.msk.f32.gmra.mrb[30].mxu1 %vm278_vm0, %v8532_v59  ;;  %v5417_v59 = vld [vmem:[%s7846_s24 + $0x56] sm:$0xff] }
 0x244   : > { %6825 = vmatmul.mubr.msk.f32.gmra.mrb[66].mxu0 %vm278_vm0, %v4787_v30  ;;  %2446 = vmatprep.mubr.f32.mxu1 %v7704_v0 }
 0x245   : > { %5182 = vmatprep.mubr.f32.mxu0 %v7704_v0 }
 0x247   : > { %6664 = vmatmul.mubr.msk.f32.gmra.mrb[32].mxu1 %vm278_vm0, %v8541_v11  ;;  %v5418_v11 = vld [vmem:[%s7846_s24 + $0x5e] sm:$0xff] }
 0x248   : > { %6826 = vmatmul.mubr.msk.f32.gmra.mrb[68].mxu0 %vm278_vm0, %v4788_v33  ;;  %2452 = vmatprep.mubr.f32.mxu1 %v7704_v0 }
 0x249   : > { %5188 = vmatprep.mubr.f32.mxu0 %v7704_v0 }
 0x24b   : > { %6665 = vmatmul.mubr.msk.f32.gmra.mrb[34].mxu1 %vm278_vm0, %v8550_v22  ;;  %v5419_v22 = vld [vmem:[%s7846_s24 + $0x66] sm:$0xff] }
 0x24c   : > { %6827 = vmatmul.mubr.msk.f32.gmra.mrb[70].mxu0 %vm278_vm0, %v4789_v35  ;;  %2458 = vmatprep.mubr.f32.mxu1 %v7704_v0 }
 0x24d   : > { %5635 = vmatprep.mubr.f32.mxu0 %v7704_v0 }
 0x24f   : > { %6666 = vmatmul.mubr.msk.f32.gmra.mrb[36].mxu1 %vm278_vm0, %v8559_v28  ;;  %v5420_v28 = vld [vmem:[%s7846_s24 + $0x6e] sm:$0xff] }
 0x250   : > { %6828 = vmatmul.mubr.msk.f32.vlgmr.msra.gmra.mrb[0].mxu0 %vm278_vm0, %v5411_v38  ;;  %2464 = vmatprep.mubr.f32.mxu1 %v7704_v0 }
 0x251   : > { %5641 = vmatprep.mubr.f32.mxu0 %v7704_v0 }
 0x253   : > { %6667 = vmatmul.mubr.msk.f32.gmra.mrb[38].mxu1 %vm278_vm0, %v8568_v42  ;;  %v5425_v42 = vld [vmem:[%s7846_s24 + $0x96] sm:$0xff] }
 0x254   : > { %6829 = vmatmul.mubr.msk.f32.gmra.mrb[2].mxu0 %vm278_vm0, %v5412_v41  ;;  %2470 = vmatprep.mubr.f32.mxu1 %v7704_v0 }
 0x255   : > { %5647 = vmatprep.mubr.f32.mxu0 %v7704_v0 }
 0x257   : > { %6668 = vmatmul.mubr.msk.f32.gmra.mrb[40].mxu1 %vm278_vm0, %v8577_v48  ;;  %v5427_v48 = vld [vmem:[%s7846_s24 + $0xa6] sm:$0xff] }
 0x258   : > { %6830 = vmatmul.mubr.msk.f32.gmra.mrb[4].mxu0 %vm278_vm0, %v5413_v43  ;;  %2476 = vmatprep.mubr.f32.mxu1 %v7704_v0 }
 0x259   : > { %5653 = vmatprep.mubr.f32.mxu0 %v7704_v0 }
 0x25b   : > { %6669 = vmatmul.mubr.msk.f32.gmra.mrb[42].mxu1 %vm278_vm0, %v8586_v51  ;;  %v5428_v51 = vld [vmem:[%s7846_s24 + $0xae] sm:$0xff] }
 0x25c   : > { %6831 = vmatmul.mubr.msk.f32.gmra.mrb[6].mxu0 %vm278_vm0, %v5414_v47  ;;  %2482 = vmatprep.mubr.f32.mxu1 %v7704_v0 }
 0x25d   : > { %5659 = vmatprep.mubr.f32.mxu0 %v7704_v0 }
 0x25f   : > { %6670 = vmatmul.mubr.msk.f32.gmra.mrb[44].mxu1 %vm278_vm0, %v8595_v58  ;;  %v5429_v58 = vld [vmem:[%s7846_s24 + $0xb6] sm:$0xff] }
 0x260   : > { %6832 = vmatmul.mubr.msk.f32.gmra.mrb[8].mxu0 %vm278_vm0, %v5415_v50  ;;  %2488 = vmatprep.mubr.f32.mxu1 %v7704_v0 }
 0x261   : > { %5665 = vmatprep.mubr.f32.mxu0 %v7704_v0 }
 0x263   : > { %6671 = vmatmul.mubr.msk.f32.gmra.mrb[46].mxu1 %vm278_vm0, %v8604_v56  ;;  %v5430_v56 = vld [vmem:[%s7846_s24 + $0xbe] sm:$0xff] }
 0x264   : > { %6833 = vmatmul.mubr.msk.f32.gmra.mrb[10].mxu0 %vm278_vm0, %v5416_v53  ;;  %2494 = vmatprep.mubr.f32.mxu1 %v7704_v0 }
 0x265   : > { %5671 = vmatprep.mubr.f32.mxu0 %v7704_v0 }
 0x267   : > { %6672 = vmatmul.mubr.msk.f32.gmra.mrb[48].mxu1 %vm278_vm0, %v8613_v1  ;;  %v5431_v1 = vld [vmem:[%s7846_s24 + $0xc6] sm:$0xff] }
 0x268   : > { %6834 = vmatmul.mubr.msk.f32.gmra.mrb[12].mxu0 %vm278_vm0, %v5417_v59  ;;  %2500 = vmatprep.mubr.f32.mxu1 %v7704_v0 }
 0x269   : > { %5677 = vmatprep.mubr.f32.mxu0 %v7704_v0 }
 0x26b   : > { %6673 = vmatmul.mubr.msk.f32.gmra.mrb[50].mxu1 %vm278_vm0, %v8622_v60  ;;  %v5432_v60 = vld [vmem:[%s7846_s24 + $0xce] sm:$0xff] }
 0x26c   : > { %6835 = vmatmul.mubr.msk.f32.gmra.mrb[14].mxu0 %vm278_vm0, %v5418_v11  ;;  %2506 = vmatprep.mubr.f32.mxu1 %v7704_v0 }
 0x26d   : > { %5683 = vmatprep.mubr.f32.mxu0 %v7704_v0 }
 0x26f   : > { %6674 = vmatmul.mubr.msk.f32.gmra.mrb[52].mxu1 %vm278_vm0, %v8631_v6  ;;  %v5433_v6 = vld [vmem:[%s7846_s24 + $0xd6] sm:$0xff] }
 0x270   : > { %6836 = vmatmul.mubr.msk.f32.gmra.mrb[16].mxu0 %vm278_vm0, %v5419_v22  ;;  %2512 = vmatprep.mubr.f32.mxu1 %v7704_v0 }
 0x271   : > { %5689 = vmatprep.mubr.f32.mxu0 %v7704_v0 }
 0x273   : > { %6675 = vmatmul.mubr.msk.f32.gmra.mrb[54].mxu1 %vm278_vm0, %v8640_v3  ;;  %v5434_v3 = vld [vmem:[%s7846_s24 + $0xde] sm:$0xff] }
 0x274   : > { %6837 = vmatmul.mubr.msk.f32.gmra.mrb[18].mxu0 %vm278_vm0, %v5420_v28  ;;  %2518 = vmatprep.mubr.f32.mxu1 %v7704_v0 }
 0x275   : > { %5695 = vmatprep.mubr.f32.mxu0 %v7704_v0 }
 0x277   : > { %6676 = vmatmul.mubr.msk.f32.gmra.mrb[56].mxu1 %vm278_vm0, %v8649_v7  ;;  %v5435_v7 = vld [vmem:[%s7846_s24 + $0xe6] sm:$0xff] }
 0x278   : > { %6838 = vmatmul.mubr.msk.f32.gmra.mrb[20].mxu0 %vm278_vm0, %v5421_v32  ;;  %2524 = vmatprep.mubr.f32.mxu1 %v7704_v0 }
 0x279   : > { %5701 = vmatprep.mubr.f32.mxu0 %v7704_v0 }
 0x27b   : > { %6677 = vmatmul.mubr.msk.f32.gmra.mrb[58].mxu1 %vm278_vm0, %v8658_v12  ;;  %v5436_v12 = vld [vmem:[%s7846_s24 + $0xee] sm:$0xff] }
 0x27c   : > { %6839 = vmatmul.mubr.msk.f32.gmra.mrb[22].mxu0 %vm278_vm0, %v5422_v34  ;;  %2530 = vmatprep.mubr.f32.mxu1 %v7704_v0 }
 0x27d   : > { %5707 = vmatprep.mubr.f32.mxu0 %v7704_v0 }
 0x27f   : > { %6678 = vmatmul.mubr.msk.f32.gmra.mrb[60].mxu1 %vm278_vm0, %v8667_v17  ;;  %v5437_v17 = vld [vmem:[%s7846_s24 + $0xf6] sm:$0xff] }
 0x280   : > { %6840 = vmatmul.mubr.msk.f32.gmra.mrb[24].mxu0 %vm278_vm0, %v5423_v36  ;;  %2536 = vmatprep.mubr.f32.mxu1 %v7704_v0 }
 0x281   : > { %5713 = vmatprep.mubr.f32.mxu0 %v7704_v0 }
 0x283   : > { %6679 = vmatmul.mubr.msk.f32.gmra.mrb[62].mxu1 %vm278_vm0, %v8676_v24  ;;  %v5438_v24 = vld [vmem:[%s7846_s24 + $0xfe] sm:$0xff] }
 0x284   : > { %6841 = vmatmul.mubr.msk.f32.gmra.mrb[26].mxu0 %vm278_vm0, %v5424_v40  ;;  %2542 = vmatprep.mubr.f32.mxu1 %v7704_v0 }
 0x285   : > { %5719 = vmatprep.mubr.f32.mxu0 %v7704_v0 }
 0x287   : > { %6680 = vmatmul.mubr.msk.f32.gmra.mrb[64].mxu1 %vm278_vm0, %v8685_v14  ;;  %v5439_v14 = vld [vmem:[%s7846_s24 + $0x106] sm:$0xff] }
 0x288   : > { %6842 = vmatmul.mubr.msk.f32.gmra.mrb[28].mxu0 %vm278_vm0, %v5425_v42  ;;  %2548 = vmatprep.mubr.f32.mxu1 %v7704_v0 }
 0x289   : > { %5725 = vmatprep.mubr.f32.mxu0 %v7704_v0 }
 0x28b   : > { %6681 = vmatmul.mubr.msk.f32.gmra.mrb[66].mxu1 %vm278_vm0, %v8694_v29  ;;  %v5440_v29 = vld [vmem:[%s7846_s24 + $0x10e] sm:$0xff] }
 0x28c   : > { %6843 = vmatmul.mubr.msk.f32.gmra.mrb[30].mxu0 %vm278_vm0, %v5426_v46  ;;  %2554 = vmatprep.mubr.f32.mxu1 %v7704_v0 }
 0x28d   : > { %5731 = vmatprep.mubr.f32.mxu0 %v7704_v0 }
 0x28f   : > { %6682 = vmatmul.mubr.msk.f32.gmra.mrb[68].mxu1 %vm278_vm0, %v2160_v45 }
 0x290   : > { %6844 = vmatmul.mubr.msk.f32.gmra.mrb[32].mxu0 %vm278_vm0, %v5427_v48  ;;  %2560 = vmatprep.mubr.f32.mxu1 %v7704_v0 }
 0x291   : > { %5737 = vmatprep.mubr.f32.mxu0 %v7704_v0 }
 0x293   : > { %6683 = vmatmul.mubr.msk.f32.gmra.mrb[70].mxu1 %vm278_vm0, %v2161_v49 }
 0x294   : > { %6845 = vmatmul.mubr.msk.f32.gmra.mrb[34].mxu0 %vm278_vm0, %v5428_v51  ;;  %3115 = vmatprep.mubr.f32.mxu1 %v7704_v0 }
 0x295   : > { %5743 = vmatprep.mubr.f32.mxu0 %v7704_v0 }
 0x297   : > { %6702 = vmatmul.mubr.msk.f32.vlgmr.msra.gmra.mrb[36].mxu1 %vm278_vm0, %v2801_v54 }
 0x298   : > { %6846 = vmatmul.mubr.msk.f32.gmra.mrb[36].mxu0 %vm278_vm0, %v5429_v58  ;;  %3121 = vmatprep.mubr.f32.mxu1 %v7704_v0 }
 0x299   : > { %5749 = vmatprep.mubr.f32.mxu0 %v7704_v0 }
 0x29b   : > { %6703 = vmatmul.mubr.msk.f32.gmra.mrb[38].mxu1 %vm278_vm0, %v2802_v61 }
 0x29c   : > { %6847 = vmatmul.mubr.msk.f32.gmra.mrb[38].mxu0 %vm278_vm0, %v5430_v56  ;;  %3127 = vmatprep.mubr.f32.mxu1 %v7704_v0  ;;  %v6070_v56 = vlaneseq }
 0x29d   : > { %5755 = vmatprep.mubr.f32.mxu0 %v7704_v0 }
 0x29f   : > { %6704 = vmatmul.mubr.msk.f32.gmra.mrb[40].mxu1 %vm278_vm0, %v2803_v62 }
 0x2a0   : > { %6848 = vmatmul.mubr.msk.f32.gmra.mrb[40].mxu0 %vm278_vm0, %v5431_v1  ;;  %3133 = vmatprep.mubr.f32.mxu1 %v7704_v0 }
 0x2a1   : > { %5761 = vmatprep.mubr.f32.mxu0 %v7704_v0 }
 0x2a3   : > { %6705 = vmatmul.mubr.msk.f32.gmra.mrb[42].mxu1 %vm278_vm0, %v2804_v55  ;;  %v6071_v55 = vshrl.u32 %v6070_v56, 7 }
 0x2a4   : > { %6849 = vmatmul.mubr.msk.f32.gmra.mrb[42].mxu0 %vm278_vm0, %v5432_v60  ;;  %3139 = vmatprep.mubr.f32.mxu1 %v7704_v0 }
 0x2a5   : > { %5767 = vmatprep.mubr.f32.mxu0 %v7704_v0 }
 0x2a7   : > { %6706 = vmatmul.mubr.msk.f32.gmra.mrb[44].mxu1 %vm278_vm0, %v2805_v4 }
 0x2a8   : > { %6850 = vmatmul.mubr.msk.f32.gmra.mrb[44].mxu0 %vm278_vm0, %v5433_v6  ;;  %3145 = vmatprep.mubr.f32.mxu1 %v7704_v0  ;;  %v6072_v6 = vsub.s32 0, %v6071_v55 }
 0x2a9   : > { %5773 = vmatprep.mubr.f32.mxu0 %v7704_v0 }
 0x2ab   : > { %6707 = vmatmul.mubr.msk.f32.gmra.mrb[46].mxu1 %vm278_vm0, %v2806_v63 }
 0x2ac   : > { %6851 = vmatmul.mubr.msk.f32.gmra.mrb[46].mxu0 %vm278_vm0, %v5434_v3  ;;  %3151 = vmatprep.mubr.f32.mxu1 %v7704_v0  ;;  %v6068_v3 = vld [vmem:[#allocation5] sm:$0x3] }
 0x2ad   : > { %5779 = vmatprep.mubr.f32.mxu0 %v7704_v0 }
 0x2af   : > { %6708 = vmatmul.mubr.msk.f32.gmra.mrb[48].mxu1 %vm278_vm0, %v2807_v5  ;;  %v6076_v5 = vsub.s32 1, %v6071_v55 }
 0x2b0   : > { %6852 = vmatmul.mubr.msk.f32.gmra.mrb[48].mxu0 %vm278_vm0, %v5435_v7  ;;  %3157 = vmatprep.mubr.f32.mxu1 %v7704_v0  ;;  %v6224_v7 = vld [vmem:[%s9367_s3] sm:$0x3] }
 0x2b1   : > { %5785 = vmatprep.mubr.f32.mxu0 %v7704_v0 }
 0x2b3   : > { %6709 = vmatmul.mubr.msk.f32.gmra.mrb[50].mxu1 %vm278_vm0, %v2808_v10  ;;  %v9099_v10 = vrot.slane %v6068_v3, %v6072_v6 }
 0x2b4   : > { %6853 = vmatmul.mubr.msk.f32.gmra.mrb[50].mxu0 %vm278_vm0, %v5436_v12  ;;  %3163 = vmatprep.mubr.f32.mxu1 %v7704_v0 }
 0x2b5   : > { %5791 = vmatprep.mubr.f32.mxu0 %v7704_v0 }
 0x2b7   : > { %6710 = vmatmul.mubr.msk.f32.gmra.mrb[52].mxu1 %vm278_vm0, %v2809_v15  ;;  %v9101_v15 = vrot.slane %v6068_v3, %v6076_v5 }
 0x2b8   : > { %6854 = vmatmul.mubr.msk.f32.gmra.mrb[52].mxu0 %vm278_vm0, %v5437_v17  ;;  %3169 = vmatprep.mubr.f32.mxu1 %v7704_v0 }
 0x2b9   : > { %5797 = vmatprep.mubr.f32.mxu0 %v7704_v0 }
 0x2bb   : > { %6711 = vmatmul.mubr.msk.f32.gmra.mrb[54].mxu1 %vm278_vm0, %v2810_v20  ;;  %v9104_v20 = vrot.slane %v6224_v7, %v6072_v6 }
 0x2bc   : > { %6855 = vmatmul.mubr.msk.f32.gmra.mrb[54].mxu0 %vm278_vm0, %v5438_v24  ;;  %3175 = vmatprep.mubr.f32.mxu1 %v7704_v0 }
 0x2bd   : > { %5803 = vmatprep.mubr.f32.mxu0 %v7704_v0 }
 0x2bf   : > { %6712 = vmatmul.mubr.msk.f32.gmra.mrb[56].mxu1 %vm278_vm0, %v2811_v27 }
 0x2c0   : > { %6856 = vmatmul.mubr.msk.f32.gmra.mrb[56].mxu0 %vm278_vm0, %v5439_v14  ;;  %3181 = vmatprep.mubr.f32.mxu1 %v7704_v0  ;;  %v9106_v14 = vrot.slane %v6224_v7, %v6076_v5 }
 0x2c1   : > { %5809 = vmatprep.mubr.f32.mxu0 %v7704_v0 }
 0x2c3   : > { %6713 = vmatmul.mubr.msk.f32.gmra.mrb[58].mxu1 %vm278_vm0, %v2812_v16 }
 0x2c4   : > { %6857 = vmatmul.mubr.msk.f32.gmra.mrb[58].mxu0 %vm278_vm0, %v5440_v29  ;;  %3187 = vmatprep.mubr.f32.mxu1 %v7704_v0 }
 0x2c5   : > { %5815 = vmatprep.mubr.f32.mxu0 %v7704_v0 }
 0x2c7   : > { %6714 = vmatmul.mubr.msk.f32.gmra.mrb[60].mxu1 %vm278_vm0, %v2813_v19 }
 0x2c8   : > { %6858 = vmatmul.mubr.msk.f32.gmra.mrb[60].mxu0 %vm278_vm0, %v5441_v23  ;;  %3193 = vmatprep.mubr.f32.mxu1 %v7704_v0 }
 0x2c9   : > { %5821 = vmatprep.mubr.f32.mxu0 %v7704_v0 }
 0x2cb   : > { %6715 = vmatmul.mubr.msk.f32.gmra.mrb[62].mxu1 %vm278_vm0, %v2814_v37 }
 0x2cc   : > { %6859 = vmatmul.mubr.msk.f32.gmra.mrb[62].mxu0 %vm278_vm0, %v5442_v57  ;;  %3199 = vmatprep.mubr.f32.mxu1 %v7704_v0 }
 0x2cd   : > { %5827 = vmatprep.mubr.f32.mxu0 %v7704_v0 }
 0x2cf   : > { %6716 = vmatmul.mubr.msk.f32.gmra.mrb[64].mxu1 %vm278_vm0, %v2815_v13 }
 0x2d0   : > { %6860 = vmatmul.mubr.msk.f32.gmra.mrb[64].mxu0 %vm278_vm0, %v5443_v18  ;;  %3205 = vmatprep.mubr.f32.mxu1 %v7704_v0 }
 0x2d1   : > { %5833 = vmatprep.mubr.f32.mxu0 %v7704_v0 }
 0x2d3   : > { %6717 = vmatmul.mubr.msk.f32.gmra.mrb[66].mxu1 %vm278_vm0, %v2816_v26 }
 0x2d4   : > { %6861 = vmatmul.mubr.msk.f32.gmra.mrb[66].mxu0 %vm278_vm0, %v5444_v31  ;;  %3211 = vmatprep.mubr.f32.mxu1 %v7704_v0 }
 0x2d5   : > { %5839 = vmatprep.mubr.f32.mxu0 %v7704_v0 }
 0x2d7   : > { %6718 = vmatmul.mubr.msk.f32.gmra.mrb[68].mxu1 %vm278_vm0, %v2817_v39 }
 0x2d8   : > { %6862 = vmatmul.mubr.msk.f32.gmra.mrb[68].mxu0 %vm278_vm0, %v5445_v44  ;;  %3217 = vmatprep.mubr.f32.mxu1 %v7704_v0 }
 0x2d9   : > { %5845 = vmatprep.mubr.f32.mxu0 %v7704_v0 }
 0x2da   : > { %v2352_v9 = vpop.f32.mrb[0].mxu1 }
 0x2db   : > { %v2354_v21 = vpop.f32.mrb[1].mxu1  ;;  %6719 = vmatmul.mubr.msk.f32.gmra.mrb[70].mxu1 %vm278_vm0, %v2818_v52 }
 0x2dc   : > { %6863 = vmatmul.mubr.msk.f32.gmra.mrb[70].mxu0 %vm278_vm0, %v5446_v2 }
 0x2de   : > { %v2358_v8 = vpop.f32.mrb[2].mxu1 }
 0x2df   : > { %v2360_v25 = vpop.f32.mrb[3].mxu1 }
 0x2e2   : > { %v9032_v30 = vpop.f32.mrb[4].mxu1 }
 0x2e3   : > { %v9034_v33 = vpop.f32.mrb[5].mxu1 }
 0x2e6   : > { %v9036_v35 = vpop.f32.mrb[6].mxu1 }
 0x2e7   : > { %v9038_v38 = vpop.f32.mrb[7].mxu1 }
 0x2ea   : > { %v9040_v41 = vpop.f32.mrb[8].mxu1 }
 0x2eb   : > { %v9042_v0 = vpop.f32.mrb[9].mxu1 }
 0x2ee   : > { %v9044_v43 = vpop.f32.mrb[10].mxu1 }
 0x2ef   : > { %v9046_v47 = vpop.f32.mrb[11].mxu1 }
 0x2f2   : > { %v9048_v50 = vpop.f32.mrb[12].mxu1 }
 0x2f3   : > { %v9050_v53 = vpop.f32.mrb[13].mxu1 }
 0x2f6   : > { %v9052_v59 = vpop.f32.mrb[14].mxu1 }
 0x2f7   : > { %v9054_v11 = vpop.f32.mrb[15].mxu1 }
 0x2fa   : > { %v9056_v22 = vpop.f32.mrb[16].mxu1 }
 0x2fb   : > { %v9058_v28 = vpop.f32.mrb[17].mxu1 }
 0x2fe   : > { %v9060_v32 = vpop.f32.mrb[18].mxu1 }
 0x2ff   : > { %v9062_v34 = vpop.f32.mrb[19].mxu1 }
 0x302   : > { %v9064_v36 = vpop.f32.mrb[20].mxu1 }
 0x303   : > { %v9066_v40 = vpop.f32.mrb[21].mxu1 }
 0x306   : > { %v9068_v42 = vpop.f32.mrb[22].mxu1 }
 0x307   : > { %v9070_v46 = vpop.f32.mrb[23].mxu1 }
 0x30a   : > { %v9072_v45 = vpop.f32.mrb[24].mxu1 }
 0x30b   : > { %v9074_v48 = vpop.f32.mrb[25].mxu1 }
 0x30e   : > { %v9076_v49 = vpop.f32.mrb[26].mxu1 }
 0x30f   : > { %v9078_v51 = vpop.f32.mrb[27].mxu1 }
 0x312   : > { %v9080_v54 = vpop.f32.mrb[28].mxu1 }
 0x313   : > { %v9082_v58 = vpop.f32.mrb[29].mxu1 }
 0x316   : > { %v9084_v61 = vpop.f32.mrb[30].mxu1 }
 0x317   : > { %v9086_v62 = vpop.f32.mrb[31].mxu1 }
 0x31a   : > { %v9088_v1 = vpop.f32.mrb[32].mxu1 }
 0x31b   : > { %v9090_v60 = vpop.f32.mrb[33].mxu1 }
 0x31e   : > { %v9092_v4 = vpop.f32.mrb[34].mxu1 }
 0x31f   : > { %v9094_v63 = vpop.f32.mrb[35].mxu1 }
 0x323   : > { %v5637_v12 = vpop.f32.mrb[0].mxu0 }
 0x324   : > { %v7018_v17 = vadd.f32 %v5637_v12, %v2352_v9  ;;  %v5639_v24 = vpop.f32.mrb[1].mxu0 }
 0x325   : > { %v7019_v27 = vadd.f32 %v5639_v24, %v2354_v21 }
 0x326   : > { %v6080_v16 = vadd.f32 %v7018_v17, %v9099_v10 }
 0x327   : > { %v6081_v29 = vadd.f32 %v7019_v27, %v9101_v15  ;;  %v5643_v19 = vpop.f32.mrb[2].mxu0 }
 0x328   : > { %vm6152_vm1 = vcmp.ge.f32.partialorder %v6080_v16, 0.0  ;;  %v6236_v23 = vmul.f32 %v9104_v20, %v6080_v16  ;;  %v7020_v37 = vadd.f32 %v5643_v19, %v2358_v8  ;;  %v5645_v57 = vpop.f32.mrb[3].mxu0 }
 0x329   : > { %vm6153_vm2 = vcmp.ge.f32.partialorder %v6081_v29, 0.0  ;;  %v6237_v13 = vmul.f32 %v9106_v14, %v6081_v29  ;;  %v7021_v18 = vadd.f32 %v5645_v57, %v2360_v25 }
 0x32a   : > { %v6308_v26 = vsel %vm6152_vm1, %v6080_v16, %v6236_v23  ;;  %v6082_v31 = vadd.f32 %v7020_v37, %v9099_v10 }
 0x32b   : > { %6380 = vst [vmem:[%s9113_s30] sm:$0xff] %v6308_v26  ;;  %v6309_v39 = vsel %vm6153_vm2, %v6081_v29, %v6237_v13  ;;  %v6083_v44 = vadd.f32 %v7021_v18, %v9101_v15  ;;  %v5649_v52 = vpop.f32.mrb[4].mxu0 }
 0x32c   : > { %6381 = vst [vmem:[%s9113_s30 + $0x8] sm:$0xff] %v6309_v39  ;;  %vm6154_vm3 = vcmp.ge.f32.partialorder %v6082_v31, 0.0  ;;  %v6238_v2 = vmul.f32 %v9104_v20, %v6082_v31  ;;  %v7022_v9 = vadd.f32 %v5649_v52, %v9032_v30  ;;  %v5651_v21 = vpop.f32.mrb[5].mxu0 }
 0x32d   : > { %vm6155_vm4 = vcmp.ge.f32.partialorder %v6083_v44, 0.0  ;;  %v6239_v8 = vmul.f32 %v9106_v14, %v6083_v44  ;;  %v7023_v25 = vadd.f32 %v5651_v21, %v9034_v33 }
 0x32e   : > { %v6310_v56 = vsel %vm6154_vm3, %v6082_v31, %v6238_v2  ;;  %v6084_v55 = vadd.f32 %v7022_v9, %v9099_v10 }
 0x32f   : > { %6382 = vst [vmem:[%s9113_s30 + $0x10] sm:$0xff] %v6310_v56  ;;  %v6311_v6 = vsel %vm6155_vm4, %v6083_v44, %v6239_v8  ;;  %v6085_v3 = vadd.f32 %v7023_v25, %v9101_v15  ;;  %v5655_v5 = vpop.f32.mrb[6].mxu0 }
 0x330   : > { %6383 = vst [vmem:[%s9113_s30 + $0x18] sm:$0xff] %v6311_v6  ;;  %vm6156_vm5 = vcmp.ge.f32.partialorder %v6084_v55, 0.0  ;;  %v6240_v30 = vmul.f32 %v9104_v20, %v6084_v55  ;;  %v7024_v7 = vadd.f32 %v5655_v5, %v9036_v35  ;;  %v5657_v12 = vpop.f32.mrb[7].mxu0 }
 0x331   : > { %vm6157_vm6 = vcmp.ge.f32.partialorder %v6085_v3, 0.0  ;;  %v6241_v33 = vmul.f32 %v9106_v14, %v6085_v3  ;;  %v7025_v17 = vadd.f32 %v5657_v12, %v9038_v38 }
 0x332   : > { %v6312_v24 = vsel %vm6156_vm5, %v6084_v55, %v6240_v30  ;;  %v6086_v27 = vadd.f32 %v7024_v7, %v9099_v10 }
 0x333   : > { %6384 = vst [vmem:[%s9113_s30 + $0x20] sm:$0xff] %v6312_v24  ;;  %v6313_v16 = vsel %vm6157_vm6, %v6085_v3, %v6241_v33  ;;  %v6087_v29 = vadd.f32 %v7025_v17, %v9101_v15  ;;  %v5661_v19 = vpop.f32.mrb[8].mxu0 }
 0x334   : > { %6385 = vst [vmem:[%s9113_s30 + $0x28] sm:$0xff] %v6313_v16  ;;  %vm6158_vm7 = vcmp.ge.f32.partialorder %v6086_v27, 0.0  ;;  %v6242_v35 = vmul.f32 %v9104_v20, %v6086_v27  ;;  %v7026_v23 = vadd.f32 %v5661_v19, %v9040_v41  ;;  %v5663_v37 = vpop.f32.mrb[9].mxu0 }
 0x335   : > { %vm6159_vm8 = vcmp.ge.f32.partialorder %v6087_v29, 0.0  ;;  %v6243_v38 = vmul.f32 %v9106_v14, %v6087_v29  ;;  %v7027_v57 = vadd.f32 %v5663_v37, %v9042_v0 }
 0x336   : > { %v6314_v13 = vsel %vm6158_vm7, %v6086_v27, %v6242_v35  ;;  %v6088_v18 = vadd.f32 %v7026_v23, %v9099_v10 }
 0x337   : > { %6386 = vst [vmem:[%s9113_s30 + $0x30] sm:$0xff] %v6314_v13  ;;  %v6315_v26 = vsel %vm6159_vm8, %v6087_v29, %v6243_v38  ;;  %v6089_v31 = vadd.f32 %v7027_v57, %v9101_v15  ;;  %v5667_v39 = vpop.f32.mrb[10].mxu0 }
 0x338   : > { %6387 = vst [vmem:[%s9113_s30 + $0x38] sm:$0xff] %v6315_v26  ;;  %vm6160_vm9 = vcmp.ge.f32.partialorder %v6088_v18, 0.0  ;;  %v6244_v41 = vmul.f32 %v9104_v20, %v6088_v18  ;;  %v7028_v44 = vadd.f32 %v5667_v39, %v9044_v43  ;;  %v5669_v52 = vpop.f32.mrb[11].mxu0 }
 0x339   : > { %vm6161_vm10 = vcmp.ge.f32.partialorder %v6089_v31, 0.0  ;;  %v6245_v0 = vmul.f32 %v9106_v14, %v6089_v31  ;;  %v7029_v2 = vadd.f32 %v5669_v52, %v9046_v47 }
 0x33a   : > { %v6316_v9 = vsel %vm6160_vm9, %v6088_v18, %v6244_v41  ;;  %v6090_v21 = vadd.f32 %v7028_v44, %v9099_v10 }
 0x33b   : > { %6388 = vst [vmem:[%s9113_s30 + $0x40] sm:$0xff] %v6316_v9  ;;  %v6317_v8 = vsel %vm6161_vm10, %v6089_v31, %v6245_v0  ;;  %v6091_v25 = vadd.f32 %v7029_v2, %v9101_v15  ;;  %v5673_v56 = vpop.f32.mrb[12].mxu0 }
 0x33c   : > { %6389 = vst [vmem:[%s9113_s30 + $0x48] sm:$0xff] %v6317_v8  ;;  %vm6162_vm11 = vcmp.ge.f32.partialorder %v6090_v21, 0.0  ;;  %v6246_v43 = vmul.f32 %v9104_v20, %v6090_v21  ;;  %v7030_v55 = vadd.f32 %v5673_v56, %v9048_v50  ;;  %v5675_v6 = vpop.f32.mrb[13].mxu0 }
 0x33d   : > { %vm6163_vm12 = vcmp.ge.f32.partialorder %v6091_v25, 0.0  ;;  %v6247_v47 = vmul.f32 %v9106_v14, %v6091_v25  ;;  %v7031_v3 = vadd.f32 %v5675_v6, %v9050_v53 }
 0x33e   : > { %v6318_v5 = vsel %vm6162_vm11, %v6090_v21, %v6246_v43  ;;  %v6092_v30 = vadd.f32 %v7030_v55, %v9099_v10 }
 0x33f   : > { %6390 = vst [vmem:[%s9113_s30 + $0x50] sm:$0xff] %v6318_v5  ;;  %v6319_v7 = vsel %vm6163_vm12, %v6091_v25, %v6247_v47  ;;  %v6093_v12 = vadd.f32 %v7031_v3, %v9101_v15  ;;  %v5679_v33 = vpop.f32.mrb[14].mxu0 }
 0x340   : > { %6391 = vst [vmem:[%s9113_s30 + $0x58] sm:$0xff] %v6319_v7  ;;  %vm6164_vm13 = vcmp.ge.f32.partialorder %v6092_v30, 0.0  ;;  %v6248_v50 = vmul.f32 %v9104_v20, %v6092_v30  ;;  %v7032_v17 = vadd.f32 %v5679_v33, %v9052_v59  ;;  %v5681_v24 = vpop.f32.mrb[15].mxu0 }
 0x341   : > { %vm6165_vm14 = vcmp.ge.f32.partialorder %v6093_v12, 0.0  ;;  %v6249_v53 = vmul.f32 %v9106_v14, %v6093_v12  ;;  %v7033_v27 = vadd.f32 %v5681_v24, %v9054_v11 }
 0x342   : > { %v6320_v16 = vsel %vm6164_vm13, %v6092_v30, %v6248_v50  ;;  %v6094_v29 = vadd.f32 %v7032_v17, %v9099_v10 }
 0x343   : > { %6392 = vst [vmem:[%s9113_s30 + $0x60] sm:$0xff] %v6320_v16  ;;  %v6321_v19 = vsel %vm6165_vm14, %v6093_v12, %v6249_v53  ;;  %v6095_v35 = vadd.f32 %v7033_v27, %v9101_v15  ;;  %v5685_v23 = vpop.f32.mrb[16].mxu0 }
 0x344   : > { %6393 = vst [vmem:[%s9113_s30 + $0x68] sm:$0xff] %v6321_v19  ;;  %vm6166_vm15 = vcmp.ge.f32.partialorder %v6094_v29, 0.0  ;;  %v6250_v59 = vmul.f32 %v9104_v20, %v6094_v29  ;;  %v7034_v37 = vadd.f32 %v5685_v23, %v9056_v22  ;;  %v5687_v38 = vpop.f32.mrb[17].mxu0 }
 0x345   : > { %vm6167_vm0 = vcmp.ge.f32.partialorder %v6095_v35, 0.0  ;;  %v6251_v11 = vmul.f32 %v9106_v14, %v6095_v35  ;;  %v7035_v57 = vadd.f32 %v5687_v38, %v9058_v28 }
 0x346   : > { %v6322_v13 = vsel %vm6166_vm15, %v6094_v29, %v6250_v59  ;;  %v6096_v18 = vadd.f32 %v7034_v37, %v9099_v10 }
 0x347   : > { %6394 = vst [vmem:[%s9113_s30 + $0x70] sm:$0xff] %v6322_v13  ;;  %v6323_v26 = vsel %vm6167_vm0, %v6095_v35, %v6251_v11  ;;  %v6097_v31 = vadd.f32 %v7035_v57, %v9101_v15  ;;  %v5691_v39 = vpop.f32.mrb[18].mxu0 }
 0x348   : > { %6395 = vst [vmem:[%s9113_s30 + $0x78] sm:$0xff] %v6323_v26  ;;  %vm6168_vm1 = vcmp.ge.f32.partialorder %v6096_v18, 0.0  ;;  %v6252_v22 = vmul.f32 %v9104_v20, %v6096_v18  ;;  %v7036_v41 = vadd.f32 %v5691_v39, %v9060_v32  ;;  %v5693_v44 = vpop.f32.mrb[19].mxu0 }
 0x349   : > { %vm6169_vm2 = vcmp.ge.f32.partialorder %v6097_v31, 0.0  ;;  %v6253_v28 = vmul.f32 %v9106_v14, %v6097_v31  ;;  %v7037_v52 = vadd.f32 %v5693_v44, %v9062_v34 }
 0x34a   : > { %v6324_v0 = vsel %vm6168_vm1, %v6096_v18, %v6252_v22  ;;  %v6098_v2 = vadd.f32 %v7036_v41, %v9099_v10 }
 0x34b   : > { %6396 = vst [vmem:[%s9113_s30 + $0x80] sm:$0xff] %v6324_v0  ;;  %v6325_v9 = vsel %vm6169_vm2, %v6097_v31, %v6253_v28  ;;  %v6099_v21 = vadd.f32 %v7037_v52, %v9101_v15  ;;  %v5697_v8 = vpop.f32.mrb[20].mxu0 }
 0x34c   : > { %6397 = vst [vmem:[%s9113_s30 + $0x88] sm:$0xff] %v6325_v9  ;;  %vm6170_vm3 = vcmp.ge.f32.partialorder %v6098_v2, 0.0  ;;  %v6254_v32 = vmul.f32 %v9104_v20, %v6098_v2  ;;  %v7038_v25 = vadd.f32 %v5697_v8, %v9064_v36  ;;  %v5699_v56 = vpop.f32.mrb[21].mxu0 }
 0x34d   : > { %vm6171_vm4 = vcmp.ge.f32.partialorder %v6099_v21, 0.0  ;;  %v6255_v34 = vmul.f32 %v9106_v14, %v6099_v21  ;;  %v7039_v43 = vadd.f32 %v5699_v56, %v9066_v40 }
 0x34e   : > { %v6326_v55 = vsel %vm6170_vm3, %v6098_v2, %v6254_v32  ;;  %v6100_v6 = vadd.f32 %v7038_v25, %v9099_v10 }
 0x34f   : > { %6398 = vst [vmem:[%s9113_s30 + $0x90] sm:$0xff] %v6326_v55  ;;  %v6327_v47 = vsel %vm6171_vm4, %v6099_v21, %v6255_v34  ;;  %v6101_v3 = vadd.f32 %v7039_v43, %v9101_v15  ;;  %v5703_v5 = vpop.f32.mrb[22].mxu0 }
 0x350   : > { %6399 = vst [vmem:[%s9113_s30 + $0x98] sm:$0xff] %v6327_v47  ;;  %vm6172_vm5 = vcmp.ge.f32.partialorder %v6100_v6, 0.0  ;;  %v6256_v36 = vmul.f32 %v9104_v20, %v6100_v6  ;;  %v7040_v30 = vadd.f32 %v5703_v5, %v9068_v42  ;;  %v5705_v7 = vpop.f32.mrb[23].mxu0 }
 0x351   : > { %vm6173_vm6 = vcmp.ge.f32.partialorder %v6101_v3, 0.0  ;;  %v6257_v40 = vmul.f32 %v9106_v14, %v6101_v3  ;;  %v7041_v12 = vadd.f32 %v5705_v7, %v9070_v46 }
 0x352   : > { %v6328_v33 = vsel %vm6172_vm5, %v6100_v6, %v6256_v36  ;;  %v6102_v50 = vadd.f32 %v7040_v30, %v9099_v10 }
 0x353   : > { %6400 = vst [vmem:[%s9113_s30 + $0xa0] sm:$0xff] %v6328_v33  ;;  %v6329_v17 = vsel %vm6173_vm6, %v6101_v3, %v6257_v40  ;;  %v6103_v24 = vadd.f32 %v7041_v12, %v9101_v15  ;;  %v5709_v53 = vpop.f32.mrb[24].mxu0 }
 0x354   : > { %6401 = vst [vmem:[%s9113_s30 + $0xa8] sm:$0xff] %v6329_v17  ;;  %vm6174_vm7 = vcmp.ge.f32.partialorder %v6102_v50, 0.0  ;;  %v6258_v42 = vmul.f32 %v9104_v20, %v6102_v50  ;;  %v7042_v27 = vadd.f32 %v5709_v53, %v9072_v45  ;;  %v5711_v16 = vpop.f32.mrb[25].mxu0 }
 0x355   : > { %vm6175_vm8 = vcmp.ge.f32.partialorder %v6103_v24, 0.0  ;;  %v6259_v46 = vmul.f32 %v9106_v14, %v6103_v24  ;;  %v7043_v29 = vadd.f32 %v5711_v16, %v9074_v48 }
 0x356   : > { %v6330_v19 = vsel %vm6174_vm7, %v6102_v50, %v6258_v42  ;;  %v6104_v35 = vadd.f32 %v7042_v27, %v9099_v10 }
 0x357   : > { %6402 = vst [vmem:[%s9113_s30 + $0xb0] sm:$0xff] %v6330_v19  ;;  %v6331_v23 = vsel %vm6175_vm8, %v6103_v24, %v6259_v46  ;;  %v6105_v59 = vadd.f32 %v7043_v29, %v9101_v15  ;;  %v5715_v37 = vpop.f32.mrb[26].mxu0 }
 0x358   : > { %6403 = vst [vmem:[%s9113_s30 + $0xb8] sm:$0xff] %v6331_v23  ;;  %vm6176_vm9 = vcmp.ge.f32.partialorder %v6104_v35, 0.0  ;;  %v6260_v45 = vmul.f32 %v9104_v20, %v6104_v35  ;;  %v7044_v38 = vadd.f32 %v5715_v37, %v9076_v49  ;;  %v5717_v11 = vpop.f32.mrb[27].mxu0 }
 0x359   : > { %vm6177_vm10 = vcmp.ge.f32.partialorder %v6105_v59, 0.0  ;;  %v6261_v48 = vmul.f32 %v9106_v14, %v6105_v59  ;;  %v7045_v57 = vadd.f32 %v5717_v11, %v9078_v51 }
 0x35a   : > { %v6332_v13 = vsel %vm6176_vm9, %v6104_v35, %v6260_v45  ;;  %v6106_v18 = vadd.f32 %v7044_v38, %v9099_v10 }
 0x35b   : > { %6404 = vst [vmem:[%s9113_s30 + $0xc0] sm:$0xff] %v6332_v13  ;;  %v6333_v26 = vsel %vm6177_vm10, %v6105_v59, %v6261_v48  ;;  %v6107_v31 = vadd.f32 %v7045_v57, %v9101_v15  ;;  %v5721_v39 = vpop.f32.mrb[28].mxu0 }
 0x35c   : > { %6405 = vst [vmem:[%s9113_s30 + $0xc8] sm:$0xff] %v6333_v26  ;;  %vm6178_vm11 = vcmp.ge.f32.partialorder %v6106_v18, 0.0  ;;  %v6262_v49 = vmul.f32 %v9104_v20, %v6106_v18  ;;  %v7046_v22 = vadd.f32 %v5721_v39, %v9080_v54  ;;  %v5723_v41 = vpop.f32.mrb[29].mxu0 }
 0x35d   : > { %vm6179_vm12 = vcmp.ge.f32.partialorder %v6107_v31, 0.0  ;;  %v6263_v51 = vmul.f32 %v9106_v14, %v6107_v31  ;;  %v7047_v44 = vadd.f32 %v5723_v41, %v9082_v58 }
 0x35e   : > { %v6334_v28 = vsel %vm6178_vm11, %v6106_v18, %v6262_v49  ;;  %v6108_v52 = vadd.f32 %v7046_v22, %v9099_v10 }
 0x35f   : > { %6406 = vst [vmem:[%s9113_s30 + $0xd0] sm:$0xff] %v6334_v28  ;;  %v6335_v0 = vsel %vm6179_vm12, %v6107_v31, %v6263_v51  ;;  %v6109_v2 = vadd.f32 %v7047_v44, %v9101_v15  ;;  %v5727_v9 = vpop.f32.mrb[30].mxu0 }
 0x360   : > { %6407 = vst [vmem:[%s9113_s30 + $0xd8] sm:$0xff] %v6335_v0  ;;  %vm6180_vm13 = vcmp.ge.f32.partialorder %v6108_v52, 0.0  ;;  %v6264_v54 = vmul.f32 %v9104_v20, %v6108_v52  ;;  %v7048_v21 = vadd.f32 %v5727_v9, %v9084_v61  ;;  %v5729_v8 = vpop.f32.mrb[31].mxu0 }
 0x361   : > { %vm6181_vm14 = vcmp.ge.f32.partialorder %v6109_v2, 0.0  ;;  %v6265_v58 = vmul.f32 %v9106_v14, %v6109_v2  ;;  %v7049_v32 = vadd.f32 %v5729_v8, %v9086_v62 }
 0x362   : > { %v6336_v25 = vsel %vm6180_vm13, %v6108_v52, %v6264_v54  ;;  %v6110_v56 = vadd.f32 %v7048_v21, %v9099_v10 }
 0x363   : > { %6408 = vst [vmem:[%s9113_s30 + $0xe0] sm:$0xff] %v6336_v25  ;;  %v6337_v34 = vsel %vm6181_vm14, %v6109_v2, %v6265_v58  ;;  %v6111_v43 = vadd.f32 %v7049_v32, %v9101_v15  ;;  %v5733_v55 = vpop.f32.mrb[32].mxu0 }
 0x364   : > { %6409 = vst [vmem:[%s9113_s30 + $0xe8] sm:$0xff] %v6337_v34  ;;  %vm6182_vm15 = vcmp.ge.f32.partialorder %v6110_v56, 0.0  ;;  %v6266_v61 = vmul.f32 %v9104_v20, %v6110_v56  ;;  %v7050_v6 = vadd.f32 %v5733_v55, %v9088_v1  ;;  %v5735_v47 = vpop.f32.mrb[33].mxu0 }
 0x365   : > { %vm6183_vm0 = vcmp.ge.f32.partialorder %v6111_v43, 0.0  ;;  %v6267_v62 = vmul.f32 %v9106_v14, %v6111_v43  ;;  %v7051_v3 = vadd.f32 %v5735_v47, %v9090_v60 }
 0x366   : > { %v6338_v5 = vsel %vm6182_vm15, %v6110_v56, %v6266_v61  ;;  %v6112_v36 = vadd.f32 %v7050_v6, %v9099_v10 }
 0x367   : > { %6410 = vst [vmem:[%s9113_s30 + $0xf0] sm:$0xff] %v6338_v5  ;;  %v6339_v30 = vsel %vm6183_vm0, %v6111_v43, %v6267_v62  ;;  %v6113_v7 = vadd.f32 %v7051_v3, %v9101_v15  ;;  %v5739_v40 = vpop.f32.mrb[34].mxu0 }
 0x368   : > { %6411 = vst [vmem:[%s9113_s30 + $0xf8] sm:$0xff] %v6339_v30  ;;  %vm6184_vm1 = vcmp.ge.f32.partialorder %v6112_v36, 0.0  ;;  %v6268_v1 = vmul.f32 %v9104_v20, %v6112_v36  ;;  %v7052_v12 = vadd.f32 %v5739_v40, %v9092_v4  ;;  %v5741_v33 = vpop.f32.mrb[35].mxu0 }
 0x369   : > { %vm6185_vm2 = vcmp.ge.f32.partialorder %v6113_v7, 0.0  ;;  %v6269_v60 = vmul.f32 %v9106_v14, %v6113_v7  ;;  %v7053_v50 = vadd.f32 %v5741_v33, %v9094_v63 }
 0x36a   : > { %v6340_v17 = vsel %vm6184_vm1, %v6112_v36, %v6268_v1  ;;  %v6114_v24 = vadd.f32 %v7052_v12, %v9099_v10  ;;  %v3117_v53 = vpop.f32.mrb[36].mxu1 }
 0x36b   : > { %6412 = vst [vmem:[%s9113_s30 + $0x100] sm:$0xff] %v6340_v17  ;;  %v6341_v42 = vsel %vm6185_vm2, %v6113_v7, %v6269_v60  ;;  %v6115_v27 = vadd.f32 %v7053_v50, %v9101_v15  ;;  %v5745_v16 = vpop.f32.mrb[36].mxu0  ;;  %v3119_v46 = vpop.f32.mrb[37].mxu1 }
 0x36c   : > { %6413 = vst [vmem:[%s9113_s30 + $0x108] sm:$0xff] %v6341_v42  ;;  %vm6186_vm3 = vcmp.ge.f32.partialorder %v6114_v24, 0.0  ;;  %v6270_v4 = vmul.f32 %v9104_v20, %v6114_v24  ;;  %v7054_v29 = vadd.f32 %v5745_v16, %v3117_v53  ;;  %v5747_v19 = vpop.f32.mrb[37].mxu0 }
 0x36d   : > { %vm6187_vm4 = vcmp.ge.f32.partialorder %v6115_v27, 0.0  ;;  %v6271_v63 = vmul.f32 %v9106_v14, %v6115_v27  ;;  %v7055_v35 = vadd.f32 %v5747_v19, %v3119_v46 }
 0x36e   : > { %v6342_v23 = vsel %vm6186_vm3, %v6114_v24, %v6270_v4  ;;  %v6116_v59 = vadd.f32 %v7054_v29, %v9099_v10  ;;  %v3123_v37 = vpop.f32.mrb[38].mxu1 }
 0x36f   : > { %6414 = vst [vmem:[%s9113_s30 + $0x110] sm:$0xff] %v6342_v23  ;;  %v6343_v45 = vsel %vm6187_vm4, %v6115_v27, %v6271_v63  ;;  %v6117_v38 = vadd.f32 %v7055_v35, %v9101_v15  ;;  %v5751_v11 = vpop.f32.mrb[38].mxu0  ;;  %v3125_v48 = vpop.f32.mrb[39].mxu1 }
 0x370   : > { %6415 = vst [vmem:[%s9113_s30 + $0x118] sm:$0xff] %v6343_v45  ;;  %vm6188_vm5 = vcmp.ge.f32.partialorder %v6116_v59, 0.0  ;;  %v6272_v57 = vmul.f32 %v9104_v20, %v6116_v59  ;;  %v7056_v13 = vadd.f32 %v5751_v11, %v3123_v37  ;;  %v5753_v18 = vpop.f32.mrb[39].mxu0 }
 0x371   : > { %vm6189_vm6 = vcmp.ge.f32.partialorder %v6117_v38, 0.0  ;;  %v6273_v26 = vmul.f32 %v9106_v14, %v6117_v38  ;;  %v7057_v31 = vadd.f32 %v5753_v18, %v3125_v48 }
 0x372   : > { %v6344_v39 = vsel %vm6188_vm5, %v6116_v59, %v6272_v57  ;;  %v6118_v49 = vadd.f32 %v7056_v13, %v9099_v10  ;;  %v3129_v22 = vpop.f32.mrb[40].mxu1 }
 0x373   : > { %6416 = vst [vmem:[%s9113_s30 + $0x120] sm:$0xff] %v6344_v39  ;;  %v6345_v41 = vsel %vm6189_vm6, %v6117_v38, %v6273_v26  ;;  %v6119_v51 = vadd.f32 %v7057_v31, %v9101_v15  ;;  %v5757_v44 = vpop.f32.mrb[40].mxu0  ;;  %v3131_v28 = vpop.f32.mrb[41].mxu1 }
 0x374   : > { %6417 = vst [vmem:[%s9113_s30 + $0x128] sm:$0xff] %v6345_v41  ;;  %vm6190_vm7 = vcmp.ge.f32.partialorder %v6118_v49, 0.0  ;;  %v6274_v52 = vmul.f32 %v9104_v20, %v6118_v49  ;;  %v7058_v0 = vadd.f32 %v5757_v44, %v3129_v22  ;;  %v5759_v2 = vpop.f32.mrb[41].mxu0 }
 0x375   : > { %vm6191_vm8 = vcmp.ge.f32.partialorder %v6119_v51, 0.0  ;;  %v6275_v9 = vmul.f32 %v9106_v14, %v6119_v51  ;;  %v7059_v54 = vadd.f32 %v5759_v2, %v3131_v28 }
 0x376   : > { %v6346_v21 = vsel %vm6190_vm7, %v6118_v49, %v6274_v52  ;;  %v6120_v8 = vadd.f32 %v7058_v0, %v9099_v10  ;;  %v3135_v58 = vpop.f32.mrb[42].mxu1 }
 0x377   : > { %6418 = vst [vmem:[%s9113_s30 + $0x130] sm:$0xff] %v6346_v21  ;;  %v6347_v32 = vsel %vm6191_vm8, %v6119_v51, %v6275_v9  ;;  %v6121_v25 = vadd.f32 %v7059_v54, %v9101_v15  ;;  %v5763_v56 = vpop.f32.mrb[42].mxu0  ;;  %v3137_v34 = vpop.f32.mrb[43].mxu1 }
 0x378   : > { %6419 = vst [vmem:[%s9113_s30 + $0x138] sm:$0xff] %v6347_v32  ;;  %vm6192_vm9 = vcmp.ge.f32.partialorder %v6120_v8, 0.0  ;;  %v6276_v43 = vmul.f32 %v9104_v20, %v6120_v8  ;;  %v7060_v55 = vadd.f32 %v5763_v56, %v3135_v58  ;;  %v5765_v61 = vpop.f32.mrb[43].mxu0 }
 0x379   : > { %vm6193_vm10 = vcmp.ge.f32.partialorder %v6121_v25, 0.0  ;;  %v6277_v6 = vmul.f32 %v9106_v14, %v6121_v25  ;;  %v7061_v47 = vadd.f32 %v5765_v61, %v3137_v34 }
 0x37a   : > { %v6348_v62 = vsel %vm6192_vm9, %v6120_v8, %v6276_v43  ;;  %v6122_v3 = vadd.f32 %v7060_v55, %v9099_v10  ;;  %v3141_v5 = vpop.f32.mrb[44].mxu1 }
 0x37b   : > { %6420 = vst [vmem:[%s9113_s30 + $0x140] sm:$0xff] %v6348_v62  ;;  %v6349_v36 = vsel %vm6193_vm10, %v6121_v25, %v6277_v6  ;;  %v6123_v30 = vadd.f32 %v7061_v47, %v9101_v15  ;;  %v5769_v7 = vpop.f32.mrb[44].mxu0  ;;  %v3143_v40 = vpop.f32.mrb[45].mxu1 }
 0x37c   : > { %6421 = vst [vmem:[%s9113_s30 + $0x148] sm:$0xff] %v6349_v36  ;;  %vm6194_vm11 = vcmp.ge.f32.partialorder %v6122_v3, 0.0  ;;  %v6278_v1 = vmul.f32 %v9104_v20, %v6122_v3  ;;  %v7062_v12 = vadd.f32 %v5769_v7, %v3141_v5  ;;  %v5771_v33 = vpop.f32.mrb[45].mxu0 }
 0x37d   : > { %vm6195_vm12 = vcmp.ge.f32.partialorder %v6123_v30, 0.0  ;;  %v6279_v60 = vmul.f32 %v9106_v14, %v6123_v30  ;;  %v7063_v50 = vadd.f32 %v5771_v33, %v3143_v40 }
 0x37e   : > { %v6350_v17 = vsel %vm6194_vm11, %v6122_v3, %v6278_v1  ;;  %v6124_v24 = vadd.f32 %v7062_v12, %v9099_v10  ;;  %v3147_v53 = vpop.f32.mrb[46].mxu1 }
 0x37f   : > { %6422 = vst [vmem:[%s9113_s30 + $0x150] sm:$0xff] %v6350_v17  ;;  %v6351_v42 = vsel %vm6195_vm12, %v6123_v30, %v6279_v60  ;;  %v6125_v27 = vadd.f32 %v7063_v50, %v9101_v15  ;;  %v5775_v16 = vpop.f32.mrb[46].mxu0  ;;  %v3149_v46 = vpop.f32.mrb[47].mxu1 }
 0x380   : > { %6423 = vst [vmem:[%s9113_s30 + $0x158] sm:$0xff] %v6351_v42  ;;  %vm6196_vm13 = vcmp.ge.f32.partialorder %v6124_v24, 0.0  ;;  %v6280_v4 = vmul.f32 %v9104_v20, %v6124_v24  ;;  %v7064_v29 = vadd.f32 %v5775_v16, %v3147_v53  ;;  %v5777_v19 = vpop.f32.mrb[47].mxu0 }
 0x381   : > { %vm6197_vm14 = vcmp.ge.f32.partialorder %v6125_v27, 0.0  ;;  %v6281_v63 = vmul.f32 %v9106_v14, %v6125_v27  ;;  %v7065_v35 = vadd.f32 %v5777_v19, %v3149_v46 }
 0x382   : > { %v6352_v23 = vsel %vm6196_vm13, %v6124_v24, %v6280_v4  ;;  %v6126_v59 = vadd.f32 %v7064_v29, %v9099_v10  ;;  %v3153_v37 = vpop.f32.mrb[48].mxu1 }
 0x383   : > { %6424 = vst [vmem:[%s9113_s30 + $0x160] sm:$0xff] %v6352_v23  ;;  %v6353_v45 = vsel %vm6197_vm14, %v6125_v27, %v6281_v63  ;;  %v6127_v38 = vadd.f32 %v7065_v35, %v9101_v15  ;;  %v5781_v11 = vpop.f32.mrb[48].mxu0  ;;  %v3155_v48 = vpop.f32.mrb[49].mxu1 }
 0x384   : > { %6425 = vst [vmem:[%s9113_s30 + $0x168] sm:$0xff] %v6353_v45  ;;  %vm6198_vm15 = vcmp.ge.f32.partialorder %v6126_v59, 0.0  ;;  %v6282_v57 = vmul.f32 %v9104_v20, %v6126_v59  ;;  %v7066_v13 = vadd.f32 %v5781_v11, %v3153_v37  ;;  %v5783_v18 = vpop.f32.mrb[49].mxu0 }
 0x385   : > { %vm6199_vm0 = vcmp.ge.f32.partialorder %v6127_v38, 0.0  ;;  %v6283_v26 = vmul.f32 %v9106_v14, %v6127_v38  ;;  %v7067_v31 = vadd.f32 %v5783_v18, %v3155_v48 }
 0x386   : > { %v6354_v39 = vsel %vm6198_vm15, %v6126_v59, %v6282_v57  ;;  %v6128_v49 = vadd.f32 %v7066_v13, %v9099_v10  ;;  %v3159_v22 = vpop.f32.mrb[50].mxu1 }
 0x387   : > { %6426 = vst [vmem:[%s9113_s30 + $0x170] sm:$0xff] %v6354_v39  ;;  %v6355_v41 = vsel %vm6199_vm0, %v6127_v38, %v6283_v26  ;;  %v6129_v51 = vadd.f32 %v7067_v31, %v9101_v15  ;;  %v5787_v44 = vpop.f32.mrb[50].mxu0  ;;  %v3161_v28 = vpop.f32.mrb[51].mxu1 }
 0x388   : > { %6427 = vst [vmem:[%s9113_s30 + $0x178] sm:$0xff] %v6355_v41  ;;  %vm6200_vm1 = vcmp.ge.f32.partialorder %v6128_v49, 0.0  ;;  %v6284_v52 = vmul.f32 %v9104_v20, %v6128_v49  ;;  %v7068_v0 = vadd.f32 %v5787_v44, %v3159_v22  ;;  %v5789_v2 = vpop.f32.mrb[51].mxu0 }
 0x389   : > { %vm6201_vm2 = vcmp.ge.f32.partialorder %v6129_v51, 0.0  ;;  %v6285_v9 = vmul.f32 %v9106_v14, %v6129_v51  ;;  %v7069_v54 = vadd.f32 %v5789_v2, %v3161_v28 }
 0x38a   : > { %v6356_v21 = vsel %vm6200_vm1, %v6128_v49, %v6284_v52  ;;  %v6130_v8 = vadd.f32 %v7068_v0, %v9099_v10  ;;  %v3165_v58 = vpop.f32.mrb[52].mxu1 }
 0x38b   : > { %6428 = vst [vmem:[%s9113_s30 + $0x180] sm:$0xff] %v6356_v21  ;;  %v6357_v32 = vsel %vm6201_vm2, %v6129_v51, %v6285_v9  ;;  %v6131_v25 = vadd.f32 %v7069_v54, %v9101_v15  ;;  %v5793_v56 = vpop.f32.mrb[52].mxu0  ;;  %v3167_v34 = vpop.f32.mrb[53].mxu1 }
 0x38c   : > { %6429 = vst [vmem:[%s9113_s30 + $0x188] sm:$0xff] %v6357_v32  ;;  %vm6202_vm3 = vcmp.ge.f32.partialorder %v6130_v8, 0.0  ;;  %v6286_v43 = vmul.f32 %v9104_v20, %v6130_v8  ;;  %v7070_v55 = vadd.f32 %v5793_v56, %v3165_v58  ;;  %v5795_v61 = vpop.f32.mrb[53].mxu0 }
 0x38d   : > { %vm6203_vm4 = vcmp.ge.f32.partialorder %v6131_v25, 0.0  ;;  %v6287_v6 = vmul.f32 %v9106_v14, %v6131_v25  ;;  %v7071_v47 = vadd.f32 %v5795_v61, %v3167_v34 }
 0x38e   : > { %v6358_v62 = vsel %vm6202_vm3, %v6130_v8, %v6286_v43  ;;  %v6132_v3 = vadd.f32 %v7070_v55, %v9099_v10  ;;  %v3171_v5 = vpop.f32.mrb[54].mxu1 }
 0x38f   : > { %6430 = vst [vmem:[%s9113_s30 + $0x190] sm:$0xff] %v6358_v62  ;;  %v6359_v36 = vsel %vm6203_vm4, %v6131_v25, %v6287_v6  ;;  %v6133_v30 = vadd.f32 %v7071_v47, %v9101_v15  ;;  %v5799_v7 = vpop.f32.mrb[54].mxu0  ;;  %v3173_v40 = vpop.f32.mrb[55].mxu1 }
 0x390   : > { %6431 = vst [vmem:[%s9113_s30 + $0x198] sm:$0xff] %v6359_v36  ;;  %vm6204_vm5 = vcmp.ge.f32.partialorder %v6132_v3, 0.0  ;;  %v6288_v1 = vmul.f32 %v9104_v20, %v6132_v3  ;;  %v7072_v12 = vadd.f32 %v5799_v7, %v3171_v5  ;;  %v5801_v33 = vpop.f32.mrb[55].mxu0 }
 0x391   : > { %vm6205_vm6 = vcmp.ge.f32.partialorder %v6133_v30, 0.0  ;;  %v6289_v60 = vmul.f32 %v9106_v14, %v6133_v30  ;;  %v7073_v50 = vadd.f32 %v5801_v33, %v3173_v40 }
 0x392   : > { %v6360_v17 = vsel %vm6204_vm5, %v6132_v3, %v6288_v1  ;;  %v6134_v24 = vadd.f32 %v7072_v12, %v9099_v10  ;;  %v3177_v53 = vpop.f32.mrb[56].mxu1 }
 0x393   : > { %6432 = vst [vmem:[%s9113_s30 + $0x1a0] sm:$0xff] %v6360_v17  ;;  %v6361_v42 = vsel %vm6205_vm6, %v6133_v30, %v6289_v60  ;;  %v6135_v27 = vadd.f32 %v7073_v50, %v9101_v15  ;;  %v5805_v16 = vpop.f32.mrb[56].mxu0  ;;  %v3179_v46 = vpop.f32.mrb[57].mxu1 }
 0x394   : > { %6433 = vst [vmem:[%s9113_s30 + $0x1a8] sm:$0xff] %v6361_v42  ;;  %vm6206_vm7 = vcmp.ge.f32.partialorder %v6134_v24, 0.0  ;;  %v6290_v4 = vmul.f32 %v9104_v20, %v6134_v24  ;;  %v7074_v29 = vadd.f32 %v5805_v16, %v3177_v53  ;;  %v5807_v19 = vpop.f32.mrb[57].mxu0 }
 0x395   : > { %vm6207_vm8 = vcmp.ge.f32.partialorder %v6135_v27, 0.0  ;;  %v6291_v63 = vmul.f32 %v9106_v14, %v6135_v27  ;;  %v7075_v35 = vadd.f32 %v5807_v19, %v3179_v46 }
 0x396   : > { %v6362_v23 = vsel %vm6206_vm7, %v6134_v24, %v6290_v4  ;;  %v6136_v59 = vadd.f32 %v7074_v29, %v9099_v10  ;;  %v3183_v37 = vpop.f32.mrb[58].mxu1 }
 0x397   : > { %6434 = vst [vmem:[%s9113_s30 + $0x1b0] sm:$0xff] %v6362_v23  ;;  %v6363_v45 = vsel %vm6207_vm8, %v6135_v27, %v6291_v63  ;;  %v6137_v38 = vadd.f32 %v7075_v35, %v9101_v15  ;;  %v5811_v11 = vpop.f32.mrb[58].mxu0  ;;  %v3185_v48 = vpop.f32.mrb[59].mxu1 }
 0x398   : > { %6435 = vst [vmem:[%s9113_s30 + $0x1b8] sm:$0xff] %v6363_v45  ;;  %vm6208_vm9 = vcmp.ge.f32.partialorder %v6136_v59, 0.0  ;;  %v6292_v57 = vmul.f32 %v9104_v20, %v6136_v59  ;;  %v7076_v13 = vadd.f32 %v5811_v11, %v3183_v37  ;;  %v5813_v18 = vpop.f32.mrb[59].mxu0 }
 0x399   : > { %vm6209_vm10 = vcmp.ge.f32.partialorder %v6137_v38, 0.0  ;;  %v6293_v26 = vmul.f32 %v9106_v14, %v6137_v38  ;;  %v7077_v31 = vadd.f32 %v5813_v18, %v3185_v48 }
 0x39a   : > { %v6364_v39 = vsel %vm6208_vm9, %v6136_v59, %v6292_v57  ;;  %v6138_v49 = vadd.f32 %v7076_v13, %v9099_v10  ;;  %v3189_v22 = vpop.f32.mrb[60].mxu1 }
 0x39b   : > { %6436 = vst [vmem:[%s9113_s30 + $0x1c0] sm:$0xff] %v6364_v39  ;;  %v6365_v41 = vsel %vm6209_vm10, %v6137_v38, %v6293_v26  ;;  %v6139_v51 = vadd.f32 %v7077_v31, %v9101_v15  ;;  %v5817_v44 = vpop.f32.mrb[60].mxu0  ;;  %v3191_v28 = vpop.f32.mrb[61].mxu1 }
 0x39c   : > { %6437 = vst [vmem:[%s9113_s30 + $0x1c8] sm:$0xff] %v6365_v41  ;;  %vm6210_vm11 = vcmp.ge.f32.partialorder %v6138_v49, 0.0  ;;  %v6294_v52 = vmul.f32 %v9104_v20, %v6138_v49  ;;  %v7078_v0 = vadd.f32 %v5817_v44, %v3189_v22  ;;  %v5819_v2 = vpop.f32.mrb[61].mxu0 }
 0x39d   : > { %vm6211_vm12 = vcmp.ge.f32.partialorder %v6139_v51, 0.0  ;;  %v6295_v9 = vmul.f32 %v9106_v14, %v6139_v51  ;;  %v7079_v54 = vadd.f32 %v5819_v2, %v3191_v28 }
 0x39e   : > { %v6366_v21 = vsel %vm6210_vm11, %v6138_v49, %v6294_v52  ;;  %v6140_v8 = vadd.f32 %v7078_v0, %v9099_v10  ;;  %v3195_v58 = vpop.f32.mrb[62].mxu1 }
 0x39f   : > { %6438 = vst [vmem:[%s9113_s30 + $0x1d0] sm:$0xff] %v6366_v21  ;;  %v6367_v32 = vsel %vm6211_vm12, %v6139_v51, %v6295_v9  ;;  %v6141_v25 = vadd.f32 %v7079_v54, %v9101_v15  ;;  %v5823_v56 = vpop.f32.mrb[62].mxu0  ;;  %v3197_v34 = vpop.f32.mrb[63].mxu1 }
 0x3a0   : > { %6439 = vst [vmem:[%s9113_s30 + $0x1d8] sm:$0xff] %v6367_v32  ;;  %vm6212_vm13 = vcmp.ge.f32.partialorder %v6140_v8, 0.0  ;;  %v6296_v43 = vmul.f32 %v9104_v20, %v6140_v8  ;;  %v7080_v55 = vadd.f32 %v5823_v56, %v3195_v58  ;;  %v5825_v61 = vpop.f32.mrb[63].mxu0 }
 0x3a1   : > { %vm6213_vm14 = vcmp.ge.f32.partialorder %v6141_v25, 0.0  ;;  %v6297_v6 = vmul.f32 %v9106_v14, %v6141_v25  ;;  %v7081_v47 = vadd.f32 %v5825_v61, %v3197_v34 }
 0x3a2   : > { %v6368_v62 = vsel %vm6212_vm13, %v6140_v8, %v6296_v43  ;;  %v6142_v3 = vadd.f32 %v7080_v55, %v9099_v10  ;;  %v3201_v5 = vpop.f32.mrb[64].mxu1 }
 0x3a3   : > { %6440 = vst [vmem:[%s9113_s30 + $0x1e0] sm:$0xff] %v6368_v62  ;;  %v6369_v36 = vsel %vm6213_vm14, %v6141_v25, %v6297_v6  ;;  %v6143_v30 = vadd.f32 %v7081_v47, %v9101_v15  ;;  %v5829_v7 = vpop.f32.mrb[64].mxu0  ;;  %v3203_v40 = vpop.f32.mrb[65].mxu1 }
 0x3a4   : > { %6441 = vst [vmem:[%s9113_s30 + $0x1e8] sm:$0xff] %v6369_v36  ;;  %vm6214_vm15 = vcmp.ge.f32.partialorder %v6142_v3, 0.0  ;;  %v6298_v1 = vmul.f32 %v9104_v20, %v6142_v3  ;;  %v7082_v12 = vadd.f32 %v5829_v7, %v3201_v5  ;;  %v5831_v33 = vpop.f32.mrb[65].mxu0 }
 0x3a5   : > { %vm6215_vm0 = vcmp.ge.f32.partialorder %v6143_v30, 0.0  ;;  %v6299_v60 = vmul.f32 %v9106_v14, %v6143_v30  ;;  %v7083_v50 = vadd.f32 %v5831_v33, %v3203_v40 }
 0x3a6   : > { %v6370_v17 = vsel %vm6214_vm15, %v6142_v3, %v6298_v1  ;;  %v6144_v24 = vadd.f32 %v7082_v12, %v9099_v10  ;;  %v3207_v53 = vpop.f32.mrb[66].mxu1 }
 0x3a7   : > { %6442 = vst [vmem:[%s9113_s30 + $0x1f0] sm:$0xff] %v6370_v17  ;;  %v6371_v42 = vsel %vm6215_vm0, %v6143_v30, %v6299_v60  ;;  %v6145_v27 = vadd.f32 %v7083_v50, %v9101_v15  ;;  %v5835_v16 = vpop.f32.mrb[66].mxu0  ;;  %v3209_v46 = vpop.f32.mrb[67].mxu1 }
 0x3a8   : > { %6443 = vst [vmem:[%s9113_s30 + $0x1f8] sm:$0xff] %v6371_v42  ;;  %vm6216_vm1 = vcmp.ge.f32.partialorder %v6144_v24, 0.0  ;;  %v6300_v4 = vmul.f32 %v9104_v20, %v6144_v24  ;;  %v7084_v29 = vadd.f32 %v5835_v16, %v3207_v53  ;;  %v5837_v19 = vpop.f32.mrb[67].mxu0 }
 0x3a9   : > { %vm6217_vm2 = vcmp.ge.f32.partialorder %v6145_v27, 0.0  ;;  %v6301_v63 = vmul.f32 %v9106_v14, %v6145_v27  ;;  %v7085_v35 = vadd.f32 %v5837_v19, %v3209_v46 }
 0x3aa   : > { %v6372_v23 = vsel %vm6216_vm1, %v6144_v24, %v6300_v4  ;;  %v6146_v59 = vadd.f32 %v7084_v29, %v9099_v10  ;;  %v3213_v37 = vpop.f32.mrb[68].mxu1 }
 0x3ab   : > { %6444 = vst [vmem:[%s9113_s30 + $0x200] sm:$0xff] %v6372_v23  ;;  %v6373_v45 = vsel %vm6217_vm2, %v6145_v27, %v6301_v63  ;;  %v6147_v38 = vadd.f32 %v7085_v35, %v9101_v15  ;;  %v5841_v11 = vpop.f32.mrb[68].mxu0  ;;  %v3215_v48 = vpop.f32.mrb[69].mxu1 }
 0x3ac   : > { %6445 = vst [vmem:[%s9113_s30 + $0x208] sm:$0xff] %v6373_v45  ;;  %vm6218_vm3 = vcmp.ge.f32.partialorder %v6146_v59, 0.0  ;;  %v6302_v57 = vmul.f32 %v9104_v20, %v6146_v59  ;;  %v7086_v13 = vadd.f32 %v5841_v11, %v3213_v37  ;;  %v5843_v18 = vpop.f32.mrb[69].mxu0 }
 0x3ad   : > { %vm6219_vm4 = vcmp.ge.f32.partialorder %v6147_v38, 0.0  ;;  %v6303_v26 = vmul.f32 %v9106_v14, %v6147_v38  ;;  %v7087_v31 = vadd.f32 %v5843_v18, %v3215_v48 }
 0x3ae   : > { %v6374_v39 = vsel %vm6218_vm3, %v6146_v59, %v6302_v57  ;;  %v6148_v49 = vadd.f32 %v7086_v13, %v9099_v10  ;;  %v3219_v22 = vpop.f32.mrb[70].mxu1 }
 0x3af   : > { %6446 = vst [vmem:[%s9113_s30 + $0x210] sm:$0xff] %v6374_v39  ;;  %v6375_v41 = vsel %vm6219_vm4, %v6147_v38, %v6303_v26  ;;  %v6149_v51 = vadd.f32 %v7087_v31, %v9101_v15  ;;  %v5847_v44 = vpop.f32.mrb[70].mxu0  ;;  %v3221_v28 = vpop.f32.mrb[71].mxu1 }
 0x3b0   : > { %6447 = vst [vmem:[%s9113_s30 + $0x218] sm:$0xff] %v6375_v41  ;;  %vm6220_vm5 = vcmp.ge.f32.partialorder %v6148_v49, 0.0  ;;  %v6304_v52 = vmul.f32 %v9104_v20, %v6148_v49  ;;  %v7088_v0 = vadd.f32 %v5847_v44, %v3219_v22  ;;  %v5849_v2 = vpop.f32.mrb[71].mxu0 }
 0x3b1   : > { %vm6221_vm6 = vcmp.ge.f32.partialorder %v6149_v51, 0.0  ;;  %v6305_v9 = vmul.f32 %v9106_v14, %v6149_v51  ;;  %v7089_v54 = vadd.f32 %v5849_v2, %v3221_v28 }
 0x3b2   : > { %v6376_v21 = vsel %vm6220_vm5, %v6148_v49, %v6304_v52  ;;  %v6150_v8 = vadd.f32 %v7088_v0, %v9099_v10 }
 0x3b3   : > { %6448 = vst [vmem:[%s9113_s30 + $0x220] sm:$0xff] %v6376_v21  ;;  %v6377_v58 = vsel %vm6221_vm6, %v6149_v51, %v6305_v9  ;;  %v6151_v32 = vadd.f32 %v7089_v54, %v9101_v15 }
 0x3b4   : > { %6449 = vst [vmem:[%s9113_s30 + $0x228] sm:$0xff] %v6377_v58  ;;  %vm6222_vm7 = vcmp.ge.f32.partialorder %v6150_v8, 0.0  ;;  %v6306_v25 = vmul.f32 %v9104_v20, %v6150_v8 }
 0x3b5   : > { %vm6223_vm8 = vcmp.ge.f32.partialorder %v6151_v32, 0.0  ;;  %v6307_v56 = vmul.f32 %v9106_v14, %v6151_v32 }
 0x3b6   : > { %v6378_v34 = vsel %vm6222_vm7, %v6150_v8, %v6306_v25 }
 0x3b7   : > { %6450 = vst [vmem:[%s9113_s30 + $0x230] sm:$0xff] %v6378_v34  ;;  %v6379_v43 = vsel %vm6223_vm8, %v6151_v32, %v6307_v56 }
 0x3b8   : > { %6451 = vst [vmem:[%s9113_s30 + $0x238] sm:$0xff] %v6379_v43 }
 0x3b9 PF: > { %s16_s15 = sadd.s32 1, %s7698_s15  }
 0x3ba   : > { %p13_p9 = scmp.ge.s32.totalorder %s16_s15, 4  }
 0x3bc   :  { %15 = sbr.rel (!%p13_p9) target bundleno = 2 (0x2), region = 75 }
 0x3c3   :  { %6473 = vsyncpa [#allocation4], 1 }
 0x3c4   :  { %6475 = vsyncpa [#allocation4 + $0x1], 1 }
 0x3c5   :  { %6476 = vsyncpa [#allocation6], 1 }

</bundles_post_ra>
